<compile_context>
chip_gen: v7x
topology: tpu7x:2x2x1
jax: 0.10.0
libtpu: 0.0.40
codegen_flags: <defaults>
</compile_context>

<pallas_src>
import math

import numpy as np
import jax
import jax.numpy as jnp
from jax import lax
from jax.experimental import pallas as pl
from jax.experimental.pallas import tpu as pltpu


_VMEM_LIMIT = 48 * 1024 * 1024   # fits v7x's 64 MiB physical VMEM with headroom
_NEG_INF = -1e30                 # finite "masked" bias (no -inf NaN corner case)


# ----------------------- sincos position embedding (init-time, numpy) --------
def get_1d_sincos_pos_embed_from_grid(embed_dim, pos):
    assert embed_dim % 2 == 0
    omega = np.arange(embed_dim // 2, dtype=np.float32)
    omega /= embed_dim / 2.0
    omega = 1.0 / 10000 ** omega
    pos = pos.reshape(-1)
    out = np.einsum('m,d->md', pos, omega)
    return np.concatenate([np.sin(out), np.cos(out)], axis=1)


def get_2d_sincos_pos_embed_from_grid(embed_dim, grid):
    assert embed_dim % 2 == 0
    emb_h = get_1d_sincos_pos_embed_from_grid(embed_dim // 2, grid[0])
    emb_w = get_1d_sincos_pos_embed_from_grid(embed_dim // 2, grid[1])
    return np.concatenate([emb_h, emb_w], axis=1)


def get_2d_sincos_pos_embed(embed_dim, grid_size, cls_token=False):
    grid_h = np.arange(grid_size, dtype=np.float32)
    grid_w = np.arange(grid_size, dtype=np.float32)
    grid = np.meshgrid(grid_w, grid_h)
    grid = np.stack(grid, axis=0).reshape([2, 1, grid_size, grid_size])
    pos_embed = get_2d_sincos_pos_embed_from_grid(embed_dim, grid)
    if cls_token:
        pos_embed = np.concatenate([np.zeros([1, embed_dim]), pos_embed], axis=0)
    return pos_embed


def get_abs_pos(abs_pos, tgt_size):
    src = int(math.sqrt(abs_pos.shape[0]))
    if (src, src) == (int(tgt_size[0]), int(tgt_size[1])):
        return abs_pos  # bicubic resize to the identical size is identity
    # TODO(synk): jax.image.resize 'bicubic' is not bit-identical to torch
    # F.interpolate(mode='bicubic', align_corners=False); close approximation.
    x = abs_pos.astype(jnp.float32).reshape(1, src, src, -1)
    x = jax.image.resize(x, (1, int(tgt_size[0]), int(tgt_size[1]), x.shape[-1]),
                         method='bicubic')
    return x.reshape(-1, abs_pos.shape[-1]).astype(abs_pos.dtype)


# ----------------------------- tiling helpers ---------------------------------
_BIG_VMEM = None


def _big_vmem():
    """True on 128-MiB-VMEM chips (v5e/v6e): allows larger matmul tiles."""
    global _BIG_VMEM
    if _BIG_VMEM is None:
        try:
            info = pltpu.get_tpu_info()
            _BIG_VMEM = int(getattr(info, "vmem_capacity_bytes", 0)) >= 100 * 2 ** 20
        except Exception:
            _BIG_VMEM = False   # conservative (v7x-safe) tiles
    return _BIG_VMEM


def _pick_tile(dim, candidates):
    """Largest candidate that divides dim; else the full dim (always legal)."""
    for c in candidates:
        if c <= dim and dim % c == 0:
            return c
    return dim


def _largest_divisor_tile(dim, cap, align):
    """Largest multiple of `align` that is <= cap and divides dim, or None."""
    t = (cap // align) * align
    while t >= align:
        if dim % t == 0:
            return t
        t -= align
    return None


def _round_up(x, m):
    return ((x + m - 1) // m) * m


# -------------------- tiled matmul (+ fused bias / LayerNorm) -----------------
def _make_matmul_kernel(has_bias, has_ln, eps):
    def kernel(*refs):
        x_ref, w_ref = refs[0], refs[1]
        i = 2
        b_ref = g_ref = be_ref = None
        if has_bias:
            b_ref = refs[i]; i += 1
        if has_ln:
            g_ref, be_ref = refs[i], refs[i + 1]; i += 2
        o_ref, acc_ref = refs[i], refs[i + 1]

        kk = pl.program_id(2)

        @pl.when(kk == 0)
        def _():
            acc_ref[...] = jnp.zeros_like(acc_ref)

        # activation tile cast to bf16 in-kernel (avoids a wrapper-side HBM pass)
        acc_ref[...] += jnp.dot(x_ref[...].astype(jnp.bfloat16), w_ref[...],
                                preferred_element_type=jnp.float32)

        @pl.when(kk == pl.num_programs(2) - 1)
        def _():
            out = acc_ref[...]
            if has_bias:
                out = out + b_ref[...]
            if has_ln:
                mu = jnp.mean(out, axis=-1, keepdims=True)
                xc = out - mu
                var = jnp.mean(xc * xc, axis=-1, keepdims=True)
                out = xc * lax.rsqrt(var + eps) * g_ref[...] + be_ref[...]
            o_ref[...] = out.astype(o_ref.dtype)

    return kernel


def pallas_matmul(x, w, bias=None, ln=None, out_dtype=jnp.float32, ln_eps=1e-6):
    """x: (M, K), w: (K, N) -> (M, N). Optional fused bias add + LayerNorm."""
    M, K = x.shape
    K2, Nout = w.shape
    assert K == K2
    if w.dtype != jnp.bfloat16:
        w = w.astype(jnp.bfloat16)          # weights are already bf16 from init

    big = _big_vmem()
    tm_c = (512, 256, 128, 64, 32, 16, 8) if big else (256, 128, 64, 32, 16, 8)
    tk_c = (1024, 512, 256, 128) if big else (512, 256, 128)
    tn_c = (1024, 512, 256, 128) if big else (512, 256, 128)

    tm = _pick_tile(M, tm_c)
    tk = _pick_tile(K, tk_c)
    # LayerNorm epilogue needs the full row resident in the output tile.
    tn = Nout if ln is not None else _pick_tile(Nout, tn_c)

    # Dual-TensorCore (v7x): ensure some "parallel" axis has >= 2 blocks.
    if (M // tm) * (Nout // tn) < 2:
        tm2 = _largest_divisor_tile(M, M // 2, 8)
        if tm2 is not None:
            tm = tm2
        elif ln is None:
            tn2 = _largest_divisor_tile(Nout, Nout // 2, 128)
            if tn2 is not None:
                tn = tn2

    in_specs = [pl.BlockSpec((tm, tk), lambda i, j, k: (i, k)),
                pl.BlockSpec((tk, tn), lambda i, j, k: (k, j))]
    args = [x, w]
    if bias is not None:
        in_specs.append(pl.BlockSpec((1, tn), lambda i, j, k: (0, j)))
        args.append(bias.reshape(1, Nout).astype(jnp.float32))
    if ln is not None:
        gamma, beta = ln
        in_specs.append(pl.BlockSpec((1, tn), lambda i, j, k: (0, j)))
        in_specs.append(pl.BlockSpec((1, tn), lambda i, j, k: (0, j)))
        args.append(gamma.reshape(1, Nout).astype(jnp.float32))
        args.append(beta.reshape(1, Nout).astype(jnp.float32))

    return pl.pallas_call(
        _make_matmul_kernel(bias is not None, ln is not None, ln_eps),
        out_shape=jax.ShapeDtypeStruct((M, Nout), out_dtype),
        grid=(M // tm, Nout // tn, K // tk),
        in_specs=in_specs,
        out_specs=pl.BlockSpec((tm, tn), lambda i, j, k: (i, j)),
        scratch_shapes=[pltpu.VMEM((tm, tn), jnp.float32)],
        compiler_params=pltpu.CompilerParams(
            dimension_semantics=("parallel", "parallel", "arbitrary"),
            vmem_limit_bytes=_VMEM_LIMIT),
    )(*args)


# ------------------------ flash-style multi-head attention --------------------
def _flash_kernel(q_ref, k_ref, v_ref, b_ref, o_ref, m_sc, l_sc, acc_sc):
    ki = pl.program_id(3)

    @pl.when(ki == 0)
    def _():
        m_sc[...] = jnp.full_like(m_sc, _NEG_INF)   # finite: no NaN when masked
        l_sc[...] = jnp.zeros_like(l_sc)
        acc_sc[...] = jnp.zeros_like(acc_sc)

    q = q_ref[...]            # (tq, hd) bf16 (scale pre-folded into Wq)
    k = k_ref[...]            # (tk, hd) bf16
    v = v_ref[...]            # (tk, hd) bf16
    bias = b_ref[...]         # (1, tk) f32 additive key bias (-1e30 == masked)

    s = lax.dot_general(q, k, (((1,), (1,)), ((), ())),
                        preferred_element_type=jnp.float32)          # (tq, tk)
    s = s + bias

    m_prev = m_sc[...]
    m_new = jnp.maximum(m_prev, jnp.max(s, axis=-1, keepdims=True))
    alpha = jnp.exp(m_prev - m_new)
    p = jnp.exp(s - m_new)
    l_sc[...] = alpha * l_sc[...] + jnp.sum(p, axis=-1, keepdims=True)
    acc_sc[...] = alpha * acc_sc[...] + lax.dot_general(
        p.astype(v.dtype), v, (((1,), (0,)), ((), ())),
        preferred_element_type=jnp.float32)
    m_sc[...] = m_new

    @pl.when(ki == pl.num_programs(3) - 1)
    def _():
        o_ref[...] = (acc_sc[...] *
                      pl.reciprocal(l_sc[...], approx=True)).astype(o_ref.dtype)


def pallas_flash_mha(q, k, v, key_bias, num_heads, *, k_head_off=0, v_head_off=0):
    """Multi-head attention with online softmax (pre-out-projection output).

    q: (N, Lq, D), D = num_heads * head_dim.
    k, v: (N, Lk, Dk); the heads used start at head offset k_head_off /
      v_head_off (in head_dim units) along the last axis -- so a packed
      (N, Lk, 2D) fused-KV tensor can be passed for both k and v (offsets 0
      and num_heads) with zero slicing passes.
    key_bias: (N, Lk) f32 additive bias (0 keep / -1e30 masked or padding).
    Returns (N, Lq, D) bf16.
    """
    N, Lq, D = q.shape
    Lk = k.shape[1]
    H = num_heads
    assert D % H == 0
    hd = D // H

    q = q.astype(jnp.bfloat16)
    k = k.astype(jnp.bfloat16)
    v = v.astype(jnp.bfloat16)
    bias3 = key_bias.reshape(N, 1, Lk).astype(jnp.float32)

    tq = _pick_tile(Lq, (128, 64, 32, 16, 8))     # cap score tile working set
    tk = _pick_tile(Lk, (256, 128))
    grid = (N, H, Lq // tq, Lk // tk)
    scratch = [pltpu.VMEM((tq, 1), jnp.float32),
               pltpu.VMEM((tq, 1), jnp.float32),
               pltpu.VMEM((tq, hd), jnp.float32)]
    cparams = pltpu.CompilerParams(
        dimension_semantics=("parallel", "parallel", "parallel", "arbitrary"),
        vmem_limit_bytes=_VMEM_LIMIT)

    if hd % 128 == 0:
        # Heads sliced directly out of (N, L, D): no XLA split/merge transposes,
        # output written straight into the (N, Lq, D) layout the GEMMs consume.
        return pl.pallas_call(
            _flash_kernel,
            out_shape=jax.ShapeDtypeStruct((N, Lq, D), jnp.bfloat16),
            grid=grid,
            in_specs=[
                pl.BlockSpec((None, tq, hd), lambda n, h, qi, ki: (n, qi, h)),
                pl.BlockSpec((None, tk, hd),
                             lambda n, h, qi, ki: (n, ki, h + k_head_off)),
                pl.BlockSpec((None, tk, hd),
                             lambda n, h, qi, ki: (n, ki, h + v_head_off)),
                pl.BlockSpec((None, 1, tk), lambda n, h, qi, ki: (n, 0, ki)),
            ],
            out_specs=pl.BlockSpec((None, tq, hd),
                                   lambda n, h, qi, ki: (n, qi, h)),
            scratch_shapes=scratch,
            compiler_params=cparams,
        )(q, k, v, bias3)

    # Fallback for head_dim < 128: explicit (N, H, L, hd) head layout.
    # TODO(synk): pack multiple heads along the lane axis (block-diagonal QK^T)
    # to avoid these transposes / partial-lane stores when head_dim < 128.
    def split_heads(t, off, L):
        t = t[:, :, off * hd: off * hd + D]
        return t.reshape(N, L, H, hd).transpose(0, 2, 1, 3)

    qh = q.reshape(N, Lq, H, hd).transpose(0, 2, 1, 3)
    kh = split_heads(k, k_head_off, Lk)
    vh = split_heads(v, v_head_off, Lk)

    out = pl.pallas_call(
        _flash_kernel,
        out_shape=jax.ShapeDtypeStruct((N, H, Lq, hd), jnp.bfloat16),
        grid=grid,
        in_specs=[
            pl.BlockSpec((None, None, tq, hd), lambda n, h, qi, ki: (n, h, qi, 0)),
            pl.BlockSpec((None, None, tk, hd), lambda n, h, qi, ki: (n, h, ki, 0)),
            pl.BlockSpec((None, None, tk, hd), lambda n, h, qi, ki: (n, h, ki, 0)),
            pl.BlockSpec((None, 1, tk), lambda n, h, qi, ki: (n, 0, ki)),
        ],
        out_specs=pl.BlockSpec((None, None, tq, hd),
                               lambda n, h, qi, ki: (n, h, qi, 0)),
        scratch_shapes=scratch,
        compiler_params=cparams,
    )(qh, kh, vh, bias3)
    return out.transpose(0, 2, 1, 3).reshape(N, Lq, D)


# --------------------------- parameters & forward ----------------------------
def init_params(key, grid_size, embed_dim, num_heads, llm_hidden_size):
    nq = grid_size ** 2
    hd = embed_dim // num_heads
    scale = 1.0 / math.sqrt(hd)
    ks = jax.random.split(key, 12)

    def nrm(k, shape, std=0.02):
        return (std * jax.random.normal(k, shape, jnp.float32))

    def mha_params(k, fuse_kv):
        k1, k2, k3 = jax.random.split(k, 3)
        in_w = nrm(k1, (3 * embed_dim, embed_dim))     # torch in_proj_weight layout
        in_b = nrm(k2, (3 * embed_dim,))
        out_w = nrm(k3, (embed_dim, embed_dim))        # torch out_proj.weight (out, in)
        out_b = jnp.zeros((embed_dim,), jnp.float32)
        wq, wk, wv = in_w[:embed_dim], in_w[embed_dim:2 * embed_dim], in_w[2 * embed_dim:]
        bq, bk, bv = in_b[:embed_dim], in_b[embed_dim:2 * embed_dim], in_b[2 * embed_dim:]
        # Stored transposed (in, out), bf16; 1/sqrt(hd) pre-folded into Wq / bq.
        p = dict(wq_t=(wq * scale).T.astype(jnp.bfloat16),
                 bq=(bq * scale).astype(jnp.float32),
                 wo_t=out_w.T.astype(jnp.bfloat16), bo=out_b)
        if fuse_kv:   # single (D, 2D) GEMM computes K and V over the same input
            p["wkv_t"] = jnp.concatenate([wk.T, wv.T], axis=1).astype(jnp.bfloat16)
            p["bkv"] = jnp.concatenate([bk, bv]).astype(jnp.float32)
        else:
            p.update(wk_t=wk.T.astype(jnp.bfloat16), bk=bk.astype(jnp.float32),
                     wv_t=wv.T.astype(jnp.bfloat16), bv=bv.astype(jnp.float32))
        return p

    def ln(ka, kb):
        return (1.0 + 0.1 * jax.random.normal(ka, (embed_dim,), jnp.float32),
                0.05 * jax.random.normal(kb, (embed_dim,), jnp.float32))

    kv_w = nrm(ks[1], (embed_dim, llm_hidden_size))    # torch Linear weight (out, in)
    return dict(
        pos_embed=jnp.asarray(get_2d_sincos_pos_embed(embed_dim, grid_size),
                              dtype=jnp.float16),       # module stores fp16
        query=nrm(ks[0], (nq, embed_dim), 0.02),
        kv_proj_w_t=kv_w.T.astype(jnp.bfloat16),
        self_attn=mha_params(ks[2], fuse_kv=True),
        attn=mha_params(ks[3], fuse_kv=False),
        ln_q=ln(ks[4], ks[5]),
        ln_kv=ln(ks[6], ks[7]),
        ln_post=ln(ks[8], ks[9]),
    )


def resampler_with_text_forward(params, x, text, attn_mask, num_heads,
                                tgt_size=(24, 24)):
    if x.ndim <= 2:
        x = x[None]
    if text.ndim <= 2:
        text = text[None]
        attn_mask = attn_mask[None]

    N, L_img, D = x.shape
    nq = params["query"].shape[0]
    H = num_heads

    if L_img != tgt_size[0] * tgt_size[1]:
        s = int(math.sqrt(L_img))
        tgt_size = (s, s)
    pos_interp = get_abs_pos(params["pos_embed"], tgt_size)          # (L_img, D)

    # ---- kv_proj (no bias) + ln_kv fused; text cast to bf16 inside the kernel
    L_txt = text.shape[1]
    t = pallas_matmul(text.reshape(N * L_txt, -1), params["kv_proj_w_t"],
                      bias=None, ln=params["ln_kv"], out_dtype=jnp.bfloat16)
    t = t.reshape(N, L_txt, D)

    # ---- self-attention over [queries ; text] (only the nq query rows) -------
    sa = params["self_attn"]
    query = jnp.broadcast_to(params["query"].astype(jnp.bfloat16)[None], (N, nq, D))
    Lk = nq + L_txt
    Lk_pad = _round_up(Lk, 128)                        # lane-aligned key tiles
    pad = Lk_pad - Lk
    kv_in = jnp.concatenate(
        [query, t, jnp.zeros((N, pad, D), jnp.bfloat16)], axis=1)    # (N, Lk_pad, D)
    bias_self = jnp.concatenate(
        [jnp.zeros((N, nq), jnp.float32),
         jnp.where(attn_mask, 0.0, _NEG_INF).astype(jnp.float32),
         jnp.full((N, pad), _NEG_INF, jnp.float32)], axis=1)         # (N, Lk_pad)

    q_sa = pallas_matmul(query.reshape(N * nq, D), sa["wq_t"],       # scale folded
                         bias=sa["bq"], out_dtype=jnp.bfloat16).reshape(N, nq, D)
    kv_sa = pallas_matmul(kv_in.reshape(N * Lk_pad, D), sa["wkv_t"], # fused K+V GEMM
                          bias=sa["bkv"],
                          out_dtype=jnp.bfloat16).reshape(N, Lk_pad, 2 * D)
    attn_sa = pallas_flash_mha(q_sa, kv_sa, kv_sa, bias_self, H,
                               k_head_off=0, v_head_off=H)
    # out-projection + ln_q fused; bf16 (only re-consumed in bf16 just below)
    query2 = pallas_matmul(attn_sa.reshape(N * nq, D), sa["wo_t"], bias=sa["bo"],
                           ln=params["ln_q"],
                           out_dtype=jnp.bfloat16).reshape(N, nq, D)

    # ---- cross-attention: (query + pos) attends over (x + pos_interp), value x
    ca = params["attn"]
    Lk_ca = _round_up(L_img, 128)
    pad_ca = Lk_ca - L_img
    q_in = query2 + params["pos_embed"].astype(jnp.bfloat16)[None]           # bf16 add
    k_core = x.astype(jnp.bfloat16) + pos_interp.astype(jnp.bfloat16)[None]  # bf16 add
    if pad_ca:
        k_in = jnp.pad(k_core, ((0, 0), (0, pad_ca), (0, 0)))
        v_in = jnp.pad(x.astype(jnp.bfloat16), ((0, 0), (0, pad_ca), (0, 0)))
    else:
        k_in, v_in = k_core, x           # x cast to bf16 inside the GEMM kernel
    bias_cross = jnp.concatenate(
        [jnp.zeros((N, L_img), jnp.float32),
         jnp.full((N, pad_ca), _NEG_INF, jnp.float32)], axis=1)

    q_ca = pallas_matmul(q_in.reshape(N * nq, D), ca["wq_t"],        # scale folded
                         bias=ca["bq"], out_dtype=jnp.bfloat16).reshape(N, nq, D)
    k_ca = pallas_matmul(k_in.reshape(N * Lk_ca, D), ca["wk_t"],
                         bias=ca["bk"], out_dtype=jnp.bfloat16).reshape(N, Lk_ca, D)
    v_ca = pallas_matmul(v_in.reshape(N * Lk_ca, D), ca["wv_t"],
                         bias=ca["bv"], out_dtype=jnp.bfloat16).reshape(N, Lk_ca, D)
    attn_ca = pallas_flash_mha(q_ca, k_ca, v_ca, bias_cross, H)
    # out-projection + ln_post fused; self.proj = nn.Identity() (use_post_proj=False)
    out = pallas_matmul(attn_ca.reshape(N * nq, D), ca["wo_t"], bias=ca["bo"],
                        ln=params["ln_post"],
                        out_dtype=jnp.float32).reshape(N, nq, D)
    return out


# ----------------------------------- demo ------------------------------------
if __name__ == "__main__":
    # head_dim = 128 -> exercises the transpose-free head-sliced flash path.
    grid_size, embed_dim, num_heads, llm_hidden = 4, 256, 2, 512
    N, L_txt = 2, 8
    L_img = grid_size ** 2

    key = jax.random.PRNGKey(0)
    kp, kx, kt = jax.random.split(key, 3)
    params = init_params(kp, grid_size, embed_dim, num_heads, llm_hidden)

    x = jax.random.normal(kx, (N, L_img, embed_dim), jnp.float32)
    text = jax.random.normal(kt, (N, L_txt, llm_hidden), jnp.float32)
    attn_mask = jnp.array([[True] * 6 + [False] * 2,
                           [True] * 8], dtype=jnp.bool_)             # True = real token

    fwd = jax.jit(resampler_with_text_forward,
                  static_argnames=("num_heads", "tgt_size"))
    out = fwd(params, x, text, attn_mask, num_heads=num_heads)
    out = jax.block_until_ready(out)

    assert out.shape == (N, grid_size ** 2, embed_dim), out.shape
    assert bool(jnp.all(jnp.isfinite(out)))
    print("KERNEL_OK")
</pallas_src>

<mosaic_0001>
module attributes {stable_mosaic.version = 11 : i64} {
  func.func @kernel(%arg0: i32, %arg1: i32, %arg2: i32, %arg3: memref<8x512xf32, #tpu.memory_space<vmem>>, %arg4: memref<512x256xbf16, #tpu.memory_space<vmem>>, %arg5: memref<1x256xf32, #tpu.memory_space<vmem>>, %arg6: memref<1x256xf32, #tpu.memory_space<vmem>>, %arg7: memref<8x256xbf16, #tpu.memory_space<vmem>>, %arg8: memref<8x256xf32, #tpu.memory_space<vmem>>) attributes {dimension_semantics = [#tpu.dimension_semantics<parallel>, #tpu.dimension_semantics<parallel>, #tpu.dimension_semantics<arbitrary>], iteration_bounds = array<i64: 2, 1, 1>, scalar_prefetch = 0 : i64, scratch_operands = 1 : i64, tpu.core_type = #tpu.core_type<tc>, window_params = [{transform_indices = @transform_0, window_bounds = array<i64: 8, 512>}, {transform_indices = @transform_1, window_bounds = array<i64: 512, 256>}, {transform_indices = @transform_2, window_bounds = array<i64: 1, 256>}, {transform_indices = @transform_3, window_bounds = array<i64: 1, 256>}, {transform_indices = @transform_4, window_bounds = array<i64: 8, 256>}]} {
    %c0_i32 = arith.constant 0 : i32
    %0 = arith.cmpi eq, %arg2, %c0_i32 : i32
    %1 = arith.extui %0 : i1 to i32
    %c0_i32_0 = arith.constant 0 : i32
    %2 = arith.cmpi ne, %1, %c0_i32_0 : i32
    scf.if %2 {
      %cst_10 = arith.constant 0.000000e+00 : f32
      %13 = vector.broadcast %cst_10 : f32 to vector<8x256xf32>
      %c0_11 = arith.constant 0 : index
      %c0_12 = arith.constant 0 : index
      %14 = vector.load %arg8[%c0_11, %c0_12] : memref<8x256xf32, #tpu.memory_space<vmem>>, vector<8x256xf32>
      tpu.vector_store %arg8[%c0_11, %c0_12], %13 {strides = array<i32>} : memref<8x256xf32, #tpu.memory_space<vmem>>, vector<8x256xf32>,
    } else {
    }
    %c0 = arith.constant 0 : index
    %c0_1 = arith.constant 0 : index
    %3 = vector.load %arg8[%c0, %c0_1] : memref<8x256xf32, #tpu.memory_space<vmem>>, vector<8x256xf32>
    %c0_2 = arith.constant 0 : index
    %c0_3 = arith.constant 0 : index
    %4 = vector.load %arg3[%c0_2, %c0_3] : memref<8x512xf32, #tpu.memory_space<vmem>>, vector<8x512xf32>
    %5 = arith.truncf %4 : vector<8x512xf32> to vector<8x512xbf16>
    %c0_4 = arith.constant 0 : index
    %c0_5 = arith.constant 0 : index
    %6 = vector.load %arg4[%c0_4, %c0_5] : memref<512x256xbf16, #tpu.memory_space<vmem>>, vector<512x256xbf16>
    %cst = arith.constant dense<0.000000e+00> : vector<8x256xf32>
    %7 = tpu.matmul %5, %6, %cst {dimension_numbers = #tpu.dot_dimension_numbers<[1], [0], [0], [1], [0, 0, 1, 1], [], []>} : vector<8x512xbf16>, vector<512x256xbf16>, vector<8x256xf32> -> vector<8x256xf32>
    %8 = arith.addf %3, %7 : vector<8x256xf32>
    %c0_6 = arith.constant 0 : index
    %c0_7 = arith.constant 0 : index
    %9 = vector.load %arg8[%c0_6, %c0_7] : memref<8x256xf32, #tpu.memory_space<vmem>>, vector<8x256xf32>
    tpu.vector_store %arg8[%c0_6, %c0_7], %8 {strides = array<i32>} : memref<8x256xf32, #tpu.memory_space<vmem>>, vector<8x256xf32>,
    %c0_i32_8 = arith.constant 0 : i32
    %10 = arith.cmpi eq, %arg2, %c0_i32_8 : i32
    %11 = arith.extui %10 : i1 to i32
    %c0_i32_9 = arith.constant 0 : i32
    %12 = arith.cmpi ne, %11, %c0_i32_9 : i32
    scf.if %12 {
      %c0_10 = arith.constant 0 : index
      %c0_11 = arith.constant 0 : index
      %13 = vector.load %arg8[%c0_10, %c0_11] : memref<8x256xf32, #tpu.memory_space<vmem>>, vector<8x256xf32>
      %cst_12 = arith.constant dense<0.000000e+00> : vector<8xf32>
      %14 = vector.multi_reduction <add>, %13, %cst_12 [1] : vector<8x256xf32> to vector<8xf32>
      %15 = vector.shape_cast %14 : vector<8xf32> to vector<8x1xf32>
      %cst_13 = arith.constant 2.560000e+02 : f32
      %16 = vector.broadcast %cst_13 : f32 to vector<8x1xf32>
      %17 = arith.divf %15, %16 : vector<8x1xf32>
      %18 = vector.broadcast %17 : vector<8x1xf32> to vector<8x256xf32>
      %19 = arith.subf %13, %18 : vector<8x256xf32>
      %20 = arith.mulf %19, %19 : vector<8x256xf32>
      %cst_14 = arith.constant dense<0.000000e+00> : vector<8xf32>
      %21 = vector.multi_reduction <add>, %20, %cst_14 [1] : vector<8x256xf32> to vector<8xf32>
      %22 = vector.shape_cast %21 : vector<8xf32> to vector<8x1xf32>
      %cst_15 = arith.constant 2.560000e+02 : f32
      %23 = vector.broadcast %cst_15 : f32 to vector<8x1xf32>
      %24 = arith.divf %22, %23 : vector<8x1xf32>
      %cst_16 = arith.constant 9.99999997E-7 : f32
      %25 = vector.broadcast %cst_16 : f32 to vector<8x1xf32>
      %26 = arith.addf %24, %25 : vector<8x1xf32>
      %27 = math.rsqrt %26 : vector<8x1xf32>
      %28 = vector.broadcast %27 : vector<8x1xf32> to vector<8x256xf32>
      %29 = arith.mulf %19, %28 : vector<8x256xf32>
      %c0_17 = arith.constant 0 : index
      %c0_18 = arith.constant 0 : index
      %30 = vector.load %arg5[%c0_17, %c0_18] : memref<1x256xf32, #tpu.memory_space<vmem>>, vector<1x256xf32>
      %31 = vector.broadcast %30 : vector<1x256xf32> to vector<8x256xf32>
      %32 = arith.mulf %29, %31 : vector<8x256xf32>
      %c0_19 = arith.constant 0 : index
      %c0_20 = arith.constant 0 : index
      %33 = vector.load %arg6[%c0_19, %c0_20] : memref<1x256xf32, #tpu.memory_space<vmem>>, vector<1x256xf32>
      %34 = vector.broadcast %33 : vector<1x256xf32> to vector<8x256xf32>
      %35 = arith.addf %32, %34 : vector<8x256xf32>
      %36 = arith.truncf %35 : vector<8x256xf32> to vector<8x256xbf16>
      %c0_21 = arith.constant 0 : index
      %c0_22 = arith.constant 0 : index
      %37 = vector.load %arg7[%c0_21, %c0_22] : memref<8x256xbf16, #tpu.memory_space<vmem>>, vector<8x256xbf16>
      tpu.vector_store %arg7[%c0_21, %c0_22], %36 {strides = array<i32>} : memref<8x256xbf16, #tpu.memory_space<vmem>>, vector<8x256xbf16>,
    } else {
    }
    return
  }
  func.func @transform_0(%arg0: i32, %arg1: i32, %arg2: i32) -> (i32, i32) {
    %c0_i32 = arith.constant 0 : i32
    return %arg0, %arg2 : i32, i32
  }
  func.func @transform_1(%arg0: i32, %arg1: i32, %arg2: i32) -> (i32, i32) {
    %c0_i32 = arith.constant 0 : i32
    return %arg2, %arg1 : i32, i32
  }
  func.func @transform_2(%arg0: i32, %arg1: i32, %arg2: i32) -> (i32, i32) {
    %c0_i32 = arith.constant 0 : i32
    %c0_i32_0 = arith.constant 0 : i32
    return %c0_i32, %arg1 : i32, i32
  }
  func.func @transform_3(%arg0: i32, %arg1: i32, %arg2: i32) -> (i32, i32) {
    %c0_i32 = arith.constant 0 : i32
    %c0_i32_0 = arith.constant 0 : i32
    return %c0_i32, %arg1 : i32, i32
  }
  func.func @transform_4(%arg0: i32, %arg1: i32, %arg2: i32) -> (i32, i32) {
    %c0_i32 = arith.constant 0 : i32
    return %arg0, %arg1 : i32, i32
  }
}

module attributes {stable_mosaic.version = 11 : i64} {
  func.func @kernel(%arg0: i32, %arg1: i32, %arg2: i32, %arg3: memref<128x256xbf16, #tpu.memory_space<vmem>>, %arg4: memref<256x512xbf16, #tpu.memory_space<vmem>>, %arg5: memref<1x512xf32, #tpu.memory_space<vmem>>, %arg6: memref<128x512xbf16, #tpu.memory_space<vmem>>, %arg7: memref<128x512xf32, #tpu.memory_space<vmem>>) attributes {dimension_semantics = [#tpu.dimension_semantics<parallel>, #tpu.dimension_semantics<parallel>, #tpu.dimension_semantics<arbitrary>], iteration_bounds = array<i64: 2, 1, 1>, scalar_prefetch = 0 : i64, scratch_operands = 1 : i64, tpu.core_type = #tpu.core_type<tc>, window_params = [{transform_indices = @transform_0, window_bounds = array<i64: 128, 256>}, {transform_indices = @transform_1, window_bounds = array<i64: 256, 512>}, {transform_indices = @transform_2, window_bounds = array<i64: 1, 512>}, {transform_indices = @transform_3, window_bounds = array<i64: 128, 512>}]} {
    %c0_i32 = arith.constant 0 : i32
    %0 = arith.cmpi eq, %arg2, %c0_i32 : i32
    %1 = arith.extui %0 : i1 to i32
    %c0_i32_0 = arith.constant 0 : i32
    %2 = arith.cmpi ne, %1, %c0_i32_0 : i32
    scf.if %2 {
      %cst_10 = arith.constant 0.000000e+00 : f32
      %12 = vector.broadcast %cst_10 : f32 to vector<128x512xf32>
      %c0_11 = arith.constant 0 : index
      %c0_12 = arith.constant 0 : index
      %13 = vector.load %arg7[%c0_11, %c0_12] : memref<128x512xf32, #tpu.memory_space<vmem>>, vector<128x512xf32>
      tpu.vector_store %arg7[%c0_11, %c0_12], %12 {strides = array<i32>} : memref<128x512xf32, #tpu.memory_space<vmem>>, vector<128x512xf32>,
    } else {
    }
    %c0 = arith.constant 0 : index
    %c0_1 = arith.constant 0 : index
    %3 = vector.load %arg7[%c0, %c0_1] : memref<128x512xf32, #tpu.memory_space<vmem>>, vector<128x512xf32>
    %c0_2 = arith.constant 0 : index
    %c0_3 = arith.constant 0 : index
    %4 = vector.load %arg3[%c0_2, %c0_3] : memref<128x256xbf16, #tpu.memory_space<vmem>>, vector<128x256xbf16>
    %c0_4 = arith.constant 0 : index
    %c0_5 = arith.constant 0 : index
    %5 = vector.load %arg4[%c0_4, %c0_5] : memref<256x512xbf16, #tpu.memory_space<vmem>>, vector<256x512xbf16>
    %cst = arith.constant dense<0.000000e+00> : vector<128x512xf32>
    %6 = tpu.matmul %4, %5, %cst {dimension_numbers = #tpu.dot_dimension_numbers<[1], [0], [0], [1], [0, 0, 1, 1], [], []>} : vector<128x256xbf16>, vector<256x512xbf16>, vector<128x512xf32> -> vector<128x512xf32>
    %7 = arith.addf %3, %6 : vector<128x512xf32>
    %c0_6 = arith.constant 0 : index
    %c0_7 = arith.constant 0 : index
    %8 = vector.load %arg7[%c0_6, %c0_7] : memref<128x512xf32, #tpu.memory_space<vmem>>, vector<128x512xf32>
    tpu.vector_store %arg7[%c0_6, %c0_7], %7 {strides = array<i32>} : memref<128x512xf32, #tpu.memory_space<vmem>>, vector<128x512xf32>,
    %c0_i32_8 = arith.constant 0 : i32
    %9 = arith.cmpi eq, %arg2, %c0_i32_8 : i32
    %10 = arith.extui %9 : i1 to i32
    %c0_i32_9 = arith.constant 0 : i32
    %11 = arith.cmpi ne, %10, %c0_i32_9 : i32
    scf.if %11 {
      %c0_10 = arith.constant 0 : index
      %c0_11 = arith.constant 0 : index
      %12 = vector.load %arg7[%c0_10, %c0_11] : memref<128x512xf32, #tpu.memory_space<vmem>>, vector<128x512xf32>
      %c0_12 = arith.constant 0 : index
      %c0_13 = arith.constant 0 : index
      %13 = vector.load %arg5[%c0_12, %c0_13] : memref<1x512xf32, #tpu.memory_space<vmem>>, vector<1x512xf32>
      %14 = vector.broadcast %13 : vector<1x512xf32> to vector<128x512xf32>
      %15 = arith.addf %12, %14 : vector<128x512xf32>
      %16 = arith.truncf %15 : vector<128x512xf32> to vector<128x512xbf16>
      %c0_14 = arith.constant 0 : index
      %c0_15 = arith.constant 0 : index
      %17 = vector.load %arg6[%c0_14, %c0_15] : memref<128x512xbf16, #tpu.memory_space<vmem>>, vector<128x512xbf16>
      tpu.vector_store %arg6[%c0_14, %c0_15], %16 {strides = array<i32>} : memref<128x512xbf16, #tpu.memory_space<vmem>>, vector<128x512xbf16>,
    } else {
    }
    return
  }
  func.func @transform_0(%arg0: i32, %arg1: i32, %arg2: i32) -> (i32, i32) {
    %c0_i32 = arith.constant 0 : i32
    return %arg0, %arg2 : i32, i32
  }
  func.func @transform_1(%arg0: i32, %arg1: i32, %arg2: i32) -> (i32, i32) {
    %c0_i32 = arith.constant 0 : i32
    return %arg2, %arg1 : i32, i32
  }
  func.func @transform_2(%arg0: i32, %arg1: i32, %arg2: i32) -> (i32, i32) {
    %c0_i32 = arith.constant 0 : i32
    %c0_i32_0 = arith.constant 0 : i32
    return %c0_i32, %arg1 : i32, i32
  }
  func.func @transform_3(%arg0: i32, %arg1: i32, %arg2: i32) -> (i32, i32) {
    %c0_i32 = arith.constant 0 : i32
    return %arg0, %arg1 : i32, i32
  }
}

module attributes {stable_mosaic.version = 11 : i64} {
  func.func @kernel(%arg0: i32, %arg1: i32, %arg2: i32, %arg3: memref<16x256xbf16, #tpu.memory_space<vmem>>, %arg4: memref<256x256xbf16, #tpu.memory_space<vmem>>, %arg5: memref<1x256xf32, #tpu.memory_space<vmem>>, %arg6: memref<16x256xbf16, #tpu.memory_space<vmem>>, %arg7: memref<16x256xf32, #tpu.memory_space<vmem>>) attributes {dimension_semantics = [#tpu.dimension_semantics<parallel>, #tpu.dimension_semantics<parallel>, #tpu.dimension_semantics<arbitrary>], iteration_bounds = array<i64: 2, 1, 1>, scalar_prefetch = 0 : i64, scratch_operands = 1 : i64, tpu.core_type = #tpu.core_type<tc>, window_params = [{transform_indices = @transform_0, window_bounds = array<i64: 16, 256>}, {transform_indices = @transform_1, window_bounds = array<i64: 256, 256>}, {transform_indices = @transform_2, window_bounds = array<i64: 1, 256>}, {transform_indices = @transform_3, window_bounds = array<i64: 16, 256>}]} {
    %c0_i32 = arith.constant 0 : i32
    %0 = arith.cmpi eq, %arg2, %c0_i32 : i32
    %1 = arith.extui %0 : i1 to i32
    %c0_i32_0 = arith.constant 0 : i32
    %2 = arith.cmpi ne, %1, %c0_i32_0 : i32
    scf.if %2 {
      %cst_10 = arith.constant 0.000000e+00 : f32
      %12 = vector.broadcast %cst_10 : f32 to vector<16x256xf32>
      %c0_11 = arith.constant 0 : index
      %c0_12 = arith.constant 0 : index
      %13 = vector.load %arg7[%c0_11, %c0_12] : memref<16x256xf32, #tpu.memory_space<vmem>>, vector<16x256xf32>
      tpu.vector_store %arg7[%c0_11, %c0_12], %12 {strides = array<i32>} : memref<16x256xf32, #tpu.memory_space<vmem>>, vector<16x256xf32>,
    } else {
    }
    %c0 = arith.constant 0 : index
    %c0_1 = arith.constant 0 : index
    %3 = vector.load %arg7[%c0, %c0_1] : memref<16x256xf32, #tpu.memory_space<vmem>>, vector<16x256xf32>
    %c0_2 = arith.constant 0 : index
    %c0_3 = arith.constant 0 : index
    %4 = vector.load %arg3[%c0_2, %c0_3] : memref<16x256xbf16, #tpu.memory_space<vmem>>, vector<16x256xbf16>
    %c0_4 = arith.constant 0 : index
    %c0_5 = arith.constant 0 : index
    %5 = vector.load %arg4[%c0_4, %c0_5] : memref<256x256xbf16, #tpu.memory_space<vmem>>, vector<256x256xbf16>
    %cst = arith.constant dense<0.000000e+00> : vector<16x256xf32>
    %6 = tpu.matmul %4, %5, %cst {dimension_numbers = #tpu.dot_dimension_numbers<[1], [0], [0], [1], [0, 0, 1, 1], [], []>} : vector<16x256xbf16>, vector<256x256xbf16>, vector<16x256xf32> -> vector<16x256xf32>
    %7 = arith.addf %3, %6 : vector<16x256xf32>
    %c0_6 = arith.constant 0 : index
    %c0_7 = arith.constant 0 : index
    %8 = vector.load %arg7[%c0_6, %c0_7] : memref<16x256xf32, #tpu.memory_space<vmem>>, vector<16x256xf32>
    tpu.vector_store %arg7[%c0_6, %c0_7], %7 {strides = array<i32>} : memref<16x256xf32, #tpu.memory_space<vmem>>, vector<16x256xf32>,
    %c0_i32_8 = arith.constant 0 : i32
    %9 = arith.cmpi eq, %arg2, %c0_i32_8 : i32
    %10 = arith.extui %9 : i1 to i32
    %c0_i32_9 = arith.constant 0 : i32
    %11 = arith.cmpi ne, %10, %c0_i32_9 : i32
    scf.if %11 {
      %c0_10 = arith.constant 0 : index
      %c0_11 = arith.constant 0 : index
      %12 = vector.load %arg7[%c0_10, %c0_11] : memref<16x256xf32, #tpu.memory_space<vmem>>, vector<16x256xf32>
      %c0_12 = arith.constant 0 : index
      %c0_13 = arith.constant 0 : index
      %13 = vector.load %arg5[%c0_12, %c0_13] : memref<1x256xf32, #tpu.memory_space<vmem>>, vector<1x256xf32>
      %14 = vector.broadcast %13 : vector<1x256xf32> to vector<16x256xf32>
      %15 = arith.addf %12, %14 : vector<16x256xf32>
      %16 = arith.truncf %15 : vector<16x256xf32> to vector<16x256xbf16>
      %c0_14 = arith.constant 0 : index
      %c0_15 = arith.constant 0 : index
      %17 = vector.load %arg6[%c0_14, %c0_15] : memref<16x256xbf16, #tpu.memory_space<vmem>>, vector<16x256xbf16>
      tpu.vector_store %arg6[%c0_14, %c0_15], %16 {strides = array<i32>} : memref<16x256xbf16, #tpu.memory_space<vmem>>, vector<16x256xbf16>,
    } else {
    }
    return
  }
  func.func @transform_0(%arg0: i32, %arg1: i32, %arg2: i32) -> (i32, i32) {
    %c0_i32 = arith.constant 0 : i32
    return %arg0, %arg2 : i32, i32
  }
  func.func @transform_1(%arg0: i32, %arg1: i32, %arg2: i32) -> (i32, i32) {
    %c0_i32 = arith.constant 0 : i32
    return %arg2, %arg1 : i32, i32
  }
  func.func @transform_2(%arg0: i32, %arg1: i32, %arg2: i32) -> (i32, i32) {
    %c0_i32 = arith.constant 0 : i32
    %c0_i32_0 = arith.constant 0 : i32
    return %c0_i32, %arg1 : i32, i32
  }
  func.func @transform_3(%arg0: i32, %arg1: i32, %arg2: i32) -> (i32, i32) {
    %c0_i32 = arith.constant 0 : i32
    return %arg0, %arg1 : i32, i32
  }
}

module attributes {stable_mosaic.version = 11 : i64} {
  func.func @_flash_kernel(%arg0: i32, %arg1: i32, %arg2: i32, %arg3: i32, %arg4: memref<1x16x128xbf16, #tpu.memory_space<vmem>>, %arg5: memref<1x128x128xbf16, #tpu.memory_space<vmem>>, %arg6: memref<1x128x128xbf16, #tpu.memory_space<vmem>>, %arg7: memref<1x1x128xf32, #tpu.memory_space<vmem>>, %arg8: memref<1x16x128xbf16, #tpu.memory_space<vmem>>, %arg9: memref<16x1xf32, #tpu.memory_space<vmem>>, %arg10: memref<16x1xf32, #tpu.memory_space<vmem>>, %arg11: memref<16x128xf32, #tpu.memory_space<vmem>>) attributes {dimension_semantics = [#tpu.dimension_semantics<parallel>, #tpu.dimension_semantics<parallel>, #tpu.dimension_semantics<parallel>, #tpu.dimension_semantics<arbitrary>], iteration_bounds = array<i64: 2, 2, 1, 1>, scalar_prefetch = 0 : i64, scratch_operands = 3 : i64, tpu.core_type = #tpu.core_type<tc>, window_params = [{transform_indices = @transform_0, window_bounds = array<i64: 1, 16, 128>}, {transform_indices = @transform_1, window_bounds = array<i64: 1, 128, 128>}, {transform_indices = @transform_2, window_bounds = array<i64: 1, 128, 128>}, {transform_indices = @transform_3, window_bounds = array<i64: 1, 1, 128>}, {transform_indices = @transform_4, window_bounds = array<i64: 1, 16, 128>}]} {
    %c0_i32 = arith.constant 0 : i32
    %0 = arith.cmpi eq, %arg3, %c0_i32 : i32
    %1 = arith.extui %0 : i1 to i32
    %c0_i32_0 = arith.constant 0 : i32
    %2 = arith.cmpi ne, %1, %c0_i32_0 : i32
    scf.if %2 {
      %cst_29 = arith.constant -1.000000e+30 : f32
      %40 = vector.broadcast %cst_29 : f32 to vector<16x1xf32>
      %c0_30 = arith.constant 0 : index
      %c0_31 = arith.constant 0 : index
      %41 = vector.load %arg9[%c0_30, %c0_31] : memref<16x1xf32, #tpu.memory_space<vmem>>, vector<16x1xf32>
      tpu.vector_store %arg9[%c0_30, %c0_31], %40 {strides = array<i32>} : memref<16x1xf32, #tpu.memory_space<vmem>>, vector<16x1xf32>,
      %cst_32 = arith.constant 0.000000e+00 : f32
      %42 = vector.broadcast %cst_32 : f32 to vector<16x1xf32>
      %c0_33 = arith.constant 0 : index
      %c0_34 = arith.constant 0 : index
      %43 = vector.load %arg10[%c0_33, %c0_34] : memref<16x1xf32, #tpu.memory_space<vmem>>, vector<16x1xf32>
      tpu.vector_store %arg10[%c0_33, %c0_34], %42 {strides = array<i32>} : memref<16x1xf32, #tpu.memory_space<vmem>>, vector<16x1xf32>,
      %cst_35 = arith.constant 0.000000e+00 : f32
      %44 = vector.broadcast %cst_35 : f32 to vector<16x128xf32>
      %c0_36 = arith.constant 0 : index
      %c0_37 = arith.constant 0 : index
      %45 = vector.load %arg11[%c0_36, %c0_37] : memref<16x128xf32, #tpu.memory_space<vmem>>, vector<16x128xf32>
      tpu.vector_store %arg11[%c0_36, %c0_37], %44 {strides = array<i32>} : memref<16x128xf32, #tpu.memory_space<vmem>>, vector<16x128xf32>,
    } else {
    }
    %c0 = arith.constant 0 : index
    %c0_1 = arith.constant 0 : index
    %c0_2 = arith.constant 0 : index
    %3 = vector.load %arg4[%c0, %c0_1, %c0_2] : memref<1x16x128xbf16, #tpu.memory_space<vmem>>, vector<1x16x128xbf16>
    %4 = vector.shape_cast %3 : vector<1x16x128xbf16> to vector<16x128xbf16>
    %c0_3 = arith.constant 0 : index
    %c0_4 = arith.constant 0 : index
    %c0_5 = arith.constant 0 : index
    %5 = vector.load %arg5[%c0_3, %c0_4, %c0_5] : memref<1x128x128xbf16, #tpu.memory_space<vmem>>, vector<1x128x128xbf16>
    %6 = vector.shape_cast %5 : vector<1x128x128xbf16> to vector<128x128xbf16>
    %c0_6 = arith.constant 0 : index
    %c0_7 = arith.constant 0 : index
    %c0_8 = arith.constant 0 : index
    %7 = vector.load %arg6[%c0_6, %c0_7, %c0_8] : memref<1x128x128xbf16, #tpu.memory_space<vmem>>, vector<1x128x128xbf16>
    %8 = vector.shape_cast %7 : vector<1x128x128xbf16> to vector<128x128xbf16>
    %c0_9 = arith.constant 0 : index
    %c0_10 = arith.constant 0 : index
    %c0_11 = arith.constant 0 : index
    %9 = vector.load %arg7[%c0_9, %c0_10, %c0_11] : memref<1x1x128xf32, #tpu.memory_space<vmem>>, vector<1x1x128xf32>
    %10 = vector.shape_cast %9 : vector<1x1x128xf32> to vector<1x128xf32>
    %cst = arith.constant dense<0.000000e+00> : vector<16x128xf32>
    %11 = tpu.matmul %4, %6, %cst {dimension_numbers = #tpu.dot_dimension_numbers<[1], [1], [0], [0], [0, 0, 1, 0], [], []>} : vector<16x128xbf16>, vector<128x128xbf16>, vector<16x128xf32> -> vector<16x128xf32>
    %12 = vector.broadcast %10 : vector<1x128xf32> to vector<16x128xf32>
    %13 = arith.addf %11, %12 : vector<16x128xf32>
    %c0_12 = arith.constant 0 : index
    %c0_13 = arith.constant 0 : index
    %14 = vector.load %arg9[%c0_12, %c0_13] : memref<16x1xf32, #tpu.memory_space<vmem>>, vector<16x1xf32>
    %cst_14 = arith.constant dense<0xFF800000> : vector<16xf32>
    %15 = vector.multi_reduction <maximumf>, %13, %cst_14 [1] : vector<16x128xf32> to vector<16xf32>
    %16 = vector.shape_cast %15 : vector<16xf32> to vector<16x1xf32>
    %17 = arith.maximumf %14, %16 : vector<16x1xf32>
    %18 = arith.subf %14, %17 : vector<16x1xf32>
    %19 = math.exp %18 : vector<16x1xf32>
    %20 = vector.broadcast %17 : vector<16x1xf32> to vector<16x128xf32>
    %21 = arith.subf %13, %20 : vector<16x128xf32>
    %22 = math.exp %21 : vector<16x128xf32>
    %c0_15 = arith.constant 0 : index
    %c0_16 = arith.constant 0 : index
    %23 = vector.load %arg10[%c0_15, %c0_16] : memref<16x1xf32, #tpu.memory_space<vmem>>, vector<16x1xf32>
    %24 = arith.mulf %19, %23 : vector<16x1xf32>
    %cst_17 = arith.constant dense<0.000000e+00> : vector<16xf32>
    %25 = vector.multi_reduction <add>, %22, %cst_17 [1] : vector<16x128xf32> to vector<16xf32>
    %26 = vector.shape_cast %25 : vector<16xf32> to vector<16x1xf32>
    %27 = arith.addf %24, %26 : vector<16x1xf32>
    %c0_18 = arith.constant 0 : index
    %c0_19 = arith.constant 0 : index
    %28 = vector.load %arg10[%c0_18, %c0_19] : memref<16x1xf32, #tpu.memory_space<vmem>>, vector<16x1xf32>
    tpu.vector_store %arg10[%c0_18, %c0_19], %27 {strides = array<i32>} : memref<16x1xf32, #tpu.memory_space<vmem>>, vector<16x1xf32>,
    %c0_20 = arith.constant 0 : index
    %c0_21 = arith.constant 0 : index
    %29 = vector.load %arg11[%c0_20, %c0_21] : memref<16x128xf32, #tpu.memory_space<vmem>>, vector<16x128xf32>
    %30 = vector.broadcast %19 : vector<16x1xf32> to vector<16x128xf32>
    %31 = arith.mulf %30, %29 : vector<16x128xf32>
    %32 = arith.truncf %22 : vector<16x128xf32> to vector<16x128xbf16>
    %cst_22 = arith.constant dense<0.000000e+00> : vector<16x128xf32>
    %33 = tpu.matmul %32, %8, %cst_22 {dimension_numbers = #tpu.dot_dimension_numbers<[1], [0], [0], [1], [0, 0, 1, 1], [], []>} : vector<16x128xbf16>, vector<128x128xbf16>, vector<16x128xf32> -> vector<16x128xf32>
    %34 = arith.addf %31, %33 : vector<16x128xf32>
    %c0_23 = arith.constant 0 : index
    %c0_24 = arith.constant 0 : index
    %35 = vector.load %arg11[%c0_23, %c0_24] : memref<16x128xf32, #tpu.memory_space<vmem>>, vector<16x128xf32>
    tpu.vector_store %arg11[%c0_23, %c0_24], %34 {strides = array<i32>} : memref<16x128xf32, #tpu.memory_space<vmem>>, vector<16x128xf32>,
    %c0_25 = arith.constant 0 : index
    %c0_26 = arith.constant 0 : index
    %36 = vector.load %arg9[%c0_25, %c0_26] : memref<16x1xf32, #tpu.memory_space<vmem>>, vector<16x1xf32>
    tpu.vector_store %arg9[%c0_25, %c0_26], %17 {strides = array<i32>} : memref<16x1xf32, #tpu.memory_space<vmem>>, vector<16x1xf32>,
    %c0_i32_27 = arith.constant 0 : i32
    %37 = arith.cmpi eq, %arg3, %c0_i32_27 : i32
    %38 = arith.extui %37 : i1 to i32
    %c0_i32_28 = arith.constant 0 : i32
    %39 = arith.cmpi ne, %38, %c0_i32_28 : i32
    scf.if %39 {
      %c0_29 = arith.constant 0 : index
      %c0_30 = arith.constant 0 : index
      %40 = vector.load %arg11[%c0_29, %c0_30] : memref<16x128xf32, #tpu.memory_space<vmem>>, vector<16x128xf32>
      %c0_31 = arith.constant 0 : index
      %c0_32 = arith.constant 0 : index
      %41 = vector.load %arg10[%c0_31, %c0_32] : memref<16x1xf32, #tpu.memory_space<vmem>>, vector<16x1xf32>
      %42 = tpu.reciprocal %41 {approx = true} : vector<16x1xf32> -> vector<16x1xf32>
      %43 = vector.broadcast %42 : vector<16x1xf32> to vector<16x128xf32>
      %44 = arith.mulf %40, %43 : vector<16x128xf32>
      %45 = arith.truncf %44 : vector<16x128xf32> to vector<16x128xbf16>
      %c0_33 = arith.constant 0 : index
      %c0_34 = arith.constant 0 : index
      %c0_35 = arith.constant 0 : index
      %46 = vector.load %arg8[%c0_33, %c0_34, %c0_35] : memref<1x16x128xbf16, #tpu.memory_space<vmem>>, vector<1x16x128xbf16>
      %47 = vector.shape_cast %46 : vector<1x16x128xbf16> to vector<16x128xbf16>
      %48 = vector.shape_cast %45 : vector<16x128xbf16> to vector<1x16x128xbf16>
      tpu.vector_store %arg8[%c0_33, %c0_34, %c0_35], %48 {strides = array<i32>} : memref<1x16x128xbf16, #tpu.memory_space<vmem>>, vector<1x16x128xbf16>,
    } else {
    }
    return
  }
  func.func @transform_0(%arg0: i32, %arg1: i32, %arg2: i32, %arg3: i32) -> (i32, i32, i32) {
    %c0_i32 = arith.constant 0 : i32
    return %arg0, %arg2, %arg1 : i32, i32, i32
  }
  func.func @transform_1(%arg0: i32, %arg1: i32, %arg2: i32, %arg3: i32) -> (i32, i32, i32) {
    %c0_i32 = arith.constant 0 : i32
    %0 = arith.addi %arg1, %c0_i32 : i32
    %c0_i32_0 = arith.constant 0 : i32
    return %arg0, %arg3, %0 : i32, i32, i32
  }
  func.func @transform_2(%arg0: i32, %arg1: i32, %arg2: i32, %arg3: i32) -> (i32, i32, i32) {
    %c2_i32 = arith.constant 2 : i32
    %0 = arith.addi %arg1, %c2_i32 : i32
    %c0_i32 = arith.constant 0 : i32
    return %arg0, %arg3, %0 : i32, i32, i32
  }
  func.func @transform_3(%arg0: i32, %arg1: i32, %arg2: i32, %arg3: i32) -> (i32, i32, i32) {
    %c0_i32 = arith.constant 0 : i32
    %c0_i32_0 = arith.constant 0 : i32
    return %arg0, %c0_i32, %arg3 : i32, i32, i32
  }
  func.func @transform_4(%arg0: i32, %arg1: i32, %arg2: i32, %arg3: i32) -> (i32, i32, i32) {
    %c0_i32 = arith.constant 0 : i32
    return %arg0, %arg2, %arg1 : i32, i32, i32
  }
}

module attributes {stable_mosaic.version = 11 : i64} {
  func.func @kernel(%arg0: i32, %arg1: i32, %arg2: i32, %arg3: memref<16x256xbf16, #tpu.memory_space<vmem>>, %arg4: memref<256x256xbf16, #tpu.memory_space<vmem>>, %arg5: memref<1x256xf32, #tpu.memory_space<vmem>>, %arg6: memref<1x256xf32, #tpu.memory_space<vmem>>, %arg7: memref<1x256xf32, #tpu.memory_space<vmem>>, %arg8: memref<16x256xbf16, #tpu.memory_space<vmem>>, %arg9: memref<16x256xf32, #tpu.memory_space<vmem>>) attributes {dimension_semantics = [#tpu.dimension_semantics<parallel>, #tpu.dimension_semantics<parallel>, #tpu.dimension_semantics<arbitrary>], iteration_bounds = array<i64: 2, 1, 1>, scalar_prefetch = 0 : i64, scratch_operands = 1 : i64, tpu.core_type = #tpu.core_type<tc>, window_params = [{transform_indices = @transform_0, window_bounds = array<i64: 16, 256>}, {transform_indices = @transform_1, window_bounds = array<i64: 256, 256>}, {transform_indices = @transform_2, window_bounds = array<i64: 1, 256>}, {transform_indices = @transform_3, window_bounds = array<i64: 1, 256>}, {transform_indices = @transform_4, window_bounds = array<i64: 1, 256>}, {transform_indices = @transform_5, window_bounds = array<i64: 16, 256>}]} {
    %c0_i32 = arith.constant 0 : i32
    %0 = arith.cmpi eq, %arg2, %c0_i32 : i32
    %1 = arith.extui %0 : i1 to i32
    %c0_i32_0 = arith.constant 0 : i32
    %2 = arith.cmpi ne, %1, %c0_i32_0 : i32
    scf.if %2 {
      %cst_10 = arith.constant 0.000000e+00 : f32
      %12 = vector.broadcast %cst_10 : f32 to vector<16x256xf32>
      %c0_11 = arith.constant 0 : index
      %c0_12 = arith.constant 0 : index
      %13 = vector.load %arg9[%c0_11, %c0_12] : memref<16x256xf32, #tpu.memory_space<vmem>>, vector<16x256xf32>
      tpu.vector_store %arg9[%c0_11, %c0_12], %12 {strides = array<i32>} : memref<16x256xf32, #tpu.memory_space<vmem>>, vector<16x256xf32>,
    } else {
    }
    %c0 = arith.constant 0 : index
    %c0_1 = arith.constant 0 : index
    %3 = vector.load %arg9[%c0, %c0_1] : memref<16x256xf32, #tpu.memory_space<vmem>>, vector<16x256xf32>
    %c0_2 = arith.constant 0 : index
    %c0_3 = arith.constant 0 : index
    %4 = vector.load %arg3[%c0_2, %c0_3] : memref<16x256xbf16, #tpu.memory_space<vmem>>, vector<16x256xbf16>
    %c0_4 = arith.constant 0 : index
    %c0_5 = arith.constant 0 : index
    %5 = vector.load %arg4[%c0_4, %c0_5] : memref<256x256xbf16, #tpu.memory_space<vmem>>, vector<256x256xbf16>
    %cst = arith.constant dense<0.000000e+00> : vector<16x256xf32>
    %6 = tpu.matmul %4, %5, %cst {dimension_numbers = #tpu.dot_dimension_numbers<[1], [0], [0], [1], [0, 0, 1, 1], [], []>} : vector<16x256xbf16>, vector<256x256xbf16>, vector<16x256xf32> -> vector<16x256xf32>
    %7 = arith.addf %3, %6 : vector<16x256xf32>
    %c0_6 = arith.constant 0 : index
    %c0_7 = arith.constant 0 : index
    %8 = vector.load %arg9[%c0_6, %c0_7] : memref<16x256xf32, #tpu.memory_space<vmem>>, vector<16x256xf32>
    tpu.vector_store %arg9[%c0_6, %c0_7], %7 {strides = array<i32>} : memref<16x256xf32, #tpu.memory_space<vmem>>, vector<16x256xf32>,
    %c0_i32_8 = arith.constant 0 : i32
    %9 = arith.cmpi eq, %arg2, %c0_i32_8 : i32
    %10 = arith.extui %9 : i1 to i32
    %c0_i32_9 = arith.constant 0 : i32
    %11 = arith.cmpi ne, %10, %c0_i32_9 : i32
    scf.if %11 {
      %c0_10 = arith.constant 0 : index
      %c0_11 = arith.constant 0 : index
      %12 = vector.load %arg9[%c0_10, %c0_11] : memref<16x256xf32, #tpu.memory_space<vmem>>, vector<16x256xf32>
      %c0_12 = arith.constant 0 : index
      %c0_13 = arith.constant 0 : index
      %13 = vector.load %arg5[%c0_12, %c0_13] : memref<1x256xf32, #tpu.memory_space<vmem>>, vector<1x256xf32>
      %14 = vector.broadcast %13 : vector<1x256xf32> to vector<16x256xf32>
      %15 = arith.addf %12, %14 : vector<16x256xf32>
      %cst_14 = arith.constant dense<0.000000e+00> : vector<16xf32>
      %16 = vector.multi_reduction <add>, %15, %cst_14 [1] : vector<16x256xf32> to vector<16xf32>
      %17 = vector.shape_cast %16 : vector<16xf32> to vector<16x1xf32>
      %cst_15 = arith.constant 2.560000e+02 : f32
      %18 = vector.broadcast %cst_15 : f32 to vector<16x1xf32>
      %19 = arith.divf %17, %18 : vector<16x1xf32>
      %20 = vector.broadcast %19 : vector<16x1xf32> to vector<16x256xf32>
      %21 = arith.subf %15, %20 : vector<16x256xf32>
      %22 = arith.mulf %21, %21 : vector<16x256xf32>
      %cst_16 = arith.constant dense<0.000000e+00> : vector<16xf32>
      %23 = vector.multi_reduction <add>, %22, %cst_16 [1] : vector<16x256xf32> to vector<16xf32>
      %24 = vector.shape_cast %23 : vector<16xf32> to vector<16x1xf32>
      %cst_17 = arith.constant 2.560000e+02 : f32
      %25 = vector.broadcast %cst_17 : f32 to vector<16x1xf32>
      %26 = arith.divf %24, %25 : vector<16x1xf32>
      %cst_18 = arith.constant 9.99999997E-7 : f32
      %27 = vector.broadcast %cst_18 : f32 to vector<16x1xf32>
      %28 = arith.addf %26, %27 : vector<16x1xf32>
      %29 = math.rsqrt %28 : vector<16x1xf32>
      %30 = vector.broadcast %29 : vector<16x1xf32> to vector<16x256xf32>
      %31 = arith.mulf %21, %30 : vector<16x256xf32>
      %c0_19 = arith.constant 0 : index
      %c0_20 = arith.constant 0 : index
      %32 = vector.load %arg6[%c0_19, %c0_20] : memref<1x256xf32, #tpu.memory_space<vmem>>, vector<1x256xf32>
      %33 = vector.broadcast %32 : vector<1x256xf32> to vector<16x256xf32>
      %34 = arith.mulf %31, %33 : vector<16x256xf32>
      %c0_21 = arith.constant 0 : index
      %c0_22 = arith.constant 0 : index
      %35 = vector.load %arg7[%c0_21, %c0_22] : memref<1x256xf32, #tpu.memory_space<vmem>>, vector<1x256xf32>
      %36 = vector.broadcast %35 : vector<1x256xf32> to vector<16x256xf32>
      %37 = arith.addf %34, %36 : vector<16x256xf32>
      %38 = arith.truncf %37 : vector<16x256xf32> to vector<16x256xbf16>
      %c0_23 = arith.constant 0 : index
      %c0_24 = arith.constant 0 : index
      %39 = vector.load %arg8[%c0_23, %c0_24] : memref<16x256xbf16, #tpu.memory_space<vmem>>, vector<16x256xbf16>
      tpu.vector_store %arg8[%c0_23, %c0_24], %38 {strides = array<i32>} : memref<16x256xbf16, #tpu.memory_space<vmem>>, vector<16x256xbf16>,
    } else {
    }
    return
  }
  func.func @transform_0(%arg0: i32, %arg1: i32, %arg2: i32) -> (i32, i32) {
    %c0_i32 = arith.constant 0 : i32
    return %arg0, %arg2 : i32, i32
  }
  func.func @transform_1(%arg0: i32, %arg1: i32, %arg2: i32) -> (i32, i32) {
    %c0_i32 = arith.constant 0 : i32
    return %arg2, %arg1 : i32, i32
  }
  func.func @transform_2(%arg0: i32, %arg1: i32, %arg2: i32) -> (i32, i32) {
    %c0_i32 = arith.constant 0 : i32
    %c0_i32_0 = arith.constant 0 : i32
    return %c0_i32, %arg1 : i32, i32
  }
  func.func @transform_3(%arg0: i32, %arg1: i32, %arg2: i32) -> (i32, i32) {
    %c0_i32 = arith.constant 0 : i32
    %c0_i32_0 = arith.constant 0 : i32
    return %c0_i32, %arg1 : i32, i32
  }
  func.func @transform_4(%arg0: i32, %arg1: i32, %arg2: i32) -> (i32, i32) {
    %c0_i32 = arith.constant 0 : i32
    %c0_i32_0 = arith.constant 0 : i32
    return %c0_i32, %arg1 : i32, i32
  }
  func.func @transform_5(%arg0: i32, %arg1: i32, %arg2: i32) -> (i32, i32) {
    %c0_i32 = arith.constant 0 : i32
    return %arg0, %arg1 : i32, i32
  }
}

module attributes {stable_mosaic.version = 11 : i64} {
  func.func @kernel(%arg0: i32, %arg1: i32, %arg2: i32, %arg3: memref<128x256xbf16, #tpu.memory_space<vmem>>, %arg4: memref<256x256xbf16, #tpu.memory_space<vmem>>, %arg5: memref<1x256xf32, #tpu.memory_space<vmem>>, %arg6: memref<128x256xbf16, #tpu.memory_space<vmem>>, %arg7: memref<128x256xf32, #tpu.memory_space<vmem>>) attributes {dimension_semantics = [#tpu.dimension_semantics<parallel>, #tpu.dimension_semantics<parallel>, #tpu.dimension_semantics<arbitrary>], iteration_bounds = array<i64: 2, 1, 1>, scalar_prefetch = 0 : i64, scratch_operands = 1 : i64, tpu.core_type = #tpu.core_type<tc>, window_params = [{transform_indices = @transform_0, window_bounds = array<i64: 128, 256>}, {transform_indices = @transform_1, window_bounds = array<i64: 256, 256>}, {transform_indices = @transform_2, window_bounds = array<i64: 1, 256>}, {transform_indices = @transform_3, window_bounds = array<i64: 128, 256>}]} {
    %c0_i32 = arith.constant 0 : i32
    %0 = arith.cmpi eq, %arg2, %c0_i32 : i32
    %1 = arith.extui %0 : i1 to i32
    %c0_i32_0 = arith.constant 0 : i32
    %2 = arith.cmpi ne, %1, %c0_i32_0 : i32
    scf.if %2 {
      %cst_10 = arith.constant 0.000000e+00 : f32
      %12 = vector.broadcast %cst_10 : f32 to vector<128x256xf32>
      %c0_11 = arith.constant 0 : index
      %c0_12 = arith.constant 0 : index
      %13 = vector.load %arg7[%c0_11, %c0_12] : memref<128x256xf32, #tpu.memory_space<vmem>>, vector<128x256xf32>
      tpu.vector_store %arg7[%c0_11, %c0_12], %12 {strides = array<i32>} : memref<128x256xf32, #tpu.memory_space<vmem>>, vector<128x256xf32>,
    } else {
    }
    %c0 = arith.constant 0 : index
    %c0_1 = arith.constant 0 : index
    %3 = vector.load %arg7[%c0, %c0_1] : memref<128x256xf32, #tpu.memory_space<vmem>>, vector<128x256xf32>
    %c0_2 = arith.constant 0 : index
    %c0_3 = arith.constant 0 : index
    %4 = vector.load %arg3[%c0_2, %c0_3] : memref<128x256xbf16, #tpu.memory_space<vmem>>, vector<128x256xbf16>
    %c0_4 = arith.constant 0 : index
    %c0_5 = arith.constant 0 : index
    %5 = vector.load %arg4[%c0_4, %c0_5] : memref<256x256xbf16, #tpu.memory_space<vmem>>, vector<256x256xbf16>
    %cst = arith.constant dense<0.000000e+00> : vector<128x256xf32>
    %6 = tpu.matmul %4, %5, %cst {dimension_numbers = #tpu.dot_dimension_numbers<[1], [0], [0], [1], [0, 0, 1, 1], [], []>} : vector<128x256xbf16>, vector<256x256xbf16>, vector<128x256xf32> -> vector<128x256xf32>
    %7 = arith.addf %3, %6 : vector<128x256xf32>
    %c0_6 = arith.constant 0 : index
    %c0_7 = arith.constant 0 : index
    %8 = vector.load %arg7[%c0_6, %c0_7] : memref<128x256xf32, #tpu.memory_space<vmem>>, vector<128x256xf32>
    tpu.vector_store %arg7[%c0_6, %c0_7], %7 {strides = array<i32>} : memref<128x256xf32, #tpu.memory_space<vmem>>, vector<128x256xf32>,
    %c0_i32_8 = arith.constant 0 : i32
    %9 = arith.cmpi eq, %arg2, %c0_i32_8 : i32
    %10 = arith.extui %9 : i1 to i32
    %c0_i32_9 = arith.constant 0 : i32
    %11 = arith.cmpi ne, %10, %c0_i32_9 : i32
    scf.if %11 {
      %c0_10 = arith.constant 0 : index
      %c0_11 = arith.constant 0 : index
      %12 = vector.load %arg7[%c0_10, %c0_11] : memref<128x256xf32, #tpu.memory_space<vmem>>, vector<128x256xf32>
      %c0_12 = arith.constant 0 : index
      %c0_13 = arith.constant 0 : index
      %13 = vector.load %arg5[%c0_12, %c0_13] : memref<1x256xf32, #tpu.memory_space<vmem>>, vector<1x256xf32>
      %14 = vector.broadcast %13 : vector<1x256xf32> to vector<128x256xf32>
      %15 = arith.addf %12, %14 : vector<128x256xf32>
      %16 = arith.truncf %15 : vector<128x256xf32> to vector<128x256xbf16>
      %c0_14 = arith.constant 0 : index
      %c0_15 = arith.constant 0 : index
      %17 = vector.load %arg6[%c0_14, %c0_15] : memref<128x256xbf16, #tpu.memory_space<vmem>>, vector<128x256xbf16>
      tpu.vector_store %arg6[%c0_14, %c0_15], %16 {strides = array<i32>} : memref<128x256xbf16, #tpu.memory_space<vmem>>, vector<128x256xbf16>,
    } else {
    }
    return
  }
  func.func @transform_0(%arg0: i32, %arg1: i32, %arg2: i32) -> (i32, i32) {
    %c0_i32 = arith.constant 0 : i32
    return %arg0, %arg2 : i32, i32
  }
  func.func @transform_1(%arg0: i32, %arg1: i32, %arg2: i32) -> (i32, i32) {
    %c0_i32 = arith.constant 0 : i32
    return %arg2, %arg1 : i32, i32
  }
  func.func @transform_2(%arg0: i32, %arg1: i32, %arg2: i32) -> (i32, i32) {
    %c0_i32 = arith.constant 0 : i32
    %c0_i32_0 = arith.constant 0 : i32
    return %c0_i32, %arg1 : i32, i32
  }
  func.func @transform_3(%arg0: i32, %arg1: i32, %arg2: i32) -> (i32, i32) {
    %c0_i32 = arith.constant 0 : i32
    return %arg0, %arg1 : i32, i32
  }
}

module attributes {stable_mosaic.version = 11 : i64} {
  func.func @kernel(%arg0: i32, %arg1: i32, %arg2: i32, %arg3: memref<16x256xbf16, #tpu.memory_space<vmem>>, %arg4: memref<256x256xbf16, #tpu.memory_space<vmem>>, %arg5: memref<1x256xf32, #tpu.memory_space<vmem>>, %arg6: memref<1x256xf32, #tpu.memory_space<vmem>>, %arg7: memref<1x256xf32, #tpu.memory_space<vmem>>, %arg8: memref<16x256xf32, #tpu.memory_space<vmem>>, %arg9: memref<16x256xf32, #tpu.memory_space<vmem>>) attributes {dimension_semantics = [#tpu.dimension_semantics<parallel>, #tpu.dimension_semantics<parallel>, #tpu.dimension_semantics<arbitrary>], iteration_bounds = array<i64: 2, 1, 1>, scalar_prefetch = 0 : i64, scratch_operands = 1 : i64, tpu.core_type = #tpu.core_type<tc>, window_params = [{transform_indices = @transform_0, window_bounds = array<i64: 16, 256>}, {transform_indices = @transform_1, window_bounds = array<i64: 256, 256>}, {transform_indices = @transform_2, window_bounds = array<i64: 1, 256>}, {transform_indices = @transform_3, window_bounds = array<i64: 1, 256>}, {transform_indices = @transform_4, window_bounds = array<i64: 1, 256>}, {transform_indices = @transform_5, window_bounds = array<i64: 16, 256>}]} {
    %c0_i32 = arith.constant 0 : i32
    %0 = arith.cmpi eq, %arg2, %c0_i32 : i32
    %1 = arith.extui %0 : i1 to i32
    %c0_i32_0 = arith.constant 0 : i32
    %2 = arith.cmpi ne, %1, %c0_i32_0 : i32
    scf.if %2 {
      %cst_10 = arith.constant 0.000000e+00 : f32
      %12 = vector.broadcast %cst_10 : f32 to vector<16x256xf32>
      %c0_11 = arith.constant 0 : index
      %c0_12 = arith.constant 0 : index
      %13 = vector.load %arg9[%c0_11, %c0_12] : memref<16x256xf32, #tpu.memory_space<vmem>>, vector<16x256xf32>
      tpu.vector_store %arg9[%c0_11, %c0_12], %12 {strides = array<i32>} : memref<16x256xf32, #tpu.memory_space<vmem>>, vector<16x256xf32>,
    } else {
    }
    %c0 = arith.constant 0 : index
    %c0_1 = arith.constant 0 : index
    %3 = vector.load %arg9[%c0, %c0_1] : memref<16x256xf32, #tpu.memory_space<vmem>>, vector<16x256xf32>
    %c0_2 = arith.constant 0 : index
    %c0_3 = arith.constant 0 : index
    %4 = vector.load %arg3[%c0_2, %c0_3] : memref<16x256xbf16, #tpu.memory_space<vmem>>, vector<16x256xbf16>
    %c0_4 = arith.constant 0 : index
    %c0_5 = arith.constant 0 : index
    %5 = vector.load %arg4[%c0_4, %c0_5] : memref<256x256xbf16, #tpu.memory_space<vmem>>, vector<256x256xbf16>
    %cst = arith.constant dense<0.000000e+00> : vector<16x256xf32>
    %6 = tpu.matmul %4, %5, %cst {dimension_numbers = #tpu.dot_dimension_numbers<[1], [0], [0], [1], [0, 0, 1, 1], [], []>} : vector<16x256xbf16>, vector<256x256xbf16>, vector<16x256xf32> -> vector<16x256xf32>
    %7 = arith.addf %3, %6 : vector<16x256xf32>
    %c0_6 = arith.constant 0 : index
    %c0_7 = arith.constant 0 : index
    %8 = vector.load %arg9[%c0_6, %c0_7] : memref<16x256xf32, #tpu.memory_space<vmem>>, vector<16x256xf32>
    tpu.vector_store %arg9[%c0_6, %c0_7], %7 {strides = array<i32>} : memref<16x256xf32, #tpu.memory_space<vmem>>, vector<16x256xf32>,
    %c0_i32_8 = arith.constant 0 : i32
    %9 = arith.cmpi eq, %arg2, %c0_i32_8 : i32
    %10 = arith.extui %9 : i1 to i32
    %c0_i32_9 = arith.constant 0 : i32
    %11 = arith.cmpi ne, %10, %c0_i32_9 : i32
    scf.if %11 {
      %c0_10 = arith.constant 0 : index
      %c0_11 = arith.constant 0 : index
      %12 = vector.load %arg9[%c0_10, %c0_11] : memref<16x256xf32, #tpu.memory_space<vmem>>, vector<16x256xf32>
      %c0_12 = arith.constant 0 : index
      %c0_13 = arith.constant 0 : index
      %13 = vector.load %arg5[%c0_12, %c0_13] : memref<1x256xf32, #tpu.memory_space<vmem>>, vector<1x256xf32>
      %14 = vector.broadcast %13 : vector<1x256xf32> to vector<16x256xf32>
      %15 = arith.addf %12, %14 : vector<16x256xf32>
      %cst_14 = arith.constant dense<0.000000e+00> : vector<16xf32>
      %16 = vector.multi_reduction <add>, %15, %cst_14 [1] : vector<16x256xf32> to vector<16xf32>
      %17 = vector.shape_cast %16 : vector<16xf32> to vector<16x1xf32>
      %cst_15 = arith.constant 2.560000e+02 : f32
      %18 = vector.broadcast %cst_15 : f32 to vector<16x1xf32>
      %19 = arith.divf %17, %18 : vector<16x1xf32>
      %20 = vector.broadcast %19 : vector<16x1xf32> to vector<16x256xf32>
      %21 = arith.subf %15, %20 : vector<16x256xf32>
      %22 = arith.mulf %21, %21 : vector<16x256xf32>
      %cst_16 = arith.constant dense<0.000000e+00> : vector<16xf32>
      %23 = vector.multi_reduction <add>, %22, %cst_16 [1] : vector<16x256xf32> to vector<16xf32>
      %24 = vector.shape_cast %23 : vector<16xf32> to vector<16x1xf32>
      %cst_17 = arith.constant 2.560000e+02 : f32
      %25 = vector.broadcast %cst_17 : f32 to vector<16x1xf32>
      %26 = arith.divf %24, %25 : vector<16x1xf32>
      %cst_18 = arith.constant 9.99999997E-7 : f32
      %27 = vector.broadcast %cst_18 : f32 to vector<16x1xf32>
      %28 = arith.addf %26, %27 : vector<16x1xf32>
      %29 = math.rsqrt %28 : vector<16x1xf32>
      %30 = vector.broadcast %29 : vector<16x1xf32> to vector<16x256xf32>
      %31 = arith.mulf %21, %30 : vector<16x256xf32>
      %c0_19 = arith.constant 0 : index
      %c0_20 = arith.constant 0 : index
      %32 = vector.load %arg6[%c0_19, %c0_20] : memref<1x256xf32, #tpu.memory_space<vmem>>, vector<1x256xf32>
      %33 = vector.broadcast %32 : vector<1x256xf32> to vector<16x256xf32>
      %34 = arith.mulf %31, %33 : vector<16x256xf32>
      %c0_21 = arith.constant 0 : index
      %c0_22 = arith.constant 0 : index
      %35 = vector.load %arg7[%c0_21, %c0_22] : memref<1x256xf32, #tpu.memory_space<vmem>>, vector<1x256xf32>
      %36 = vector.broadcast %35 : vector<1x256xf32> to vector<16x256xf32>
      %37 = arith.addf %34, %36 : vector<16x256xf32>
      %c0_23 = arith.constant 0 : index
      %c0_24 = arith.constant 0 : index
      %38 = vector.load %arg8[%c0_23, %c0_24] : memref<16x256xf32, #tpu.memory_space<vmem>>, vector<16x256xf32>
      tpu.vector_store %arg8[%c0_23, %c0_24], %37 {strides = array<i32>} : memref<16x256xf32, #tpu.memory_space<vmem>>, vector<16x256xf32>,
    } else {
    }
    return
  }
  func.func @transform_0(%arg0: i32, %arg1: i32, %arg2: i32) -> (i32, i32) {
    %c0_i32 = arith.constant 0 : i32
    return %arg0, %arg2 : i32, i32
  }
  func.func @transform_1(%arg0: i32, %arg1: i32, %arg2: i32) -> (i32, i32) {
    %c0_i32 = arith.constant 0 : i32
    return %arg2, %arg1 : i32, i32
  }
  func.func @transform_2(%arg0: i32, %arg1: i32, %arg2: i32) -> (i32, i32) {
    %c0_i32 = arith.constant 0 : i32
    %c0_i32_0 = arith.constant 0 : i32
    return %c0_i32, %arg1 : i32, i32
  }
  func.func @transform_3(%arg0: i32, %arg1: i32, %arg2: i32) -> (i32, i32) {
    %c0_i32 = arith.constant 0 : i32
    %c0_i32_0 = arith.constant 0 : i32
    return %c0_i32, %arg1 : i32, i32
  }
  func.func @transform_4(%arg0: i32, %arg1: i32, %arg2: i32) -> (i32, i32) {
    %c0_i32 = arith.constant 0 : i32
    %c0_i32_0 = arith.constant 0 : i32
    return %c0_i32, %arg1 : i32, i32
  }
  func.func @transform_5(%arg0: i32, %arg1: i32, %arg2: i32) -> (i32, i32) {
    %c0_i32 = arith.constant 0 : i32
    return %arg0, %arg1 : i32, i32
  }
}

module attributes {stable_mosaic.version = 11 : i64} {
  func.func @_flash_kernel(%arg0: i32, %arg1: i32, %arg2: i32, %arg3: i32, %arg4: memref<1x16x128xbf16, #tpu.memory_space<vmem>>, %arg5: memref<1x128x128xbf16, #tpu.memory_space<vmem>>, %arg6: memref<1x128x128xbf16, #tpu.memory_space<vmem>>, %arg7: memref<1x1x128xf32, #tpu.memory_space<vmem>>, %arg8: memref<1x16x128xbf16, #tpu.memory_space<vmem>>, %arg9: memref<16x1xf32, #tpu.memory_space<vmem>>, %arg10: memref<16x1xf32, #tpu.memory_space<vmem>>, %arg11: memref<16x128xf32, #tpu.memory_space<vmem>>) attributes {dimension_semantics = [#tpu.dimension_semantics<parallel>, #tpu.dimension_semantics<parallel>, #tpu.dimension_semantics<parallel>, #tpu.dimension_semantics<arbitrary>], iteration_bounds = array<i64: 2, 2, 1, 1>, scalar_prefetch = 0 : i64, scratch_operands = 3 : i64, tpu.core_type = #tpu.core_type<tc>, window_params = [{transform_indices = @transform_0, window_bounds = array<i64: 1, 16, 128>}, {transform_indices = @transform_1, window_bounds = array<i64: 1, 128, 128>}, {transform_indices = @transform_2, window_bounds = array<i64: 1, 128, 128>}, {transform_indices = @transform_3, window_bounds = array<i64: 1, 1, 128>}, {transform_indices = @transform_4, window_bounds = array<i64: 1, 16, 128>}]} {
    %c0_i32 = arith.constant 0 : i32
    %0 = arith.cmpi eq, %arg3, %c0_i32 : i32
    %1 = arith.extui %0 : i1 to i32
    %c0_i32_0 = arith.constant 0 : i32
    %2 = arith.cmpi ne, %1, %c0_i32_0 : i32
    scf.if %2 {
      %cst_29 = arith.constant -1.000000e+30 : f32
      %40 = vector.broadcast %cst_29 : f32 to vector<16x1xf32>
      %c0_30 = arith.constant 0 : index
      %c0_31 = arith.constant 0 : index
      %41 = vector.load %arg9[%c0_30, %c0_31] : memref<16x1xf32, #tpu.memory_space<vmem>>, vector<16x1xf32>
      tpu.vector_store %arg9[%c0_30, %c0_31], %40 {strides = array<i32>} : memref<16x1xf32, #tpu.memory_space<vmem>>, vector<16x1xf32>,
      %cst_32 = arith.constant 0.000000e+00 : f32
      %42 = vector.broadcast %cst_32 : f32 to vector<16x1xf32>
      %c0_33 = arith.constant 0 : index
      %c0_34 = arith.constant 0 : index
      %43 = vector.load %arg10[%c0_33, %c0_34] : memref<16x1xf32, #tpu.memory_space<vmem>>, vector<16x1xf32>
      tpu.vector_store %arg10[%c0_33, %c0_34], %42 {strides = array<i32>} : memref<16x1xf32, #tpu.memory_space<vmem>>, vector<16x1xf32>,
      %cst_35 = arith.constant 0.000000e+00 : f32
      %44 = vector.broadcast %cst_35 : f32 to vector<16x128xf32>
      %c0_36 = arith.constant 0 : index
      %c0_37 = arith.constant 0 : index
      %45 = vector.load %arg11[%c0_36, %c0_37] : memref<16x128xf32, #tpu.memory_space<vmem>>, vector<16x128xf32>
      tpu.vector_store %arg11[%c0_36, %c0_37], %44 {strides = array<i32>} : memref<16x128xf32, #tpu.memory_space<vmem>>, vector<16x128xf32>,
    } else {
    }
    %c0 = arith.constant 0 : index
    %c0_1 = arith.constant 0 : index
    %c0_2 = arith.constant 0 : index
    %3 = vector.load %arg4[%c0, %c0_1, %c0_2] : memref<1x16x128xbf16, #tpu.memory_space<vmem>>, vector<1x16x128xbf16>
    %4 = vector.shape_cast %3 : vector<1x16x128xbf16> to vector<16x128xbf16>
    %c0_3 = arith.constant 0 : index
    %c0_4 = arith.constant 0 : index
    %c0_5 = arith.constant 0 : index
    %5 = vector.load %arg5[%c0_3, %c0_4, %c0_5] : memref<1x128x128xbf16, #tpu.memory_space<vmem>>, vector<1x128x128xbf16>
    %6 = vector.shape_cast %5 : vector<1x128x128xbf16> to vector<128x128xbf16>
    %c0_6 = arith.constant 0 : index
    %c0_7 = arith.constant 0 : index
    %c0_8 = arith.constant 0 : index
    %7 = vector.load %arg6[%c0_6, %c0_7, %c0_8] : memref<1x128x128xbf16, #tpu.memory_space<vmem>>, vector<1x128x128xbf16>
    %8 = vector.shape_cast %7 : vector<1x128x128xbf16> to vector<128x128xbf16>
    %c0_9 = arith.constant 0 : index
    %c0_10 = arith.constant 0 : index
    %c0_11 = arith.constant 0 : index
    %9 = vector.load %arg7[%c0_9, %c0_10, %c0_11] : memref<1x1x128xf32, #tpu.memory_space<vmem>>, vector<1x1x128xf32>
    %10 = vector.shape_cast %9 : vector<1x1x128xf32> to vector<1x128xf32>
    %cst = arith.constant dense<0.000000e+00> : vector<16x128xf32>
    %11 = tpu.matmul %4, %6, %cst {dimension_numbers = #tpu.dot_dimension_numbers<[1], [1], [0], [0], [0, 0, 1, 0], [], []>} : vector<16x128xbf16>, vector<128x128xbf16>, vector<16x128xf32> -> vector<16x128xf32>
    %12 = vector.broadcast %10 : vector<1x128xf32> to vector<16x128xf32>
    %13 = arith.addf %11, %12 : vector<16x128xf32>
    %c0_12 = arith.constant 0 : index
    %c0_13 = arith.constant 0 : index
    %14 = vector.load %arg9[%c0_12, %c0_13] : memref<16x1xf32, #tpu.memory_space<vmem>>, vector<16x1xf32>
    %cst_14 = arith.constant dense<0xFF800000> : vector<16xf32>
    %15 = vector.multi_reduction <maximumf>, %13, %cst_14 [1] : vector<16x128xf32> to vector<16xf32>
    %16 = vector.shape_cast %15 : vector<16xf32> to vector<16x1xf32>
    %17 = arith.maximumf %14, %16 : vector<16x1xf32>
    %18 = arith.subf %14, %17 : vector<16x1xf32>
    %19 = math.exp %18 : vector<16x1xf32>
    %20 = vector.broadcast %17 : vector<16x1xf32> to vector<16x128xf32>
    %21 = arith.subf %13, %20 : vector<16x128xf32>
    %22 = math.exp %21 : vector<16x128xf32>
    %c0_15 = arith.constant 0 : index
    %c0_16 = arith.constant 0 : index
    %23 = vector.load %arg10[%c0_15, %c0_16] : memref<16x1xf32, #tpu.memory_space<vmem>>, vector<16x1xf32>
    %24 = arith.mulf %19, %23 : vector<16x1xf32>
    %cst_17 = arith.constant dense<0.000000e+00> : vector<16xf32>
    %25 = vector.multi_reduction <add>, %22, %cst_17 [1] : vector<16x128xf32> to vector<16xf32>
    %26 = vector.shape_cast %25 : vector<16xf32> to vector<16x1xf32>
    %27 = arith.addf %24, %26 : vector<16x1xf32>
    %c0_18 = arith.constant 0 : index
    %c0_19 = arith.constant 0 : index
    %28 = vector.load %arg10[%c0_18, %c0_19] : memref<16x1xf32, #tpu.memory_space<vmem>>, vector<16x1xf32>
    tpu.vector_store %arg10[%c0_18, %c0_19], %27 {strides = array<i32>} : memref<16x1xf32, #tpu.memory_space<vmem>>, vector<16x1xf32>,
    %c0_20 = arith.constant 0 : index
    %c0_21 = arith.constant 0 : index
    %29 = vector.load %arg11[%c0_20, %c0_21] : memref<16x128xf32, #tpu.memory_space<vmem>>, vector<16x128xf32>
    %30 = vector.broadcast %19 : vector<16x1xf32> to vector<16x128xf32>
    %31 = arith.mulf %30, %29 : vector<16x128xf32>
    %32 = arith.truncf %22 : vector<16x128xf32> to vector<16x128xbf16>
    %cst_22 = arith.constant dense<0.000000e+00> : vector<16x128xf32>
    %33 = tpu.matmul %32, %8, %cst_22 {dimension_numbers = #tpu.dot_dimension_numbers<[1], [0], [0], [1], [0, 0, 1, 1], [], []>} : vector<16x128xbf16>, vector<128x128xbf16>, vector<16x128xf32> -> vector<16x128xf32>
    %34 = arith.addf %31, %33 : vector<16x128xf32>
    %c0_23 = arith.constant 0 : index
    %c0_24 = arith.constant 0 : index
    %35 = vector.load %arg11[%c0_23, %c0_24] : memref<16x128xf32, #tpu.memory_space<vmem>>, vector<16x128xf32>
    tpu.vector_store %arg11[%c0_23, %c0_24], %34 {strides = array<i32>} : memref<16x128xf32, #tpu.memory_space<vmem>>, vector<16x128xf32>,
    %c0_25 = arith.constant 0 : index
    %c0_26 = arith.constant 0 : index
    %36 = vector.load %arg9[%c0_25, %c0_26] : memref<16x1xf32, #tpu.memory_space<vmem>>, vector<16x1xf32>
    tpu.vector_store %arg9[%c0_25, %c0_26], %17 {strides = array<i32>} : memref<16x1xf32, #tpu.memory_space<vmem>>, vector<16x1xf32>,
    %c0_i32_27 = arith.constant 0 : i32
    %37 = arith.cmpi eq, %arg3, %c0_i32_27 : i32
    %38 = arith.extui %37 : i1 to i32
    %c0_i32_28 = arith.constant 0 : i32
    %39 = arith.cmpi ne, %38, %c0_i32_28 : i32
    scf.if %39 {
      %c0_29 = arith.constant 0 : index
      %c0_30 = arith.constant 0 : index
      %40 = vector.load %arg11[%c0_29, %c0_30] : memref<16x128xf32, #tpu.memory_space<vmem>>, vector<16x128xf32>
      %c0_31 = arith.constant 0 : index
      %c0_32 = arith.constant 0 : index
      %41 = vector.load %arg10[%c0_31, %c0_32] : memref<16x1xf32, #tpu.memory_space<vmem>>, vector<16x1xf32>
      %42 = tpu.reciprocal %41 {approx = true} : vector<16x1xf32> -> vector<16x1xf32>
      %43 = vector.broadcast %42 : vector<16x1xf32> to vector<16x128xf32>
      %44 = arith.mulf %40, %43 : vector<16x128xf32>
      %45 = arith.truncf %44 : vector<16x128xf32> to vector<16x128xbf16>
      %c0_33 = arith.constant 0 : index
      %c0_34 = arith.constant 0 : index
      %c0_35 = arith.constant 0 : index
      %46 = vector.load %arg8[%c0_33, %c0_34, %c0_35] : memref<1x16x128xbf16, #tpu.memory_space<vmem>>, vector<1x16x128xbf16>
      %47 = vector.shape_cast %46 : vector<1x16x128xbf16> to vector<16x128xbf16>
      %48 = vector.shape_cast %45 : vector<16x128xbf16> to vector<1x16x128xbf16>
      tpu.vector_store %arg8[%c0_33, %c0_34, %c0_35], %48 {strides = array<i32>} : memref<1x16x128xbf16, #tpu.memory_space<vmem>>, vector<1x16x128xbf16>,
    } else {
    }
    return
  }
  func.func @transform_0(%arg0: i32, %arg1: i32, %arg2: i32, %arg3: i32) -> (i32, i32, i32) {
    %c0_i32 = arith.constant 0 : i32
    return %arg0, %arg2, %arg1 : i32, i32, i32
  }
  func.func @transform_1(%arg0: i32, %arg1: i32, %arg2: i32, %arg3: i32) -> (i32, i32, i32) {
    %c0_i32 = arith.constant 0 : i32
    %0 = arith.addi %arg1, %c0_i32 : i32
    %c0_i32_0 = arith.constant 0 : i32
    return %arg0, %arg3, %0 : i32, i32, i32
  }
  func.func @transform_2(%arg0: i32, %arg1: i32, %arg2: i32, %arg3: i32) -> (i32, i32, i32) {
    %c0_i32 = arith.constant 0 : i32
    %0 = arith.addi %arg1, %c0_i32 : i32
    %c0_i32_0 = arith.constant 0 : i32
    return %arg0, %arg3, %0 : i32, i32, i32
  }
  func.func @transform_3(%arg0: i32, %arg1: i32, %arg2: i32, %arg3: i32) -> (i32, i32, i32) {
    %c0_i32 = arith.constant 0 : i32
    %c0_i32_0 = arith.constant 0 : i32
    return %arg0, %c0_i32, %arg3 : i32, i32, i32
  }
  func.func @transform_4(%arg0: i32, %arg1: i32, %arg2: i32, %arg3: i32) -> (i32, i32, i32) {
    %c0_i32 = arith.constant 0 : i32
    return %arg0, %arg2, %arg1 : i32, i32, i32
  }
}

</mosaic_0001>

<bundles_post_ra>
// kernel: resampler_with_text_forward.11
= control target key start
LH: loop header
LB: loop body
LE: loop exit
PB: predicated region body
PF: predicated region fallthrough
CT: control target
= control target key end

     0   :  { %s889_s12 = smov 0   ;;  %s891_s13 = smov 0   ;;  %s1032_s0 = inlined_call_operand.vmem [shape: bf16[32,256], index: 0, kind: input, shape index: {}]   ;;  %s1033_s1 = inlined_call_operand.vmem [shape: bf16[256,256], index: 1, kind: input, shape index: {}]   ;;  %s1034_s2 = inlined_call_operand.vmem [shape: f32[1,256], index: 2, kind: input, shape index: {}]   ;;  %s1035_s3 = inlined_call_operand.vmem [shape: bf16[32,256], index: 3, kind: output, shape index: {}]  }
   0x1   :  { %s893_s14 = smov 0  }
   0x2 LB: > { %s32_s15 = sadd.s32 1, %s863_s13  ;;  %p721_p0 = scmp.ge.s32.totalorder %s867_s14, 1  ;;  %s867_s14 = sphi %s893_s14, %s13_s14   ;;  %s863_s13 = sphi %s891_s13, %s1037_s13   ;;  %s859_s12 = sphi %s889_s12, %s1036_s12  }
   0x3   : > { %p34_p1 = scmp.ge.s32.totalorder %s32_s15, 2  ;;  %p196_p2 = scmp.lt.s32.totalorder %s867_s14, 3 }
   0x5   : > { %s1039_s15 = smov (%p34_p1, %s32_s15), 0  ;;  %p197_p3 = pnand %p721_p0, %p196_p2 }
   0x6   : > { %v794_v0 = vld [vmem:[%s1033_s1 + $0x4] ss:$8 sps:$4 sm:$0xff] (!%p197_p3)   ;;  %v796_v1 = vld [vmem:[%s1033_s1] ss:$8 sps:$4 sm:$0xff] (!%p197_p3)   ;;  %v797_v2 = vld [vmem:[%s1033_s1 + $0x14] ss:$8 sps:$4 sm:$0xff] (!%p197_p3)   ;;  %v561_v34 = vlaneseq (!%p197_p3) }
   0x7   : > { %200 = sbr.rel (%p197_p3) target bundleno = 291 (0x123), region = 32  ;;  %501 = vmatprep.subr.bf16.mxu0 (!%p197_p3), %v794_v0  ;;  %v799_v3 = vld [vmem:[%s1033_s1 + $0x10] ss:$8 sps:$4 sm:$0xff] (!%p197_p3)   ;;  %v800_v4 = vld [vmem:[%s1033_s1 + $0x24] ss:$8 sps:$4 sm:$0xff] (!%p197_p3)   ;;  %s722_s26 = sshll.u32 (!%p197_p3), %s859_s12, 1 }
   0x8   : > { %502 = vmatpush1.bf16.msra.mxu0 (!%p197_p3), %v796_v1  ;;  %v802_v5 = vld [vmem:[%s1033_s1 + $0x20] ss:$8 sps:$4 sm:$0xff] (!%p197_p3)   ;;  %v803_v6 = vld [vmem:[%s1033_s1 + $0x34] ss:$8 sps:$4 sm:$0xff] (!%p197_p3)   ;;  %p246_p4 = scmp.lt.s32.totalorder (!%p197_p3), %s722_s26, 3  ;;  %v562_v35 = vshrl.u32 (!%p197_p3), %v561_v34, 7 }
   0x9   : > { %503 = vmatprep.subr.bf16.mxu0 (!%p197_p3), %v797_v2  ;;  %v805_v7 = vld [vmem:[%s1033_s1 + $0x30] ss:$8 sps:$4 sm:$0xff] (!%p197_p3)   ;;  %v806_v8 = vld [vmem:[%s1033_s1 + $0x44] ss:$8 sps:$4 sm:$0xff] (!%p197_p3)   ;;  %v808_v9 = vld [vmem:[%s1033_s1 + $0x40] ss:$8 sps:$4 sm:$0xff] (!%p197_p3)  }
   0xa   : > { %v809_v10 = vld [vmem:[%s1033_s1 + $0x54] ss:$8 sps:$4 sm:$0xff] (!%p197_p3)   ;;  %v811_v11 = vld [vmem:[%s1033_s1 + $0x50] ss:$8 sps:$4 sm:$0xff] (!%p197_p3)   ;;  %v812_v12 = vld [vmem:[%s1033_s1 + $0x64] ss:$8 sps:$4 sm:$0xff] (!%p197_p3)  }
   0xb   : > { %v814_v14 = vld [vmem:[%s1033_s1 + $0x60] ss:$8 sps:$4 sm:$0xff] (!%p197_p3)   ;;  %v815_v15 = vld [vmem:[%s1033_s1 + $0x74] ss:$8 sps:$4 sm:$0xff] (!%p197_p3)   ;;  %v817_v16 = vld [vmem:[%s1033_s1 + $0x70] ss:$8 sps:$4 sm:$0xff] (!%p197_p3)  }
   0xc   : > { %504 = vmatpush1.bf16.msra.mxu0 (!%p197_p3), %v799_v3  ;;  %v818_v17 = vld [vmem:[%s1033_s1 + $0x84] ss:$8 sps:$4 sm:$0xff] (!%p197_p3)   ;;  %v820_v18 = vld [vmem:[%s1033_s1 + $0x80] ss:$8 sps:$4 sm:$0xff] (!%p197_p3)   ;;  %v821_v19 = vld [vmem:[%s1033_s1 + $0x94] ss:$8 sps:$4 sm:$0xff] (!%p197_p3)  }
   0xd   : > { %505 = vmatprep.subr.bf16.mxu0 (!%p197_p3), %v800_v4  ;;  %v823_v20 = vld [vmem:[%s1033_s1 + $0x90] ss:$8 sps:$4 sm:$0xff] (!%p197_p3)   ;;  %v824_v21 = vld [vmem:[%s1033_s1 + $0xa4] ss:$8 sps:$4 sm:$0xff] (!%p197_p3)   ;;  %v826_v22 = vld [vmem:[%s1033_s1 + $0xa0] ss:$8 sps:$4 sm:$0xff] (!%p197_p3)  }
   0xe   : > { %s1041_s26 = smov (!%p246_p4, %s722_s26), 3  ;;  %v827_v23 = vld [vmem:[%s1033_s1 + $0xb4] ss:$8 sps:$4 sm:$0xff]   ;;  %v829_v24 = vld [vmem:[%s1033_s1 + $0xb0] ss:$8 sps:$4 sm:$0xff]   ;;  %v563_v36 = vsub.s32 0, %v562_v35 }
   0xf   : > { %s766_s12 = sshll.u32 %s1041_s26, 3  ;;  %v830_v25 = vld [vmem:[%s1033_s1 + $0xc4] ss:$8 sps:$4 sm:$0xff]   ;;  %v832_v26 = vld [vmem:[%s1033_s1 + $0xc0] ss:$8 sps:$4 sm:$0xff]   ;;  %v567_v38 = vsub.s32 1, %v562_v35 }
  0x10   : > { %506 = vmatpush1.bf16.msra.mxu0 %v802_v5  ;;  %s951_s20 = scalar_lea.vmem %s1032_s0, %s766_s12  ;;  %v833_v27 = vld [vmem:[%s1033_s1 + $0xd4] ss:$8 sps:$4 sm:$0xff]   ;;  %v835_v28 = vld [vmem:[%s1033_s1 + $0xd0] ss:$8 sps:$4 sm:$0xff]   ;;  %v836_v29 = vld [vmem:[%s1033_s1 + $0xe4] ss:$8 sps:$4 sm:$0xff]   ;;  %s282_s22 = scalar_lea.vmem %s1035_s3, %s766_s12 }
  0x11   : > { %507 = vmatprep.subr.bf16.mxu0 %v803_v6  ;;  %v844_v13 = vld [vmem:[%s951_s20 + $0x4] ss:$8 sps:$4 sm:$0xff]   ;;  %v838_v30 = vld [vmem:[%s1033_s1 + $0xe0] ss:$8 sps:$4 sm:$0xff]   ;;  %v839_v31 = vld [vmem:[%s1033_s1 + $0xf4] ss:$8 sps:$4 sm:$0xff]  }
  0x12   : > { %533 = vmatprep.mubr.bf16.mxu0 %v844_v13  ;;  %v841_v32 = vld [vmem:[%s1033_s1 + $0xf0] ss:$8 sps:$4 sm:$0xff]   ;;  %v842_v33 = vld [vmem:[%s951_s20] ss:$8 sps:$4 sm:$0xff]  }
  0x13   : > { %v559_v37 = vld [vmem:[%s1034_s2] sm:$0x3] }
  0x14   : > { %508 = vmatpush1.bf16.msra.mxu0 %v805_v7  ;;  %v564_v39 = vrot.slane %v559_v37, %v563_v36  ;;  %v568_v40 = vrot.slane %v559_v37, %v567_v38 }
  0x15   : > { %509 = vmatprep.subr.bf16.mxu0 %v806_v8 }
  0x18   : > { %510 = vmatpush1.bf16.msra.mxu0 %v808_v9 }
  0x19   : > { %511 = vmatprep.subr.bf16.mxu0 %v809_v10 }
  0x1c   : > { %512 = vmatpush1.bf16.msra.mxu0 %v811_v11 }
  0x1d   : > { %513 = vmatprep.subr.bf16.mxu0 %v812_v12 }
  0x20   : > { %514 = vmatpush1.bf16.msra.mxu0 %v814_v14 }
  0x21   : > { %515 = vmatprep.subr.bf16.mxu0 %v815_v15 }
  0x24   : > { %516 = vmatpush1.bf16.msra.mxu0 %v817_v16 }
  0x25   : > { %517 = vmatprep.subr.bf16.mxu0 %v818_v17 }
  0x28   : > { %518 = vmatpush1.bf16.msra.mxu0 %v820_v18 }
  0x29   : > { %519 = vmatprep.subr.bf16.mxu0 %v821_v19 }
  0x2c   : > { %520 = vmatpush1.bf16.msra.mxu0 %v823_v20 }
  0x2d   : > { %521 = vmatprep.subr.bf16.mxu0 %v824_v21 }
  0x30   : > { %522 = vmatpush1.bf16.msra.mxu0 %v826_v22 }
  0x31   : > { %523 = vmatprep.subr.bf16.mxu0 %v827_v23 }
  0x34   : > { %524 = vmatpush1.bf16.msra.mxu0 %v829_v24 }
  0x35   : > { %525 = vmatprep.subr.bf16.mxu0 %v830_v25 }
  0x38   : > { %526 = vmatpush1.bf16.msra.mxu0 %v832_v26 }
  0x39   : > { %527 = vmatprep.subr.bf16.mxu0 %v833_v27 }
  0x3c   : > { %528 = vmatpush1.bf16.msra.mxu0 %v835_v28 }
  0x3d   : > { %529 = vmatprep.subr.bf16.mxu0 %v836_v29 }
  0x40   : > { %530 = vmatpush1.bf16.msra.mxu0 %v838_v30 }
  0x41   : > { %531 = vmatprep.subr.bf16.mxu0 %v839_v31 }
  0x44   : > { %532 = vmatpush1.bf16.msra.mxu0 %v841_v32 }
  0x47   : > { %534 = vmatmul.mubr.bf16.vlgmr.msra.gmra.mrb[0].mxu0 %v842_v33 }
 0x11a   : > { %v535_v41 = vpop.f32.mrb[0].mxu0 }
 0x11b   : > { %v571_v42 = vadd.f32 %v564_v39, %v535_v41  ;;  %v537_v43 = vpop.f32.mrb[1].mxu0 }
 0x11c   : > { %v572_v44 = vadd.f32 %v568_v40, %v537_v43  ;;  %v539_v45 = vpop.f32.mrb[2].mxu0 }
 0x11d   : > { %v573_v46 = vadd.f32 %v564_v39, %v539_v45  ;;  %v541_v47 = vpop.f32.mrb[3].mxu0 }
 0x11e   : > { %v768_v48 = vpack.c.bf16 %v572_v44, %v571_v42  ;;  %v574_v49 = vadd.f32 %v568_v40, %v541_v47 }
 0x120   : > { %587 = vst [vmem:[%s282_s22] sm:$0xff] %v768_v48  ;;  %v769_v50 = vpack.c.bf16 %v574_v49, %v573_v46 }
 0x122   : > { %588 = vst [vmem:[%s282_s22 + $0x8] sm:$0xff] %v769_v50 }
 0x123 PF: > { %s13_s14 = sadd.s32 1, %s867_s14   ;;  %s1036_s12 = smov %s863_s13 }
 0x124   : > { %p10_p5 = scmp.ge.s32.totalorder %s13_s14, 4   ;;  %s1037_s13 = smov %s1039_s15 }
 0x126   :  { %12 = sbr.rel (!%p10_p5) target bundleno = 2 (0x2), region = 76 }

// kernel: resampler_with_text_forward.10
= control target key start
LH: loop header
LB: loop body
LE: loop exit
PB: predicated region body
PF: predicated region fallthrough
CT: control target
= control target key end

     0   :  { %9 = vsyncpa [#allocation4], 0  ;;  %s1292_s15 = smov 0   ;;  %s1294_s16 = smov 0   ;;  %s1384_s0 = inlined_call_operand.vmem [shape: f32[16,512], index: 0, kind: input, shape index: {}]   ;;  %s1385_s1 = inlined_call_operand.hbm [shape: bf16[512,256], index: 1, kind: input, shape index: {}]   ;;  %s1386_s2 = inlined_call_operand.vmem [shape: f32[1,256], index: 2, kind: input, shape index: {}]   ;;  %s1387_s3 = inlined_call_operand.vmem [shape: f32[1,256], index: 3, kind: input, shape index: {}]   ;;  %s1388_s4 = inlined_call_operand.vmem [shape: bf16[16,256], index: 4, kind: output, shape index: {}]  }
   0x1   :  { %s1296_s17 = smov 0  }
   0x2 LB: > { %s988_s18 = sadd.s32 4294967295, %s1262_s17   ;;  %s34_s19 = sadd.s32 1, %s1258_s16  ;;  %s1262_s17 = sphi %s1296_s17, %s15_s17   ;;  %s1258_s16 = sphi %s1294_s16, %s1398_s16   ;;  %s1254_s15 = sphi %s1292_s15, %s1397_s15  }
   0x3   : > { %p36_p0 = scmp.ge.s32.totalorder %s34_s19, 2  ;;  %p990_p1 = scmp.ge.s32.totalorder %s1262_s17, 1 }
   0x4   : > { %p175_p2 = scmp.lt.s32.totalorder %s1262_s17, 3  ;;  %p1317_p4 = scmp.eq.s32.totalorder %s988_s18, 0 }
   0x5   : > { %s1400_s19 = smov (%p36_p0, %s34_s19), 0  ;;  %s1264_s22 = smov [#allocation3]  }
   0x6   : > { %p1313_p3 = pnand %p990_p1, %p175_p2  ;;  %s193_s23 = sshll.u32 %s1264_s22, 4  ;;  %s194_s23 = int_to_ptr.vmem [resolvable:$true] %s193_s23 }
   0x7   : > { %s1393_s21 = scalar_select %p1317_p4, 1, 0 }
   0x8   : > { %s1392_s20 = scalar_select %p1313_p3, 1, 0 }
   0x9   : > { %p1077_p5 = pneg %p1313_p3  ;;  %s1208_s27 = scalar_lea.hbm %s1385_s1, 8192 }
   0xa   : > { %p1209_p7 = scmp.ne.s32.totalorder %s1385_s1, %s1208_s27  ;;  %p1215_p11 = scmp.lt.u32.totalorder %s1208_s27, %s1385_s1 }
   0xb   : > { %p1325_p6 = pnand %p1317_p4, %p1077_p5 }
   0xd   : > { %p1210_p8 = pneg %p1325_p6 }
   0xf   : > { %p1211_p9 = pnand %p1210_p8, %p1209_p7 }
  0x11   : > { %p1212_p10 = pneg %p1211_p9 }
  0x13   : > { %p1217_p12 = pnand %p1215_p11, %p1212_p10 }
  0x15   : > { %1220 = shalt.err (!%p1217_p12)
}
  0x16   : > { %s1221_s6 = scalar_lea.vmem %s194_s23, 8192  ;;  %p1229_p2 = scmp.lt.s32.totalorder %s194_s23, %s194_s23 }
  0x17   : > { %p1222_p13 = scmp.ne.s32.totalorder %s194_s23, %s1221_s6  ;;  %p1230_p5 = scmp.lt.s32.totalorder %s1221_s6, %s1221_s6 }
  0x19   : > { %p1224_p0 = pnand %p1222_p13, %p1210_p8  ;;  %p1231_p4 = por %p1230_p5, %p1229_p2 }
  0x1b   : > { %p1225_p1 = pneg %p1224_p0 }
  0x1d   : > { %p1232_p3 = pnand %p1231_p4, %p1225_p1 }
  0x1f   : > { %1235 = shalt.err (!%p1232_p3)
}
  0x20   : > { %s1265_s7 = smov 128   ;;  %s1266_s8 = smov 8  }
  0x21   : > { %1080 = dma.hbm_to_vmem [thread:$0]  (!%p1325_p6), %s1385_s1, 8192, %s194_s23, [#allocation4], %s1265_s7, %s1265_s7, %s1266_s8  }
  0x22   : > { %p1395_p7 = scmp.ne.s32.totalorder %s1392_s20, 0 }
  0x23   : > { %p1396_p9 = scmp.ne.s32.totalorder (!%p1395_p7), %s1393_s21, 0 }
  0x24   : > { %238 = sbr.rel (%p1395_p7) target bundleno = 643 (0x283), region = 36 }
  0x2b   : > { %1249 = dma.done.wait (%p1396_p9), [#allocation4], 8192  }
  0x2c   : > { %1251 = vsyncadd (%p1396_p9), [#allocation4], 4294959104  ;;  %v1110_v0 = vld [vmem:[#allocation3 + $0x4] ss:$8 sps:$4 sm:$0xff]   ;;  %v1114_v2 = vld [vmem:[#allocation3] ss:$8 sps:$4 sm:$0xff]  }
  0x2d   : > { %v1112_v1 = vld [vmem:[#allocation3 + $0x104] ss:$8 sps:$4 sm:$0xff]   ;;  %712 = vmatprep.subr.bf16.mxu1 %v1110_v0  ;;  %v1115_v3 = vld [vmem:[#allocation3 + $0x100] ss:$8 sps:$4 sm:$0xff]   ;;  %v1116_v4 = vld [vmem:[#allocation3 + $0x14] ss:$8 sps:$4 sm:$0xff]  }
  0x2e   : > { %753 = vmatprep.subr.bf16.mxu0 %v1112_v1  ;;  %713 = vmatpush1.bf16.msra.mxu1 %v1114_v2  ;;  %v1118_v5 = vld [vmem:[#allocation3 + $0x114] ss:$8 sps:$4 sm:$0xff]   ;;  %v1120_v6 = vld [vmem:[#allocation3 + $0x10] ss:$8 sps:$4 sm:$0xff]   ;;  %v1122_v8 = vld [vmem:[#allocation3 + $0x24] ss:$8 sps:$4 sm:$0xff]  }
  0x2f   : > { %754 = vmatpush1.bf16.msra.mxu0 %v1115_v3  ;;  %714 = vmatprep.subr.bf16.mxu1 %v1116_v4  ;;  %v1121_v7 = vld [vmem:[#allocation3 + $0x110] ss:$8 sps:$4 sm:$0xff]   ;;  %v1124_v9 = vld [vmem:[#allocation3 + $0x124] ss:$8 sps:$4 sm:$0xff]   ;;  %v1126_v10 = vld [vmem:[#allocation3 + $0x20] ss:$8 sps:$4 sm:$0xff]  }
  0x30   : > { %755 = vmatprep.subr.bf16.mxu0 %v1118_v5  ;;  %v1127_v11 = vld [vmem:[#allocation3 + $0x120] ss:$8 sps:$4 sm:$0xff]   ;;  %v1128_v12 = vld [vmem:[#allocation3 + $0x34] ss:$8 sps:$4 sm:$0xff]   ;;  %v1132_v14 = vld [vmem:[#allocation3 + $0x30] ss:$8 sps:$4 sm:$0xff]  }
  0x31   : > { %v1130_v13 = vld [vmem:[#allocation3 + $0x134] ss:$8 sps:$4 sm:$0xff]   ;;  %v1133_v15 = vld [vmem:[#allocation3 + $0x130] ss:$8 sps:$4 sm:$0xff]   ;;  %v1134_v16 = vld [vmem:[#allocation3 + $0x44] ss:$8 sps:$4 sm:$0xff]  }
  0x32   : > { %715 = vmatpush1.bf16.msra.mxu1 %v1120_v6  ;;  %v1136_v17 = vld [vmem:[#allocation3 + $0x144] ss:$8 sps:$4 sm:$0xff]   ;;  %v1138_v18 = vld [vmem:[#allocation3 + $0x40] ss:$8 sps:$4 sm:$0xff]   ;;  %v1140_v20 = vld [vmem:[#allocation3 + $0x54] ss:$8 sps:$4 sm:$0xff]  }
  0x33   : > { %756 = vmatpush1.bf16.msra.mxu0 %v1121_v7  ;;  %716 = vmatprep.subr.bf16.mxu1 %v1122_v8  ;;  %v1139_v19 = vld [vmem:[#allocation3 + $0x140] ss:$8 sps:$4 sm:$0xff]   ;;  %v1142_v21 = vld [vmem:[#allocation3 + $0x154] ss:$8 sps:$4 sm:$0xff]   ;;  %v1144_v22 = vld [vmem:[#allocation3 + $0x50] ss:$8 sps:$4 sm:$0xff]  }
  0x34   : > { %757 = vmatprep.subr.bf16.mxu0 %v1124_v9  ;;  %v1145_v23 = vld [vmem:[#allocation3 + $0x150] ss:$8 sps:$4 sm:$0xff]   ;;  %v1146_v24 = vld [vmem:[#allocation3 + $0x64] ss:$8 sps:$4 sm:$0xff]   ;;  %v1150_v26 = vld [vmem:[#allocation3 + $0x60] ss:$8 sps:$4 sm:$0xff]  }
  0x35   : > { %v1148_v25 = vld [vmem:[#allocation3 + $0x164] ss:$8 sps:$4 sm:$0xff]   ;;  %v1151_v27 = vld [vmem:[#allocation3 + $0x160] ss:$8 sps:$4 sm:$0xff]   ;;  %v1152_v28 = vld [vmem:[#allocation3 + $0x74] ss:$8 sps:$4 sm:$0xff]  }
  0x36   : > { %717 = vmatpush1.bf16.msra.mxu1 %v1126_v10  ;;  %v1154_v29 = vld [vmem:[#allocation3 + $0x174] ss:$8 sps:$4 sm:$0xff]   ;;  %v1156_v30 = vld [vmem:[#allocation3 + $0x70] ss:$8 sps:$4 sm:$0xff]   ;;  %v1158_v32 = vld [vmem:[#allocation3 + $0x84] ss:$8 sps:$4 sm:$0xff]  }
  0x37   : > { %758 = vmatpush1.bf16.msra.mxu0 %v1127_v11  ;;  %718 = vmatprep.subr.bf16.mxu1 %v1128_v12  ;;  %v1157_v31 = vld [vmem:[#allocation3 + $0x170] ss:$8 sps:$4 sm:$0xff]   ;;  %p281_p3 = scmp.lt.s32.totalorder %s1254_s15, 1  ;;  %v1160_v33 = vld [vmem:[#allocation3 + $0x184] ss:$8 sps:$4 sm:$0xff]  }
  0x38   : > { %759 = vmatprep.subr.bf16.mxu0 %v1130_v13  ;;  %v1162_v34 = vld [vmem:[#allocation3 + $0x80] ss:$8 sps:$4 sm:$0xff]   ;;  %v1164_v36 = vld [vmem:[#allocation3 + $0x94] ss:$8 sps:$4 sm:$0xff]   ;;  %v1168_v38 = vld [vmem:[#allocation3 + $0x90] ss:$8 sps:$4 sm:$0xff]  }
  0x39   : > { %v1163_v35 = vld [vmem:[#allocation3 + $0x180] ss:$8 sps:$4 sm:$0xff]   ;;  %s1402_s15 = smov (!%p281_p3, %s1254_s15), 1  ;;  %v1166_v37 = vld [vmem:[#allocation3 + $0x194] ss:$8 sps:$4 sm:$0xff]  }
  0x3a   : > { %719 = vmatpush1.bf16.msra.mxu1 %v1132_v14  ;;  %v1169_v39 = vld [vmem:[#allocation3 + $0x190] ss:$8 sps:$4 sm:$0xff]   ;;  %v1170_v40 = vld [vmem:[#allocation3 + $0xa4] ss:$8 sps:$4 sm:$0xff]   ;;  %s1068_s11 = sshll.u32 %s1402_s15, 5  ;;  %s1069_s23 = sshll.u32 %s1402_s15, 3 }
  0x3b   : > { %760 = vmatpush1.bf16.msra.mxu0 %v1133_v15  ;;  %720 = vmatprep.subr.bf16.mxu1 %v1134_v16  ;;  %v1172_v41 = vld [vmem:[#allocation3 + $0x1a4] ss:$8 sps:$4 sm:$0xff]   ;;  %v1174_v42 = vld [vmem:[#allocation3 + $0xa0] ss:$8 sps:$4 sm:$0xff]   ;;  %s1359_s14 = scalar_lea.vmem %s1384_s0, %s1068_s11  ;;  %v1176_v44 = vld [vmem:[#allocation3 + $0xb4] ss:$8 sps:$4 sm:$0xff]   ;;  %s310_s26 = scalar_lea.vmem %s1388_s4, %s1069_s23 }
  0x3c   : > { %761 = vmatprep.subr.bf16.mxu0 %v1136_v17  ;;  %v1175_v43 = vld [vmem:[#allocation3 + $0x1a0] ss:$8 sps:$4 sm:$0xff]   ;;  %v1178_v45 = vld [vmem:[#allocation3 + $0x1b4] ss:$8 sps:$4 sm:$0xff]   ;;  %v1180_v49 = vld [vmem:[#allocation3 + $0xb0] ss:$8 sps:$4 sm:$0xff]  }
  0x3d   : > { %v321_v46 = vld [vmem:[%s1359_s14 + $0x8] sm:$0xff]  ;;  %v323_v48 = vld [vmem:[%s1359_s14 + $0x18] sm:$0xff]  ;;  %v320_v4 = vld [vmem:[%s1359_s14] sm:$0xff] }
  0x3e   : > { %721 = vmatpush1.bf16.msra.mxu1 %v1138_v18  ;;  %v325_v47 = vpack.c.bf16 %v321_v46, %v321_v46  ;;  %v1181_v50 = vld [vmem:[#allocation3 + $0x1b0] ss:$8 sps:$4 sm:$0xff]   ;;  %v327_v51 = vpack.c.bf16 %v323_v48, %v323_v48  ;;  %v1182_v52 = vld [vmem:[#allocation3 + $0xc4] ss:$8 sps:$4 sm:$0xff]   ;;  %v1186_v54 = vld [vmem:[#allocation3 + $0xc0] ss:$8 sps:$4 sm:$0xff]   ;;  %v324_v6 = vpack.c.bf16 %v320_v4, %v320_v4 }
  0x3f   : > { %762 = vmatpush1.bf16.msra.mxu0 %v1139_v19  ;;  %722 = vmatprep.subr.bf16.mxu1 %v1140_v20  ;;  %v1184_v53 = vld [vmem:[#allocation3 + $0x1c4] ss:$8 sps:$4 sm:$0xff]   ;;  %v1187_v55 = vld [vmem:[#allocation3 + $0x1c0] ss:$8 sps:$4 sm:$0xff]   ;;  %v1188_v56 = vld [vmem:[#allocation3 + $0xd4] ss:$8 sps:$4 sm:$0xff]  }
  0x40   : > { %763 = vmatprep.subr.bf16.mxu0 %v1142_v21  ;;  %744 = vmatprep.mubr.bf16.mxu1 %v325_v47  ;;  %v1190_v57 = vld [vmem:[#allocation3 + $0x1d4] ss:$8 sps:$4 sm:$0xff]   ;;  %v1192_v58 = vld [vmem:[#allocation3 + $0xd0] ss:$8 sps:$4 sm:$0xff]   ;;  %v1194_v60 = vld [vmem:[#allocation3 + $0xe4] ss:$8 sps:$4 sm:$0xff]  }
  0x41   : > { %785 = vmatprep.mubr.bf16.mxu0 %v327_v51  ;;  %v1193_v59 = vld [vmem:[#allocation3 + $0x1d0] ss:$8 sps:$4 sm:$0xff]   ;;  %v1196_v61 = vld [vmem:[#allocation3 + $0x1e4] ss:$8 sps:$4 sm:$0xff]   ;;  %v1198_v62 = vld [vmem:[#allocation3 + $0xe0] ss:$8 sps:$4 sm:$0xff]  }
  0x42   : > { %723 = vmatpush1.bf16.msra.mxu1 %v1144_v22  ;;  %v1199_v63 = vld [vmem:[#allocation3 + $0x1e0] ss:$8 sps:$4 sm:$0xff]   ;;  %v1200_v0 = vld [vmem:[#allocation3 + $0xf4] ss:$8 sps:$4 sm:$0xff]   ;;  %v1204_v2 = vld [vmem:[#allocation3 + $0xf0] ss:$8 sps:$4 sm:$0xff]  }
  0x43   : > { %764 = vmatpush1.bf16.msra.mxu0 %v1145_v23  ;;  %724 = vmatprep.subr.bf16.mxu1 %v1146_v24  ;;  %v1202_v1 = vld [vmem:[#allocation3 + $0x1f4] ss:$8 sps:$4 sm:$0xff]   ;;  %v1205_v3 = vld [vmem:[#allocation3 + $0x1f0] ss:$8 sps:$4 sm:$0xff]  }
  0x44   : > { %765 = vmatprep.subr.bf16.mxu0 %v1148_v25  ;;  %v322_v5 = vld [vmem:[%s1359_s14 + $0x10] sm:$0xff] }
  0x45   : > { %v326_v7 = vpack.c.bf16 %v322_v5, %v322_v5 }
  0x46   : > { %725 = vmatpush1.bf16.msra.mxu1 %v1150_v26 }
  0x47   : > { %766 = vmatpush1.bf16.msra.mxu0 %v1151_v27  ;;  %726 = vmatprep.subr.bf16.mxu1 %v1152_v28  ;;  %v822_v28 = vlaneseq }
  0x48   : > { %767 = vmatprep.subr.bf16.mxu0 %v1154_v29 }
  0x4a   : > { %727 = vmatpush1.bf16.msra.mxu1 %v1156_v30  ;;  %v823_v30 = vshrl.u32 %v822_v28, 7 }
  0x4b   : > { %768 = vmatpush1.bf16.msra.mxu0 %v1157_v31  ;;  %728 = vmatprep.subr.bf16.mxu1 %v1158_v32 }
  0x4c   : > { %769 = vmatprep.subr.bf16.mxu0 %v1160_v33  ;;  %v824_v31 = vsub.s32 0, %v823_v30  ;;  %v828_v32 = vsub.s32 1, %v823_v30  ;;  %v820_v33 = vld [vmem:[%s1386_s2] sm:$0x3] }
  0x4e   : > { %729 = vmatpush1.bf16.msra.mxu1 %v1162_v34  ;;  %v834_v34 = vld [vmem:[%s1387_s3] sm:$0x3] }
  0x4f   : > { %770 = vmatpush1.bf16.msra.mxu0 %v1163_v35  ;;  %730 = vmatprep.subr.bf16.mxu1 %v1164_v36  ;;  %v825_v35 = vrot.slane %v820_v33, %v824_v31  ;;  %v829_v36 = vrot.slane %v820_v33, %v828_v32 }
  0x50   : > { %771 = vmatprep.subr.bf16.mxu0 %v1166_v37 }
  0x52   : > { %731 = vmatpush1.bf16.msra.mxu1 %v1168_v38  ;;  %v839_v38 = vrot.slane %v834_v34, %v824_v31 }
  0x53   : > { %772 = vmatpush1.bf16.msra.mxu0 %v1169_v39  ;;  %732 = vmatprep.subr.bf16.mxu1 %v1170_v40  ;;  %v843_v39 = vrot.slane %v834_v34, %v828_v32 }
  0x54   : > { %773 = vmatprep.subr.bf16.mxu0 %v1172_v41 }
  0x56   : > { %733 = vmatpush1.bf16.msra.mxu1 %v1174_v42 }
  0x57   : > { %774 = vmatpush1.bf16.msra.mxu0 %v1175_v43  ;;  %734 = vmatprep.subr.bf16.mxu1 %v1176_v44 }
  0x58   : > { %775 = vmatprep.subr.bf16.mxu0 %v1178_v45 }
  0x5a   : > { %735 = vmatpush1.bf16.msra.mxu1 %v1180_v49 }
  0x5b   : > { %776 = vmatpush1.bf16.msra.mxu0 %v1181_v50  ;;  %736 = vmatprep.subr.bf16.mxu1 %v1182_v52 }
  0x5c   : > { %777 = vmatprep.subr.bf16.mxu0 %v1184_v53 }
  0x5e   : > { %737 = vmatpush1.bf16.msra.mxu1 %v1186_v54 }
  0x5f   : > { %778 = vmatpush1.bf16.msra.mxu0 %v1187_v55  ;;  %738 = vmatprep.subr.bf16.mxu1 %v1188_v56 }
  0x60   : > { %779 = vmatprep.subr.bf16.mxu0 %v1190_v57 }
  0x62   : > { %739 = vmatpush1.bf16.msra.mxu1 %v1192_v58 }
  0x63   : > { %780 = vmatpush1.bf16.msra.mxu0 %v1193_v59  ;;  %740 = vmatprep.subr.bf16.mxu1 %v1194_v60 }
  0x64   : > { %781 = vmatprep.subr.bf16.mxu0 %v1196_v61 }
  0x66   : > { %741 = vmatpush1.bf16.msra.mxu1 %v1198_v62 }
  0x67   : > { %782 = vmatpush1.bf16.msra.mxu0 %v1199_v63  ;;  %742 = vmatprep.subr.bf16.mxu1 %v1200_v0 }
  0x68   : > { %783 = vmatprep.subr.bf16.mxu0 %v1202_v1 }
  0x6a   : > { %743 = vmatpush1.bf16.msra.mxu1 %v1204_v2 }
  0x6b   : > { %784 = vmatpush1.bf16.msra.mxu0 %v1205_v3 }
  0x6d   : > { %745 = vmatmul.mubr.bf16.vlgmr.msra.gmra.mrb[0].mxu1 %v324_v6 }
  0x6e   : > { %786 = vmatmul.mubr.bf16.vlgmr.msra.gmra.mrb[0].mxu0 %v326_v7 }
 0x140   : > { %v746_v8 = vpop.f32.mrb[0].mxu1 }
 0x141   : > { %v787_v9 = vpop.f32.mrb[0].mxu0  ;;  %v748_v11 = vpop.f32.mrb[1].mxu1 }
 0x142   : > { %v788_v10 = vadd.f32 %v787_v9, %v746_v8  ;;  %v789_v12 = vpop.f32.mrb[1].mxu0  ;;  %v750_v14 = vpop.f32.mrb[2].mxu1 }
 0x143   : > { %v790_v13 = vadd.f32 %v789_v12, %v748_v11  ;;  %v791_v15 = vpop.f32.mrb[2].mxu0  ;;  %v751_v16 = vpop.f32.mrb[3].mxu1 }
 0x144   : > { %v792_v17 = vpop.f32.mrb[3].mxu0 }
 0x145   : > { %v803_v18 = vadd.f32 %v790_v13, %v788_v10 }
 0x147   : > { %804 = vadd.xlane.f32.xlu0 %v803_v18 }
 0x1d4   : > { %v805_v19 = vpop.xlane.xlu0 %804 }
 0x1d5   : > { %v807_v20 = vmul.f32 0.00390625, %v805_v19 }
 0x1d7   : > { %v808_v21 = vsub.f32 %v788_v10, %v807_v20  ;;  %v809_v22 = vsub.f32 %v790_v13, %v807_v20 }
 0x1d9   : > { %v810_v23 = vmul.f32 %v808_v21, %v808_v21  ;;  %v811_v24 = vmul.f32 %v809_v22, %v809_v22 }
 0x1db   : > { %v812_v25 = vadd.f32 %v811_v24, %v810_v23 }
 0x1dd   : > { %813 = vadd.xlane.f32.xlu0 %v812_v25 }
 0x26a   : > { %v814_v26 = vpop.xlane.xlu0 %813 }
 0x26b   : > { %v815_v27 = vmul.f32 0.00390625, %v814_v26 }
 0x26d   : > { %v816_v29 = vadd.f32 1e-06, %v815_v27 }
 0x26f   : > { %1206 = vrsqrt.f32 %v816_v29 }
 0x279   : > { %v1207_v37 = vpop.eup %1206 }
 0x27a   : > { %v818_v40 = vmul.f32 %v1207_v37, %v808_v21  ;;  %v819_v41 = vmul.f32 %v1207_v37, %v809_v22 }
 0x27c   : > { %v832_v42 = vmul.f32 %v825_v35, %v818_v40  ;;  %v833_v43 = vmul.f32 %v829_v36, %v819_v41 }
 0x27e   : > { %v846_v44 = vadd.f32 %v839_v38, %v832_v42  ;;  %v847_v45 = vadd.f32 %v843_v39, %v833_v43 }
 0x280   : > { %v1070_v46 = vpack.c.bf16 %v847_v45, %v846_v44 }
 0x282   : > { %856 = vst [vmem:[%s310_s26] sm:$0xff] %v1070_v46 }
 0x283 PF: > { %s15_s17 = sadd.s32 1, %s1262_s17   ;;  %s1397_s15 = smov %s1258_s16 }
 0x284   : > { %p12_p4 = scmp.ge.s32.totalorder %s15_s17, 4   ;;  %s1398_s16 = smov %s1400_s19 }
 0x286   :  { %14 = sbr.rel (!%p12_p4) target bundleno = 2 (0x2), region = 86 }
 0x28d   :  { %887 = vsyncpa [#allocation4], 1 }
 0x28e   :  { %889 = vsyncpa [#allocation4 + $0x1], 1 }

// kernel: resampler_with_text_forward.13
= control target key start
LH: loop header
LB: loop body
LE: loop exit
PB: predicated region body
PF: predicated region fallthrough
CT: control target
= control target key end

     0   :  { %s1429_s15 = smov 0   ;;  %s1431_s16 = smov 0   ;;  %s1669_s0 = inlined_call_operand.vmem [shape: bf16[2,16,256], index: 0, kind: input, shape index: {}]   ;;  %s1670_s1 = inlined_call_operand.vmem [shape: bf16[2,128,512], index: 1, kind: input, shape index: {}, may-alias: {1,2}]   ;;  %s1671_s2 = inlined_call_operand.vmem [shape: bf16[2,128,512], index: 2, kind: input, shape index: {}, may-alias: {1,2}]   ;;  %s1672_s3 = inlined_call_operand.vmem [shape: f32[2,1,128], index: 3, kind: input, shape index: {}]   ;;  %s1673_s4 = inlined_call_operand.vmem [shape: bf16[2,16,256], index: 4, kind: output, shape index: {}]  }
   0x1   :  { %s1433_s17 = smov 0   ;;  %s1435_s18 = smov 0  }
   0x2   :  { %s1437_s19 = smov 0   ;;  %s1439_s20 = smov 0  }
   0x3   :  { %s1441_s21 = smov 0   ;;  %s1443_s22 = smov 0  }
   0x4   :  { %s1445_s23 = smov 0  }
   0x5 LB: > { %s1097_s24 = sadd.s32 4294967295, %s1398_s23   ;;  %s36_s25 = sadd.s32 1, %s1390_s21  ;;  %s1398_s23 = sphi %s1445_s23, %s14_s23   ;;  %s1394_s22 = sphi %s1443_s22, %s1690_s22   ;;  %s1390_s21 = sphi %s1441_s21, %s1689_s21   ;;  %s1386_s20 = sphi %s1439_s20, %s1688_s20   ;;  %s1382_s19 = sphi %s1437_s19, %s1687_s19   ;;  %s1378_s18 = sphi %s1435_s18, %s1686_s18   ;;  %s1374_s17 = sphi %s1433_s17, %s1685_s17   ;;  %s1370_s16 = sphi %s1431_s16, %s1684_s16   ;;  %s1366_s15 = sphi %s1429_s15, %s1683_s15  }
   0x6   : > { %p38_p0 = scmp.ge.s32.totalorder %s36_s25, 2  ;;  %s40_s26 = sadd.s32 1, %s1394_s22 }
   0x7   : > { %s51_s27 = sadd.s32 1, %s1378_s18  ;;  %p58_p1 = scmp.ne.s32.totalorder %s1378_s18, %s1374_s17 }
   0x8   : > { %s1692_s25 = smov (%p38_p0, %s36_s25), 0  ;;  %s1694_s26 = smov (!%p38_p0, %s40_s26), %s1394_s22 }
   0x9   : > { %1676 = sst [smem:[#allocation9_spill]] %s1692_s25  ;;  %s47_s28 = ssub.s32 %s1390_s21, %s1692_s25 }
   0xa   : > { %p59_p2 = scmp.eq.s32.totalorder %s1398_s23, 0  ;;  %p42_p3 = scmp.ge.s32.totalorder %s1694_s26, 2 }
   0xb   : > { %s104_s29 = sadd.s32 2, %s1390_s21  ;;  %s105_s5 = sadd.s32 2, %s1692_s25 }
   0xc   : > { %p1492_p4 = por %p59_p2, %p58_p1  ;;  %s1696_s26 = smov (%p42_p3, %s1694_s26), 0 }
   0xd   : > { %1678 = sst [smem:[#allocation10_spill]] %s1696_s26  ;;  %s109_s6 = ssub.s32 %s104_s29, %s105_s5 }
   0xe   : > { %s113_s7 = sadd.s32 1, %s1370_s16  ;;  %s44_s8 = ssub.s32 %s1394_s22, %s1696_s26 }
   0xf   : > { %p120_p5 = scmp.ne.s32.totalorder %s1370_s16, %s1366_s15  ;;  %s48_s9 = sor.u32 %s47_s28, %s44_s8 }
  0x10   : > { %s110_s10 = sor.u32 %s109_s6, %s44_s8  ;;  %p49_p6 = scmp.eq.s32.totalorder %s48_s9, 0 }
  0x11   : > { %p111_p7 = scmp.eq.s32.totalorder %s110_s10, 0  ;;  %p1506_p8 = por %p120_p5, %p59_p2 }
  0x12   : > { %p182_p9 = scmp.eq.s32.totalorder %s1097_s24, 3  ;;  %p1100_p11 = scmp.ge.s32.totalorder %s1398_s23, 4 }
  0x13   : > { %s1511_s12 = scalar_select %p49_p6, %s1378_s18, %s51_s27  }
  0x14   : > { %s1514_s13 = scalar_select %p111_p7, %s1370_s16, %s113_s7  }
  0x15   : > { %p1519_p10 = por %p182_p9, %p58_p1  ;;  %204 = sbr.rel (%p1100_p11) target bundleno = 69 (0x45), region = 16 }
  0x1c   : > { %207 = sbr.rel (!%p1492_p4) target bundleno = 35 (0x23), region = 20  ;;  %s209_s28 = sand.u32 (%p1492_p4), 1, %s1378_s18  }
  0x1d   : > { %s1102_s24 = sshll.u32 (%p1492_p4), %s1394_s22, 2  ;;  %s1101_s27 = sshll.u32 (%p1492_p4), %s209_s28, 3 }
  0x1e   : > { %s216_s29 = sadd.s32 (%p1492_p4), %s1390_s21, %s1102_s24  ;;  %s211_s9 = scalar_lea.vmem (%p1492_p4), [#allocation5], %s1101_s27 }
  0x1f   : > { %s1103_s5 = sshll.u32 (%p1492_p4), %s216_s29, 2 }
  0x20   : > { %s218_s8 = scalar_lea.vmem (%p1492_p4), %s1669_s0, %s1103_s5 }
  0x21   : > { %v234_v0 = vld [vmem:[%s218_s8] sm:$0xf] (%p1492_p4)  ;;  %v236_v1 = vld [vmem:[%s218_s8 + $0x8] sm:$0xf] (%p1492_p4) }
  0x22   : > { %235 = vst [vmem:[%s211_s9] sm:$0xf] (%p1492_p4), %v234_v0  ;;  %237 = vst [vmem:[%s211_s9 + $0x4] sm:$0xf] (%p1492_p4), %v236_v1 }
  0x23 PF: > { %264 = sbr.rel (!%p1492_p4) target bundleno = 52 (0x34), region = 61  ;;  %s266_s10 = sand.u32 (%p1492_p4), 1, %s1378_s18  }
  0x24   : > { %s1105_s28 = sshll.u32 (%p1492_p4), %s1394_s22, 6  ;;  %s1104_s24 = sshll.u32 (%p1492_p4), %s266_s10, 6 }
  0x25   : > { %s273_s29 = sadd.s32 (%p1492_p4), %s1390_s21, %s1105_s28  ;;  %s268_s30 = scalar_lea.vmem (%p1492_p4), [#allocation6], %s1104_s24 }
  0x26   : > { %s1106_s26 = sshll.u32 (%p1492_p4), %s273_s29, 2 }
  0x27   : > { %s1540_s5 = scalar_lea.vmem (%p1492_p4), %s1670_s1, %s1106_s26 }
  0x28   : > { %v291_v2 = vld [vmem:[%s1540_s5] sm:$0xf] (%p1492_p4)  ;;  %v293_v3 = vld [vmem:[%s1540_s5 + $0x10] sm:$0xf] (%p1492_p4) }
  0x29   : > { %v295_v4 = vld [vmem:[%s1540_s5 + $0x20] sm:$0xf] (%p1492_p4)  ;;  %292 = vst [vmem:[%s268_s30] sm:$0xf] (%p1492_p4), %v291_v2  ;;  %294 = vst [vmem:[%s268_s30 + $0x4] sm:$0xf] (%p1492_p4), %v293_v3 }
  0x2a   : > { %296 = vst [vmem:[%s268_s30 + $0x8] sm:$0xf] %v295_v4  ;;  %v297_v5 = vld [vmem:[%s1540_s5 + $0x30] sm:$0xf]  ;;  %v299_v6 = vld [vmem:[%s1540_s5 + $0x40] sm:$0xf] }
  0x2b   : > { %v301_v7 = vld [vmem:[%s1540_s5 + $0x50] sm:$0xf]  ;;  %298 = vst [vmem:[%s268_s30 + $0xc] sm:$0xf] %v297_v5  ;;  %300 = vst [vmem:[%s268_s30 + $0x10] sm:$0xf] %v299_v6 }
  0x2c   : > { %302 = vst [vmem:[%s268_s30 + $0x14] sm:$0xf] %v301_v7  ;;  %v303_v8 = vld [vmem:[%s1540_s5 + $0x60] sm:$0xf]  ;;  %v305_v9 = vld [vmem:[%s1540_s5 + $0x70] sm:$0xf] }
  0x2d   : > { %v307_v10 = vld [vmem:[%s1540_s5 + $0x80] sm:$0xf]  ;;  %304 = vst [vmem:[%s268_s30 + $0x18] sm:$0xf] %v303_v8  ;;  %306 = vst [vmem:[%s268_s30 + $0x1c] sm:$0xf] %v305_v9 }
  0x2e   : > { %308 = vst [vmem:[%s268_s30 + $0x20] sm:$0xf] %v307_v10  ;;  %v309_v11 = vld [vmem:[%s1540_s5 + $0x90] sm:$0xf]  ;;  %v311_v12 = vld [vmem:[%s1540_s5 + $0xa0] sm:$0xf] }
  0x2f   : > { %v313_v13 = vld [vmem:[%s1540_s5 + $0xb0] sm:$0xf]  ;;  %310 = vst [vmem:[%s268_s30 + $0x24] sm:$0xf] %v309_v11  ;;  %312 = vst [vmem:[%s268_s30 + $0x28] sm:$0xf] %v311_v12 }
  0x30   : > { %314 = vst [vmem:[%s268_s30 + $0x2c] sm:$0xf] %v313_v13  ;;  %v315_v14 = vld [vmem:[%s1540_s5 + $0xc0] sm:$0xf]  ;;  %v317_v15 = vld [vmem:[%s1540_s5 + $0xd0] sm:$0xf] }
  0x31   : > { %v319_v16 = vld [vmem:[%s1540_s5 + $0xe0] sm:$0xf]  ;;  %316 = vst [vmem:[%s268_s30 + $0x30] sm:$0xf] %v315_v14  ;;  %318 = vst [vmem:[%s268_s30 + $0x34] sm:$0xf] %v317_v15 }
  0x32   : > { %320 = vst [vmem:[%s268_s30 + $0x38] sm:$0xf] %v319_v16  ;;  %v321_v17 = vld [vmem:[%s1540_s5 + $0xf0] sm:$0xf] }
  0x33   : > { %322 = vst [vmem:[%s268_s30 + $0x3c] sm:$0xf] %v321_v17 }
  0x34 PF: > { %377 = sbr.rel (!%p1506_p8) target bundleno = 69 (0x45), region = 102  ;;  %s379_s25 = sand.u32 (%p1506_p8), 1, %s1370_s16  }
  0x35   : > { %s1108_s26 = sshll.u32 (%p1506_p8), %s1394_s22, 6  ;;  %s1107_s27 = sshll.u32 (%p1506_p8), %s379_s25, 6 }
  0x36   : > { %s991_s7 = sadd.s32 (%p1506_p8), %s1390_s21, %s1108_s26  ;;  %s381_s11 = scalar_lea.vmem (%p1506_p8), [#allocation7], %s1107_s27 }
  0x37   : > { %s1109_s8 = sshll.u32 (%p1506_p8), %s991_s7, 2 }
  0x38   : > { %s1566_s28 = scalar_lea.vmem (%p1506_p8), %s1671_s2, %s1109_s8 }
  0x39   : > { %v1110_v18 = vld [vmem:[%s1566_s28 + $0x8] sm:$0xf] (%p1506_p8)  ;;  %v1111_v19 = vld [vmem:[%s1566_s28 + $0x18] sm:$0xf] (%p1506_p8) }
  0x3a   : > { %v1112_v20 = vld [vmem:[%s1566_s28 + $0x28] sm:$0xf] (%p1506_p8)  ;;  %406 = vst [vmem:[%s381_s11] sm:$0xf] (%p1506_p8), %v1110_v18  ;;  %408 = vst [vmem:[%s381_s11 + $0x4] sm:$0xf] (%p1506_p8), %v1111_v19 }
  0x3b   : > { %410 = vst [vmem:[%s381_s11 + $0x8] sm:$0xf] %v1112_v20  ;;  %v1113_v21 = vld [vmem:[%s1566_s28 + $0x38] sm:$0xf]  ;;  %v1114_v22 = vld [vmem:[%s1566_s28 + $0x48] sm:$0xf] }
  0x3c   : > { %v1115_v23 = vld [vmem:[%s1566_s28 + $0x58] sm:$0xf]  ;;  %412 = vst [vmem:[%s381_s11 + $0xc] sm:$0xf] %v1113_v21  ;;  %414 = vst [vmem:[%s381_s11 + $0x10] sm:$0xf] %v1114_v22 }
  0x3d   : > { %416 = vst [vmem:[%s381_s11 + $0x14] sm:$0xf] %v1115_v23  ;;  %v1116_v24 = vld [vmem:[%s1566_s28 + $0x68] sm:$0xf]  ;;  %v1117_v25 = vld [vmem:[%s1566_s28 + $0x78] sm:$0xf] }
  0x3e   : > { %v1118_v26 = vld [vmem:[%s1566_s28 + $0x88] sm:$0xf]  ;;  %418 = vst [vmem:[%s381_s11 + $0x18] sm:$0xf] %v1116_v24  ;;  %420 = vst [vmem:[%s381_s11 + $0x1c] sm:$0xf] %v1117_v25 }
  0x3f   : > { %422 = vst [vmem:[%s381_s11 + $0x20] sm:$0xf] %v1118_v26  ;;  %v1119_v27 = vld [vmem:[%s1566_s28 + $0x98] sm:$0xf]  ;;  %v1120_v28 = vld [vmem:[%s1566_s28 + $0xa8] sm:$0xf] }
  0x40   : > { %v1121_v29 = vld [vmem:[%s1566_s28 + $0xb8] sm:$0xf]  ;;  %424 = vst [vmem:[%s381_s11 + $0x24] sm:$0xf] %v1119_v27  ;;  %426 = vst [vmem:[%s381_s11 + $0x28] sm:$0xf] %v1120_v28 }
  0x41   : > { %428 = vst [vmem:[%s381_s11 + $0x2c] sm:$0xf] %v1121_v29  ;;  %v1122_v30 = vld [vmem:[%s1566_s28 + $0xc8] sm:$0xf]  ;;  %v1123_v31 = vld [vmem:[%s1566_s28 + $0xd8] sm:$0xf] }
  0x42   : > { %v1124_v32 = vld [vmem:[%s1566_s28 + $0xe8] sm:$0xf]  ;;  %430 = vst [vmem:[%s381_s11 + $0x30] sm:$0xf] %v1122_v30  ;;  %432 = vst [vmem:[%s381_s11 + $0x34] sm:$0xf] %v1123_v31 }
  0x43   : > { %434 = vst [vmem:[%s381_s11 + $0x38] sm:$0xf] %v1124_v32  ;;  %v1125_v33 = vld [vmem:[%s1566_s28 + $0xf8] sm:$0xf] }
  0x44   : > { %436 = vst [vmem:[%s381_s11 + $0x3c] sm:$0xf] %v1125_v33 }
  0x45 PF: > { %p1126_p12 = scmp.ge.s32.totalorder %s1398_s23, 1  ;;  %p499_p13 = scmp.lt.s32.totalorder %s1398_s23, 5 }
  0x47   : > { %p500_p0 = pnand %p1126_p12, %p499_p13 }
  0x48   : > { %s506_s24 = sand.u32 (!%p500_p0), 1, %s1374_s17   ;;  %v1400_v34 = vmov (!%p500_p0), 0.0   ;;  %vm1401_vm0 = vmmov (!%p500_p0), 0   ;;  %vm574_vm1 = vcmask (!%p500_p0), 7168   ;;  %v1402_v44 = vmov (!%p500_p0), -1e+30  }
  0x49   : > { %503 = sbr.rel (%p500_p0) target bundleno = 948 (0x3b4), region = 147  ;;  %1181 = vmatprep.subr.bf16.mxu0 (!%p500_p0), %v1400_v34  ;;  %s1128_s29 = sshll.u32 (!%p500_p0), %s506_s24, 6  ;;  %1197 = vmatprep.mubr.msk.bf16.mxu0 (!%p500_p0), %vm1401_vm0, %v1400_v34  ;;  %575 = vst.msk [vmem:[#allocation2] sm:$0xff] (!%p500_p0), %vm574_vm1, %v1402_v44  ;;  %576 = vst.msk [vmem:[#allocation2 + $0x8] sm:$0xff] (!%p500_p0), %vm574_vm1, %v1402_v44  ;;  %v1403_v52 = vmov (!%p500_p0), 0  }
  0x4a   : > { %1201 = vmatprep.subr.bf16.mxu1 (!%p500_p0), %v1400_v34  ;;  %1217 = vmatprep.mubr.msk.bf16.mxu1 (!%p500_p0), %vm1401_vm0, %v1400_v34  ;;  %s515_s6 = scalar_lea.vmem (!%p500_p0), [#allocation6], %s1128_s29  ;;  %s1592_s5 = sshll.u32 (!%p500_p0), %s506_s24, 3  ;;  %577 = vst.msk [vmem:[#allocation3] sm:$0xff] (!%p500_p0), %vm574_vm1, %v1400_v34  ;;  %578 = vst.msk [vmem:[#allocation3 + $0x8] sm:$0xff] (!%p500_p0), %vm574_vm1, %v1400_v34 }
  0x4b   : > { %v1299_v35 = vld [vmem:[%s515_s6] sm:$0xff] (!%p500_p0)   ;;  %v1300_v36 = vld [vmem:[%s515_s6 + $0x8] sm:$0xff] (!%p500_p0)   ;;  %s508_s17 = scalar_lea.vmem (!%p500_p0), [#allocation5], %s1592_s5  ;;  %v1301_v37 = vld [vmem:[%s515_s6 + $0x10] sm:$0xff] (!%p500_p0)   ;;  %p562_p1 = scmp.lt.s32.totalorder (!%p500_p0), %s1386_s20, 1  ;;  %1297 = vset.pattern.permute.xlu1 (!%p500_p0), %v1403_v52  ;;  %1298 = vset.pattern.permute.xlu0 (!%p500_p0), %v1403_v52 }
  0x4c   : > { %1182 = vmatpush3.bf16.xpose.msra.mxu0 (!%p500_p0), %v1299_v35  ;;  %v1302_v38 = vld [vmem:[%s515_s6 + $0x18] sm:$0xff] (!%p500_p0)   ;;  %v1303_v39 = vld [vmem:[%s515_s6 + $0x20] sm:$0xff] (!%p500_p0)   ;;  %v1304_v40 = vld [vmem:[%s515_s6 + $0x28] sm:$0xff] (!%p500_p0)   ;;  %s520_s7 = sand.u32 (!%p500_p0), 1, %s1366_s15   ;;  %s557_s15 = scalar_lea.vmem (!%p500_p0), [#allocation8], %s1592_s5 }
  0x4d   : > { %1183 = vmatprep.subr.bf16.mxu0 (!%p500_p0), %v1400_v34  ;;  %v1305_v41 = vld [vmem:[%s515_s6 + $0x30] sm:$0xff] (!%p500_p0)   ;;  %v1306_v42 = vld [vmem:[%s515_s6 + $0x38] sm:$0xff] (!%p500_p0)   ;;  %s1129_s8 = sshll.u32 (!%p500_p0), %s520_s7, 6 }
  0x4e   : > { %v1307_v43 = vld [vmem:[%s508_s17] sm:$0xff] (!%p500_p0)   ;;  %s1613_s9 = scalar_lea.vmem (!%p500_p0), [#allocation7], %s1129_s8 }
  0x4f   : > { %v1308_v53 = vld [vmem:[%s1613_s9] sm:$0xff] (!%p500_p0)   ;;  %v1309_v54 = vld [vmem:[%s1613_s9 + $0x8] sm:$0xff] (!%p500_p0)   ;;  %v1310_v55 = vld [vmem:[%s1613_s9 + $0x10] sm:$0xff] (!%p500_p0)  }
  0x50   : > { %s563_s30 = scalar_select %p562_p1, %s1386_s20, 1  ;;  %1202 = vmatpush3.bf16.msra.mxu1 %v1308_v53  ;;  %v717_v56 = vld [vmem:[#allocation2] sm:$0xff]  ;;  %v718_v59 = vld [vmem:[#allocation2 + $0x8] sm:$0xff]  ;;  %v1312_v1 = vld [vmem:[%s1613_s9 + $0x20] sm:$0xff]  }
  0x51   : > { %1203 = vmatprep.subr.bf16.mxu1 %v1400_v34  ;;  %v1311_v61 = vld [vmem:[%s1613_s9 + $0x18] sm:$0xff]   ;;  %v1313_v2 = vld [vmem:[%s1613_s9 + $0x28] sm:$0xff]   ;;  %v1314_v3 = vld [vmem:[%s1613_s9 + $0x30] sm:$0xff]   ;;  %s1152_s10 = sshll.u32 (%p1519_p10), %s1386_s20, 2 }
  0x52   : > { %s567_s27 = scalar_lea.vmem %s1672_s3, %s563_s30  ;;  %v1315_v4 = vld [vmem:[%s1613_s9 + $0x38] sm:$0xff]   ;;  %v747_v18 = vld [vmem:[#allocation3] sm:$0xff]  ;;  %v748_v21 = vld [vmem:[#allocation3 + $0x8] sm:$0xff]  ;;  %s912_s28 = sadd.s32 (%p1519_p10), %s1382_s19, %s1152_s10 }
  0x53   : > { %v1131_v45 = vld [vmem:[%s567_s27] ss:$0 sm:$0xff]  ;;  %s1153_s11 = sshll.u32 (%p1519_p10), %s912_s28, 2 }
  0x54   : > { %1184 = vmatpush3.bf16.xpose.msra.mxu0 %v1300_v36  ;;  %1204 = vmatpush3.bf16.msra.mxu1 %v1309_v54  ;;  %s914_s6 = scalar_lea.vmem (%p1519_p10), %s1673_s4, %s1153_s11 }
  0x55   : > { %1185 = vmatprep.subr.bf16.mxu0 %v1400_v34  ;;  %1205 = vmatprep.subr.bf16.mxu1 %v1400_v34 }
  0x58   : > { %1206 = vmatpush3.bf16.msra.mxu1 %v1310_v55 }
  0x59   : > { %1207 = vmatprep.subr.bf16.mxu1 %v1400_v34 }
  0x5c   : > { %1186 = vmatpush3.bf16.xpose.msra.mxu0 %v1301_v37  ;;  %1208 = vmatpush3.bf16.msra.mxu1 %v1311_v61 }
  0x5d   : > { %1187 = vmatprep.subr.bf16.mxu0 %v1400_v34  ;;  %1209 = vmatprep.subr.bf16.mxu1 %v1400_v34 }
  0x60   : > { %1210 = vmatpush3.bf16.msra.mxu1 %v1312_v1 }
  0x61   : > { %1211 = vmatprep.subr.bf16.mxu1 %v1400_v34 }
  0x64   : > { %1188 = vmatpush3.bf16.xpose.msra.mxu0 %v1302_v38  ;;  %1212 = vmatpush3.bf16.msra.mxu1 %v1313_v2 }
  0x65   : > { %1189 = vmatprep.subr.bf16.mxu0 %v1400_v34  ;;  %1213 = vmatprep.subr.bf16.mxu1 %v1400_v34 }
  0x68   : > { %1214 = vmatpush3.bf16.msra.mxu1 %v1314_v3 }
  0x69   : > { %1215 = vmatprep.subr.bf16.mxu1 %v1400_v34 }
  0x6c   : > { %1190 = vmatpush3.bf16.xpose.msra.mxu0 %v1303_v39  ;;  %1216 = vmatpush3.bf16.msra.mxu1 %v1315_v4 }
  0x6d   : > { %1191 = vmatprep.subr.bf16.mxu0 %v1400_v34 }
  0x74   : > { %1192 = vmatpush3.bf16.xpose.msra.mxu0 %v1304_v40 }
  0x75   : > { %1193 = vmatprep.subr.bf16.mxu0 %v1400_v34 }
  0x7c   : > { %1194 = vmatpush3.bf16.xpose.msra.mxu0 %v1305_v41 }
  0x7d   : > { %1195 = vmatprep.subr.bf16.mxu0 %v1400_v34 }
  0x84   : > { %1196 = vmatpush3.bf16.xpose.msra.mxu0 %v1306_v42 }
  0x8b   : > { %1198 = vmatmul.mubr.bf16.vlgmr.msra.gmra.mrb[0].mxu0 %v1307_v43 }
 0x15e   : > { %v710_v46 = vpop.f32.mrb[0].mxu0 }
 0x15f   : > { %v711_v47 = vadd.f32 %v1131_v45, %v710_v46  ;;  %v1199_v48 = vpop.f32.mrb[1].mxu0 }
 0x160   : > { %v713_v49 = vpop.f32.mrb[2].mxu0 }
 0x161   : > { %719 = vmax.xlane.f32.xlu0 %v711_v47  ;;  %v1200_v50 = vpop.f32.mrb[3].mxu0  ;;  %v714_v51 = vadd.f32 %v1131_v45, %v713_v49 }
 0x165   : > { %721 = vmax.xlane.f32.xlu0 %v714_v51 }
 0x1ee   : > { %v720_v57 = vpop.xlane.xlu0 %719 }
 0x1ef   : > { %v723_v58 = vmax.f32 %v717_v56, %v720_v57 }
 0x1f1   : > { %v725_v60 = vsub.f32 %v717_v56, %v723_v58  ;;  %868 = vst.msk [vmem:[#allocation2] sm:$0xff] %vm574_vm1, %v723_v58  ;;  %733 = vperm.xlu1 %1297, %v723_v58  }
 0x1f2   : > { %v722_v62 = vpop.xlane.xlu0 %721 }
 0x1f3   : > { %v724_v63 = vmax.f32 %v718_v59, %v722_v62  ;;  %v727_v15 = vmul.f32 1.442695, %v725_v60 }
 0x1f5   : > { %v726_v0 = vsub.f32 %v718_v59, %v724_v63  ;;  %869 = vst.msk [vmem:[#allocation2 + $0x8] sm:$0xff] %vm574_vm1, %v724_v63  ;;  %738 = vperm.xlu1 %1297, %v724_v63  }
 0x1f7   : > { %v729_v14 = vmul.f32 1.442695, %v726_v0 }
 0x270   : > { %v734_v5 = vpop.permute.xlu1 %733 }
 0x271   : > { %v741_v6 = vsub.f32 %v711_v47, %v734_v5 }
 0x273   : > { %v743_v7 = vmul.f32 1.442695, %v741_v6 }
 0x274   : > { %v739_v8 = vpop.permute.xlu1 %738 }
 0x275   : > { %1316 = vpow2.f32 %v743_v7  ;;  %v742_v9 = vsub.f32 %v714_v51, %v739_v8 }
 0x277   : > { %v745_v10 = vmul.f32 1.442695, %v742_v9 }
 0x279   : > { %1318 = vpow2.f32 %v745_v10 }
 0x27a   : > { %1320 = vpow2.f32 %v729_v14 }
 0x27b   : > { %1322 = vpow2.f32 %v727_v15 }
 0x27f   : > { %v1317_v11 = vpop.eup %1316 }
 0x280   : > { %751 = vadd.xlane.f32.xlu0 %v1317_v11 }
 0x283   : > { %v1319_v12 = vpop.eup %1318 }
 0x284   : > { %753 = vadd.xlane.f32.xlu1 %v1319_v12  ;;  %v774_v13 = vpack.c.bf16 %v1319_v12, %v1317_v11  ;;  %v1321_v16 = vpop.eup %1320 }
 0x285   : > { %v1323_v17 = vpop.eup %1322  ;;  %v750_v23 = vmul.f32 %v1321_v16, %v748_v21 }
 0x286   : > { %1218 = vmatmul.mubr.bf16.vlgmr.msra.gmra.mrb[0].mxu1 %v774_v13  ;;  %v749_v19 = vmul.f32 %v1323_v17, %v747_v18 }
 0x295   : > { %769 = vperm.xlu1 %1297, %v1321_v16  }
 0x296   : > { %764 = vperm.xlu0 %1298, %v1323_v17  }
 0x30d   : > { %v752_v20 = vpop.xlane.xlu0 %751 }
 0x30e   : > { %v755_v22 = vadd.f32 %v752_v20, %v749_v19 }
 0x310   : > { %758 = vst.msk [vmem:[#allocation3] sm:$0xff] %vm574_vm1, %v755_v22 }
 0x311   : > { %v754_v24 = vpop.xlane.xlu1 %753 }
 0x312   : > { %v756_v25 = vadd.f32 %v754_v24, %v750_v23 }
 0x314   : > { %759 = vst.msk [vmem:[#allocation3 + $0x8] sm:$0xff] %vm574_vm1, %v756_v25 }
 0x315   : > { %v765_v34 = vpop.permute.xlu0 %764  ;;  %v770_v35 = vpop.permute.xlu1 %769 }
 0x316   : > { %v773_v37 = vmul.f32 0.0, %v770_v35  ;;  %v772_v38 = vmul.f32 0.0, %v765_v34 }
 0x317   : > { %v875_v26 = vld [vmem:[#allocation3] sm:$0xff] }
 0x318   : > { %1324 = vrcp.f32 %v875_v26 }
 0x31b   : > { %v876_v27 = vld [vmem:[#allocation3 + $0x8] sm:$0xff] }
 0x31c   : > { %1326 = vrcp.f32 %v876_v27 }
 0x322   : > { %v1325_v28 = vpop.eup %1324 }
 0x323   : > { %881 = vperm.xlu0 %1298, %v1325_v28  }
 0x326   : > { %v1327_v29 = vpop.eup %1326 }
 0x327   : > { %886 = vperm.xlu0 %1298, %v1327_v29  }
 0x359   : > { %v857_v30 = vpop.f32.mrb[0].mxu1 }
 0x35a   : > { %v1219_v31 = vpop.f32.mrb[1].mxu1  ;;  %v864_v39 = vadd.f32 %v857_v30, %v772_v38 }
 0x35b   : > { %v860_v32 = vpop.f32.mrb[2].mxu1 }
 0x35c   : > { %v1220_v33 = vpop.f32.mrb[3].mxu1  ;;  %v865_v40 = vadd.f32 %v860_v32, %v773_v37 }
 0x3a2   : > { %v882_v36 = vpop.permute.xlu0 %881 }
 0x3a3   : > { %v889_v42 = vmul.f32 %v882_v36, %v864_v39 }
 0x3a5   : > { %907 = sbr.rel (!%p1519_p10) target bundleno = 948 (0x3b4), region = 171 }
 0x3a6   : > { %v887_v41 = vpop.permute.xlu0 %886 }
 0x3a7   : > { %v890_v43 = vmul.f32 %v887_v41, %v865_v40 }
 0x3a9   : > { %v1161_v44 = vpack.c.bf16 %v890_v43, %v889_v42 }
 0x3ab   : > { %1162 = vst [vmem:[%s557_s15] sm:$0xff] %v1161_v44  }
 0x3b2   : > { %v930_v45 = vld [vmem:[%s557_s15] sm:$0xf]  ;;  %v932_v46 = vld [vmem:[%s557_s15 + $0x4] sm:$0xf] }
 0x3b3   : > { %931 = vst [vmem:[%s914_s6] sm:$0xf] %v930_v45  ;;  %933 = vst [vmem:[%s914_s6 + $0x8] sm:$0xf] %v932_v46 }
 0x3b4 PF: > { %s14_s23 = sadd.s32 1, %s1398_s23   ;;  %s1681_s14 = sld [smem:[#allocation9_spill]] }
 0x3b5   : > { %p11_p2 = scmp.ge.s32.totalorder %s14_s23, 6   ;;  %s1682_s5 = sld [smem:[#allocation10_spill]] }
 0x3b6   : > { %s1683_s15 = smov %s1370_s16  ;;  %s1684_s16 = smov %s1514_s13 }
 0x3b7   : > { %s1685_s17 = smov %s1378_s18  ;;  %s1686_s18 = smov %s1511_s12 }
 0x3b8   : > { %s1687_s19 = smov %s1390_s21  ;;  %s1688_s20 = smov %s1394_s22 }
 0x3b9   :  { %13 = sbr.rel (!%p11_p2) target bundleno = 5 (0x5), region = 262 }
 0x3ba   : > { %s1689_s21 = smov %s1681_s14 }
 0x3bb   : > { %s1690_s22 = smov %s1682_s5 }

// kernel: resampler_with_text_forward.12
= control target key start
LH: loop header
LB: loop body
LE: loop exit
PB: predicated region body
PF: predicated region fallthrough
CT: control target
= control target key end

     0   :  { %s2103_s12 = smov 0   ;;  %s2105_s13 = smov 0   ;;  %s2462_s0 = inlined_call_operand.vmem [shape: bf16[256,256], index: 0, kind: input, shape index: {}]   ;;  %s2463_s1 = inlined_call_operand.vmem [shape: bf16[256,512], index: 1, kind: input, shape index: {}]   ;;  %s2464_s2 = inlined_call_operand.vmem [shape: f32[1,512], index: 2, kind: input, shape index: {}]   ;;  %s2465_s3 = inlined_call_operand.vmem [shape: bf16[256,512], index: 3, kind: output, shape index: {}]  }
   0x1   :  { %s2107_s14 = smov 0  }
   0x2 LB: > { %s32_s15 = sadd.s32 1, %s2077_s13  ;;  %p1760_p0 = scmp.ge.s32.totalorder %s2081_s14, 1  ;;  %s2081_s14 = sphi %s2107_s14, %s13_s14   ;;  %s2077_s13 = sphi %s2105_s13, %s2467_s13   ;;  %s2073_s12 = sphi %s2103_s12, %s2466_s12  }
   0x3   : > { %p34_p1 = scmp.ge.s32.totalorder %s32_s15, 2  ;;  %p196_p2 = scmp.lt.s32.totalorder %s2081_s14, 3 }
   0x5   : > { %s2469_s15 = smov (%p34_p1, %s32_s15), 0  ;;  %p197_p3 = pnand %p1760_p0, %p196_p2 }
   0x6   : > { %v1939_v0 = vld [vmem:[%s2463_s1 + $0x4] ss:$16 sps:$4 sm:$0xff] (!%p197_p3)   ;;  %v1941_v1 = vld [vmem:[%s2463_s1 + $0xc] ss:$16 sps:$4 sm:$0xff] (!%p197_p3)   ;;  %v1943_v2 = vld [vmem:[%s2463_s1] ss:$16 sps:$4 sm:$0xff] (!%p197_p3)  }
   0x7   : > { %200 = sbr.rel (%p197_p3) target bundleno = 347 (0x15b), region = 32  ;;  %897 = vmatprep.subr.bf16.mxu0 (!%p197_p3), %v1939_v0  ;;  %v1944_v3 = vld [vmem:[%s2463_s1 + $0x8] ss:$16 sps:$4 sm:$0xff] (!%p197_p3)   ;;  %1010 = vmatprep.subr.bf16.mxu1 (!%p197_p3), %v1941_v1  ;;  %v1945_v4 = vld [vmem:[%s2463_s1 + $0x24] ss:$16 sps:$4 sm:$0xff] (!%p197_p3)   ;;  %s1761_s30 = sshll.u32 (!%p197_p3), %s2073_s12, 4 }
   0x8   : > { %898 = vmatpush1.bf16.msra.mxu0 (!%p197_p3), %v1943_v2  ;;  %1011 = vmatpush1.bf16.msra.mxu1 (!%p197_p3), %v1944_v3  ;;  %v1947_v5 = vld [vmem:[%s2463_s1 + $0x2c] ss:$16 sps:$4 sm:$0xff] (!%p197_p3)   ;;  %v1949_v6 = vld [vmem:[%s2463_s1 + $0x20] ss:$16 sps:$4 sm:$0xff] (!%p197_p3)   ;;  %v1950_v7 = vld [vmem:[%s2463_s1 + $0x28] ss:$16 sps:$4 sm:$0xff] (!%p197_p3)  }
   0x9   : > { %899 = vmatprep.subr.bf16.mxu0 (!%p197_p3), %v1945_v4  ;;  %1012 = vmatprep.subr.bf16.mxu1 (!%p197_p3), %v1947_v5  ;;  %v1951_v8 = vld [vmem:[%s2463_s1 + $0x44] ss:$16 sps:$4 sm:$0xff] (!%p197_p3)   ;;  %v1953_v9 = vld [vmem:[%s2463_s1 + $0x4c] ss:$16 sps:$4 sm:$0xff] (!%p197_p3)   ;;  %v1955_v10 = vld [vmem:[%s2463_s1 + $0x40] ss:$16 sps:$4 sm:$0xff] (!%p197_p3)  }
   0xa   : > { %v1956_v11 = vld [vmem:[%s2463_s1 + $0x48] ss:$16 sps:$4 sm:$0xff] (!%p197_p3)   ;;  %v1957_v12 = vld [vmem:[%s2463_s1 + $0x64] ss:$16 sps:$4 sm:$0xff] (!%p197_p3)   ;;  %v1959_v13 = vld [vmem:[%s2463_s1 + $0x6c] ss:$16 sps:$4 sm:$0xff] (!%p197_p3)  }
   0xb   : > { %v1961_v14 = vld [vmem:[%s2463_s1 + $0x60] ss:$16 sps:$4 sm:$0xff] (!%p197_p3)   ;;  %v1962_v15 = vld [vmem:[%s2463_s1 + $0x68] ss:$16 sps:$4 sm:$0xff] (!%p197_p3)   ;;  %v1963_v16 = vld [vmem:[%s2463_s1 + $0x84] ss:$16 sps:$4 sm:$0xff] (!%p197_p3)  }
   0xc   : > { %900 = vmatpush1.bf16.msra.mxu0 (!%p197_p3), %v1949_v6  ;;  %1013 = vmatpush1.bf16.msra.mxu1 (!%p197_p3), %v1950_v7  ;;  %v1965_v17 = vld [vmem:[%s2463_s1 + $0x8c] ss:$16 sps:$4 sm:$0xff] (!%p197_p3)   ;;  %v1967_v18 = vld [vmem:[%s2463_s1 + $0x80] ss:$16 sps:$4 sm:$0xff] (!%p197_p3)   ;;  %v1968_v19 = vld [vmem:[%s2463_s1 + $0x88] ss:$16 sps:$4 sm:$0xff] (!%p197_p3)  }
   0xd   : > { %901 = vmatprep.subr.bf16.mxu0 (!%p197_p3), %v1951_v8  ;;  %1014 = vmatprep.subr.bf16.mxu1 (!%p197_p3), %v1953_v9  ;;  %v1969_v20 = vld [vmem:[%s2463_s1 + $0xa4] ss:$16 sps:$4 sm:$0xff] (!%p197_p3)   ;;  %v1971_v21 = vld [vmem:[%s2463_s1 + $0xac] ss:$16 sps:$4 sm:$0xff] (!%p197_p3)   ;;  %v1973_v22 = vld [vmem:[%s2463_s1 + $0xa0] ss:$16 sps:$4 sm:$0xff] (!%p197_p3)  }
   0xe   : > { %v1974_v23 = vld [vmem:[%s2463_s1 + $0xa8] ss:$16 sps:$4 sm:$0xff]   ;;  %v1975_v24 = vld [vmem:[%s2463_s1 + $0xc4] ss:$16 sps:$4 sm:$0xff]   ;;  %v1977_v25 = vld [vmem:[%s2463_s1 + $0xcc] ss:$16 sps:$4 sm:$0xff]  }
   0xf   : > { %v1979_v26 = vld [vmem:[%s2463_s1 + $0xc0] ss:$16 sps:$4 sm:$0xff]   ;;  %v1980_v27 = vld [vmem:[%s2463_s1 + $0xc8] ss:$16 sps:$4 sm:$0xff]   ;;  %v1981_v28 = vld [vmem:[%s2463_s1 + $0xe4] ss:$16 sps:$4 sm:$0xff]  }
  0x10   : > { %902 = vmatpush1.bf16.msra.mxu0 %v1955_v10  ;;  %1015 = vmatpush1.bf16.msra.mxu1 %v1956_v11  ;;  %v1983_v29 = vld [vmem:[%s2463_s1 + $0xec] ss:$16 sps:$4 sm:$0xff]   ;;  %v1985_v30 = vld [vmem:[%s2463_s1 + $0xe0] ss:$16 sps:$4 sm:$0xff]   ;;  %v1986_v31 = vld [vmem:[%s2463_s1 + $0xe8] ss:$16 sps:$4 sm:$0xff]  }
  0x11   : > { %903 = vmatprep.subr.bf16.mxu0 %v1957_v12  ;;  %1016 = vmatprep.subr.bf16.mxu1 %v1959_v13  ;;  %v1987_v32 = vld [vmem:[%s2463_s1 + $0x104] ss:$16 sps:$4 sm:$0xff]   ;;  %v1989_v33 = vld [vmem:[%s2463_s1 + $0x10c] ss:$16 sps:$4 sm:$0xff]   ;;  %p246_p4 = scmp.lt.s32.totalorder %s1761_s30, 31 }
  0x12   : > { %v1991_v34 = vld [vmem:[%s2463_s1 + $0x100] ss:$16 sps:$4 sm:$0xff]   ;;  %v1992_v35 = vld [vmem:[%s2463_s1 + $0x108] ss:$16 sps:$4 sm:$0xff]   ;;  %v1993_v36 = vld [vmem:[%s2463_s1 + $0x124] ss:$16 sps:$4 sm:$0xff]  }
  0x13   : > { %v1995_v37 = vld [vmem:[%s2463_s1 + $0x12c] ss:$16 sps:$4 sm:$0xff]   ;;  %s2471_s30 = smov (!%p246_p4, %s1761_s30), 31  ;;  %v1997_v38 = vld [vmem:[%s2463_s1 + $0x120] ss:$16 sps:$4 sm:$0xff]  }
  0x14   : > { %904 = vmatpush1.bf16.msra.mxu0 %v1961_v14  ;;  %1017 = vmatpush1.bf16.msra.mxu1 %v1962_v15  ;;  %v1998_v39 = vld [vmem:[%s2463_s1 + $0x128] ss:$16 sps:$4 sm:$0xff]   ;;  %v1999_v40 = vld [vmem:[%s2463_s1 + $0x144] ss:$16 sps:$4 sm:$0xff]   ;;  %v2001_v41 = vld [vmem:[%s2463_s1 + $0x14c] ss:$16 sps:$4 sm:$0xff]  }
  0x15   : > { %905 = vmatprep.subr.bf16.mxu0 %v1963_v16  ;;  %1018 = vmatprep.subr.bf16.mxu1 %v1965_v17  ;;  %s1881_s5 = sshll.u32 %s2471_s30, 3  ;;  %v2003_v42 = vld [vmem:[%s2463_s1 + $0x140] ss:$16 sps:$4 sm:$0xff]   ;;  %v2004_v43 = vld [vmem:[%s2463_s1 + $0x148] ss:$16 sps:$4 sm:$0xff]   ;;  %v1320_v16 = vlaneseq }
  0x16   : > { %v2005_v44 = vld [vmem:[%s2463_s1 + $0x164] ss:$16 sps:$4 sm:$0xff]   ;;  %s2265_s17 = scalar_lea.vmem %s2462_s0, %s1881_s5  ;;  %v2007_v45 = vld [vmem:[%s2463_s1 + $0x16c] ss:$16 sps:$4 sm:$0xff]   ;;  %v2009_v46 = vld [vmem:[%s2463_s1 + $0x160] ss:$16 sps:$4 sm:$0xff]  }
  0x17   : > { %v2010_v47 = vld [vmem:[%s2463_s1 + $0x168] ss:$16 sps:$4 sm:$0xff]   ;;  %v2037_v48 = vld [vmem:[%s2265_s17 + $0x4] ss:$8 sps:$4 sm:$0xff]   ;;  %v2015_v51 = vld [vmem:[%s2463_s1 + $0x180] ss:$16 sps:$4 sm:$0xff]  }
  0x18   : > { %906 = vmatpush1.bf16.msra.mxu0 %v1967_v18  ;;  %1019 = vmatpush1.bf16.msra.mxu1 %v1968_v19  ;;  %v2011_v49 = vld [vmem:[%s2463_s1 + $0x184] ss:$16 sps:$4 sm:$0xff]   ;;  %v2013_v50 = vld [vmem:[%s2463_s1 + $0x18c] ss:$16 sps:$4 sm:$0xff]   ;;  %v2016_v52 = vld [vmem:[%s2463_s1 + $0x188] ss:$16 sps:$4 sm:$0xff]  }
  0x19   : > { %907 = vmatprep.subr.bf16.mxu0 %v1969_v20  ;;  %1020 = vmatprep.subr.bf16.mxu1 %v1971_v21  ;;  %v2017_v53 = vld [vmem:[%s2463_s1 + $0x1a4] ss:$16 sps:$4 sm:$0xff]   ;;  %v2019_v54 = vld [vmem:[%s2463_s1 + $0x1ac] ss:$16 sps:$4 sm:$0xff]   ;;  %v2021_v55 = vld [vmem:[%s2463_s1 + $0x1a0] ss:$16 sps:$4 sm:$0xff]  }
  0x1a   : > { %929 = vmatprep.mubr.bf16.mxu0 %v2037_v48  ;;  %1042 = vmatprep.mubr.bf16.mxu1 %v2037_v48  ;;  %v2022_v56 = vld [vmem:[%s2463_s1 + $0x1a8] ss:$16 sps:$4 sm:$0xff]   ;;  %v2023_v57 = vld [vmem:[%s2463_s1 + $0x1c4] ss:$16 sps:$4 sm:$0xff]   ;;  %v2025_v58 = vld [vmem:[%s2463_s1 + $0x1cc] ss:$16 sps:$4 sm:$0xff]  }
  0x1b   : > { %v2027_v59 = vld [vmem:[%s2463_s1 + $0x1c0] ss:$16 sps:$4 sm:$0xff]   ;;  %v2028_v60 = vld [vmem:[%s2463_s1 + $0x1c8] ss:$16 sps:$4 sm:$0xff]   ;;  %v2029_v61 = vld [vmem:[%s2463_s1 + $0x1e4] ss:$16 sps:$4 sm:$0xff]  }
  0x1c   : > { %908 = vmatpush1.bf16.msra.mxu0 %v1973_v22  ;;  %1021 = vmatpush1.bf16.msra.mxu1 %v1974_v23  ;;  %v2031_v62 = vld [vmem:[%s2463_s1 + $0x1ec] ss:$16 sps:$4 sm:$0xff]   ;;  %v2033_v63 = vld [vmem:[%s2463_s1 + $0x1e0] ss:$16 sps:$4 sm:$0xff]   ;;  %v2034_v0 = vld [vmem:[%s2463_s1 + $0x1e8] ss:$16 sps:$4 sm:$0xff]  }
  0x1d   : > { %909 = vmatprep.subr.bf16.mxu0 %v1975_v24  ;;  %1022 = vmatprep.subr.bf16.mxu1 %v1977_v25  ;;  %v2035_v1 = vld [vmem:[%s2265_s17] ss:$8 sps:$4 sm:$0xff]   ;;  %v2038_v2 = vld [vmem:[%s2265_s17 + $0x14] ss:$8 sps:$4 sm:$0xff]   ;;  %v2040_v3 = vld [vmem:[%s2265_s17 + $0x10] ss:$8 sps:$4 sm:$0xff]  }
  0x1e   : > { %v2041_v4 = vld [vmem:[%s2265_s17 + $0x24] ss:$8 sps:$4 sm:$0xff]   ;;  %v2043_v5 = vld [vmem:[%s2265_s17 + $0x20] ss:$8 sps:$4 sm:$0xff]   ;;  %v2044_v6 = vld [vmem:[%s2265_s17 + $0x34] ss:$8 sps:$4 sm:$0xff]  }
  0x1f   : > { %v2046_v7 = vld [vmem:[%s2265_s17 + $0x30] ss:$8 sps:$4 sm:$0xff]   ;;  %v2047_v8 = vld [vmem:[%s2265_s17 + $0x44] ss:$8 sps:$4 sm:$0xff]   ;;  %v2049_v9 = vld [vmem:[%s2265_s17 + $0x40] ss:$8 sps:$4 sm:$0xff]  }
  0x20   : > { %910 = vmatpush1.bf16.msra.mxu0 %v1979_v26  ;;  %1023 = vmatpush1.bf16.msra.mxu1 %v1980_v27  ;;  %v2050_v10 = vld [vmem:[%s2265_s17 + $0x54] ss:$8 sps:$4 sm:$0xff]   ;;  %v2052_v11 = vld [vmem:[%s2265_s17 + $0x50] ss:$8 sps:$4 sm:$0xff]   ;;  %v2053_v12 = vld [vmem:[%s2265_s17 + $0x64] ss:$8 sps:$4 sm:$0xff]  }
  0x21   : > { %911 = vmatprep.subr.bf16.mxu0 %v1981_v28  ;;  %1024 = vmatprep.subr.bf16.mxu1 %v1983_v29  ;;  %v2055_v13 = vld [vmem:[%s2265_s17 + $0x60] ss:$8 sps:$4 sm:$0xff]   ;;  %v2056_v14 = vld [vmem:[%s2265_s17 + $0x74] ss:$8 sps:$4 sm:$0xff]   ;;  %v2058_v15 = vld [vmem:[%s2265_s17 + $0x70] ss:$8 sps:$4 sm:$0xff]  }
  0x22   : > { %v1321_v17 = vshrl.u32 %v1320_v16, 7  ;;  %v1318_v20 = vld [vmem:[%s2464_s2] sm:$0xf]  ;;  %s1882_s17 = sshll.u32 %s2471_s30, 4 }
  0x23   : > { %s2359_s12 = scalar_lea.vmem %s2465_s3, %s1882_s17 }
  0x24   : > { %912 = vmatpush1.bf16.msra.mxu0 %v1985_v30  ;;  %1025 = vmatpush1.bf16.msra.mxu1 %v1986_v31  ;;  %v1322_v18 = vsub.s32 0, %v1321_v17  ;;  %v1330_v19 = vsub.s32 2, %v1321_v17  ;;  %v1326_v21 = vsub.s32 1, %v1321_v17  ;;  %v1334_v22 = vsub.s32 3, %v1321_v17 }
  0x25   : > { %913 = vmatprep.subr.bf16.mxu0 %v1987_v32  ;;  %1026 = vmatprep.subr.bf16.mxu1 %v1989_v33 }
  0x26   : > { %v2343_v23 = vrot.slane %v1318_v20, %v1322_v18  ;;  %v2345_v24 = vrot.slane %v1318_v20, %v1330_v19  ;;  %v2347_v25 = vrot.slane %v1318_v20, %v1326_v21  ;;  %v2349_v26 = vrot.slane %v1318_v20, %v1334_v22 }
  0x28   : > { %914 = vmatpush1.bf16.msra.mxu0 %v1991_v34  ;;  %1027 = vmatpush1.bf16.msra.mxu1 %v1992_v35 }
  0x29   : > { %915 = vmatprep.subr.bf16.mxu0 %v1993_v36  ;;  %1028 = vmatprep.subr.bf16.mxu1 %v1995_v37 }
  0x2c   : > { %916 = vmatpush1.bf16.msra.mxu0 %v1997_v38  ;;  %1029 = vmatpush1.bf16.msra.mxu1 %v1998_v39 }
  0x2d   : > { %917 = vmatprep.subr.bf16.mxu0 %v1999_v40  ;;  %1030 = vmatprep.subr.bf16.mxu1 %v2001_v41 }
  0x30   : > { %918 = vmatpush1.bf16.msra.mxu0 %v2003_v42  ;;  %1031 = vmatpush1.bf16.msra.mxu1 %v2004_v43 }
  0x31   : > { %919 = vmatprep.subr.bf16.mxu0 %v2005_v44  ;;  %1032 = vmatprep.subr.bf16.mxu1 %v2007_v45 }
  0x34   : > { %920 = vmatpush1.bf16.msra.mxu0 %v2009_v46  ;;  %1033 = vmatpush1.bf16.msra.mxu1 %v2010_v47 }
  0x35   : > { %921 = vmatprep.subr.bf16.mxu0 %v2011_v49  ;;  %1034 = vmatprep.subr.bf16.mxu1 %v2013_v50 }
  0x38   : > { %922 = vmatpush1.bf16.msra.mxu0 %v2015_v51  ;;  %1035 = vmatpush1.bf16.msra.mxu1 %v2016_v52 }
  0x39   : > { %923 = vmatprep.subr.bf16.mxu0 %v2017_v53  ;;  %1036 = vmatprep.subr.bf16.mxu1 %v2019_v54 }
  0x3c   : > { %924 = vmatpush1.bf16.msra.mxu0 %v2021_v55  ;;  %1037 = vmatpush1.bf16.msra.mxu1 %v2022_v56 }
  0x3d   : > { %925 = vmatprep.subr.bf16.mxu0 %v2023_v57  ;;  %1038 = vmatprep.subr.bf16.mxu1 %v2025_v58 }
  0x40   : > { %926 = vmatpush1.bf16.msra.mxu0 %v2027_v59  ;;  %1039 = vmatpush1.bf16.msra.mxu1 %v2028_v60 }
  0x41   : > { %927 = vmatprep.subr.bf16.mxu0 %v2029_v61  ;;  %1040 = vmatprep.subr.bf16.mxu1 %v2031_v62 }
  0x44   : > { %928 = vmatpush1.bf16.msra.mxu0 %v2033_v63  ;;  %1041 = vmatpush1.bf16.msra.mxu1 %v2034_v0 }
  0x47   : > { %930 = vmatmul.mubr.bf16.vlgmr.msra.gmra.mrb[0].mxu0 %v2035_v1  ;;  %1043 = vmatmul.mubr.bf16.vlgmr.msra.gmra.mrb[0].mxu1 %v2035_v1 }
  0x48   : > { %939 = vmatprep.mubr.bf16.mxu0 %v2038_v2  ;;  %1052 = vmatprep.mubr.bf16.mxu1 %v2038_v2 }
  0x4f   : > { %940 = vmatmul.mubr.bf16.gmra.mrb[4].mxu0 %v2040_v3  ;;  %1053 = vmatmul.mubr.bf16.gmra.mrb[4].mxu1 %v2040_v3 }
  0x50   : > { %949 = vmatprep.mubr.bf16.mxu0 %v2041_v4  ;;  %1062 = vmatprep.mubr.bf16.mxu1 %v2041_v4 }
  0x57   : > { %950 = vmatmul.mubr.bf16.gmra.mrb[8].mxu0 %v2043_v5  ;;  %1063 = vmatmul.mubr.bf16.gmra.mrb[8].mxu1 %v2043_v5 }
  0x58   : > { %959 = vmatprep.mubr.bf16.mxu0 %v2044_v6  ;;  %1072 = vmatprep.mubr.bf16.mxu1 %v2044_v6 }
  0x5f   : > { %960 = vmatmul.mubr.bf16.gmra.mrb[12].mxu0 %v2046_v7  ;;  %1073 = vmatmul.mubr.bf16.gmra.mrb[12].mxu1 %v2046_v7 }
  0x60   : > { %969 = vmatprep.mubr.bf16.mxu0 %v2047_v8  ;;  %1082 = vmatprep.mubr.bf16.mxu1 %v2047_v8 }
  0x67   : > { %970 = vmatmul.mubr.bf16.gmra.mrb[16].mxu0 %v2049_v9  ;;  %1083 = vmatmul.mubr.bf16.gmra.mrb[16].mxu1 %v2049_v9 }
  0x68   : > { %979 = vmatprep.mubr.bf16.mxu0 %v2050_v10  ;;  %1092 = vmatprep.mubr.bf16.mxu1 %v2050_v10 }
  0x6f   : > { %980 = vmatmul.mubr.bf16.gmra.mrb[20].mxu0 %v2052_v11  ;;  %1093 = vmatmul.mubr.bf16.gmra.mrb[20].mxu1 %v2052_v11 }
  0x70   : > { %989 = vmatprep.mubr.bf16.mxu0 %v2053_v12  ;;  %1102 = vmatprep.mubr.bf16.mxu1 %v2053_v12 }
  0x77   : > { %990 = vmatmul.mubr.bf16.gmra.mrb[24].mxu0 %v2055_v13  ;;  %1103 = vmatmul.mubr.bf16.gmra.mrb[24].mxu1 %v2055_v13 }
  0x78   : > { %999 = vmatprep.mubr.bf16.mxu0 %v2056_v14  ;;  %1112 = vmatprep.mubr.bf16.mxu1 %v2056_v14 }
  0x7f   : > { %1000 = vmatmul.mubr.bf16.gmra.mrb[28].mxu0 %v2058_v15  ;;  %1113 = vmatmul.mubr.bf16.gmra.mrb[28].mxu1 %v2058_v15 }
 0x11a   : > { %v931_v27 = vpop.f32.mrb[0].mxu0  ;;  %v1044_v28 = vpop.f32.mrb[0].mxu1 }
 0x11b   : > { %v1340_v29 = vadd.f32 %v2343_v23, %v931_v27  ;;  %v1342_v30 = vadd.f32 %v2345_v24, %v1044_v28  ;;  %v933_v31 = vpop.f32.mrb[1].mxu0  ;;  %v1046_v32 = vpop.f32.mrb[1].mxu1 }
 0x11c   : > { %v1341_v33 = vadd.f32 %v2347_v25, %v933_v31  ;;  %v1343_v34 = vadd.f32 %v2349_v26, %v1046_v32  ;;  %v935_v35 = vpop.f32.mrb[2].mxu0  ;;  %v1048_v36 = vpop.f32.mrb[2].mxu1 }
 0x11d   : > { %v1344_v37 = vadd.f32 %v2343_v23, %v935_v35  ;;  %v1346_v38 = vadd.f32 %v2345_v24, %v1048_v36  ;;  %v937_v39 = vpop.f32.mrb[3].mxu0  ;;  %v1050_v40 = vpop.f32.mrb[3].mxu1 }
 0x11e   : > { %v1883_v41 = vpack.c.bf16 %v1341_v33, %v1340_v29  ;;  %v1884_v42 = vpack.c.bf16 %v1343_v34, %v1342_v30  ;;  %v1345_v43 = vadd.f32 %v2347_v25, %v937_v39  ;;  %v1347_v44 = vadd.f32 %v2349_v26, %v1050_v40 }
 0x120   : > { %1596 = vst [vmem:[%s2359_s12] sm:$0xff] %v1883_v41  ;;  %1597 = vst [vmem:[%s2359_s12 + $0x8] sm:$0xff] %v1884_v42  ;;  %v1885_v45 = vpack.c.bf16 %v1345_v43, %v1344_v37  ;;  %v1886_v46 = vpack.c.bf16 %v1347_v44, %v1346_v38 }
 0x122   : > { %1598 = vst [vmem:[%s2359_s12 + $0x10] sm:$0xff] %v1885_v45  ;;  %1599 = vst [vmem:[%s2359_s12 + $0x18] sm:$0xff] %v1886_v46  ;;  %v941_v47 = vpop.f32.mrb[4].mxu0  ;;  %v1054_v48 = vpop.f32.mrb[4].mxu1 }
 0x123   : > { %v1348_v49 = vadd.f32 %v2343_v23, %v941_v47  ;;  %v1350_v50 = vadd.f32 %v2345_v24, %v1054_v48  ;;  %v943_v51 = vpop.f32.mrb[5].mxu0  ;;  %v1056_v52 = vpop.f32.mrb[5].mxu1 }
 0x124   : > { %v1349_v53 = vadd.f32 %v2347_v25, %v943_v51  ;;  %v1351_v54 = vadd.f32 %v2349_v26, %v1056_v52  ;;  %v945_v55 = vpop.f32.mrb[6].mxu0  ;;  %v1058_v56 = vpop.f32.mrb[6].mxu1 }
 0x125   : > { %v1352_v57 = vadd.f32 %v2343_v23, %v945_v55  ;;  %v1354_v58 = vadd.f32 %v2345_v24, %v1058_v56  ;;  %v947_v59 = vpop.f32.mrb[7].mxu0  ;;  %v1060_v60 = vpop.f32.mrb[7].mxu1 }
 0x126   : > { %v1887_v61 = vpack.c.bf16 %v1349_v53, %v1348_v49  ;;  %v1888_v62 = vpack.c.bf16 %v1351_v54, %v1350_v50  ;;  %v1353_v63 = vadd.f32 %v2347_v25, %v947_v59  ;;  %v1355_v0 = vadd.f32 %v2349_v26, %v1060_v60 }
 0x128   : > { %1600 = vst [vmem:[%s2359_s12 + $0x20] sm:$0xff] %v1887_v61  ;;  %1601 = vst [vmem:[%s2359_s12 + $0x28] sm:$0xff] %v1888_v62  ;;  %v1889_v1 = vpack.c.bf16 %v1353_v63, %v1352_v57  ;;  %v1890_v2 = vpack.c.bf16 %v1355_v0, %v1354_v58 }
 0x12a   : > { %1602 = vst [vmem:[%s2359_s12 + $0x30] sm:$0xff] %v1889_v1  ;;  %1603 = vst [vmem:[%s2359_s12 + $0x38] sm:$0xff] %v1890_v2  ;;  %v951_v3 = vpop.f32.mrb[8].mxu0  ;;  %v1064_v4 = vpop.f32.mrb[8].mxu1 }
 0x12b   : > { %v1356_v5 = vadd.f32 %v2343_v23, %v951_v3  ;;  %v1358_v6 = vadd.f32 %v2345_v24, %v1064_v4  ;;  %v953_v7 = vpop.f32.mrb[9].mxu0  ;;  %v1066_v8 = vpop.f32.mrb[9].mxu1 }
 0x12c   : > { %v1357_v9 = vadd.f32 %v2347_v25, %v953_v7  ;;  %v1359_v10 = vadd.f32 %v2349_v26, %v1066_v8  ;;  %v955_v11 = vpop.f32.mrb[10].mxu0  ;;  %v1068_v12 = vpop.f32.mrb[10].mxu1 }
 0x12d   : > { %v1360_v13 = vadd.f32 %v2343_v23, %v955_v11  ;;  %v1362_v14 = vadd.f32 %v2345_v24, %v1068_v12  ;;  %v957_v15 = vpop.f32.mrb[11].mxu0  ;;  %v1070_v16 = vpop.f32.mrb[11].mxu1 }
 0x12e   : > { %v1891_v17 = vpack.c.bf16 %v1357_v9, %v1356_v5  ;;  %v1892_v18 = vpack.c.bf16 %v1359_v10, %v1358_v6  ;;  %v1361_v19 = vadd.f32 %v2347_v25, %v957_v15  ;;  %v1363_v20 = vadd.f32 %v2349_v26, %v1070_v16 }
 0x130   : > { %1604 = vst [vmem:[%s2359_s12 + $0x40] sm:$0xff] %v1891_v17  ;;  %1605 = vst [vmem:[%s2359_s12 + $0x48] sm:$0xff] %v1892_v18  ;;  %v1893_v21 = vpack.c.bf16 %v1361_v19, %v1360_v13  ;;  %v1894_v22 = vpack.c.bf16 %v1363_v20, %v1362_v14 }
 0x132   : > { %1606 = vst [vmem:[%s2359_s12 + $0x50] sm:$0xff] %v1893_v21  ;;  %1607 = vst [vmem:[%s2359_s12 + $0x58] sm:$0xff] %v1894_v22  ;;  %v961_v27 = vpop.f32.mrb[12].mxu0  ;;  %v1074_v28 = vpop.f32.mrb[12].mxu1 }
 0x133   : > { %v1364_v29 = vadd.f32 %v2343_v23, %v961_v27  ;;  %v1366_v30 = vadd.f32 %v2345_v24, %v1074_v28  ;;  %v963_v31 = vpop.f32.mrb[13].mxu0  ;;  %v1076_v32 = vpop.f32.mrb[13].mxu1 }
 0x134   : > { %v1365_v33 = vadd.f32 %v2347_v25, %v963_v31  ;;  %v1367_v34 = vadd.f32 %v2349_v26, %v1076_v32  ;;  %v965_v35 = vpop.f32.mrb[14].mxu0  ;;  %v1078_v36 = vpop.f32.mrb[14].mxu1 }
 0x135   : > { %v1368_v37 = vadd.f32 %v2343_v23, %v965_v35  ;;  %v1370_v38 = vadd.f32 %v2345_v24, %v1078_v36  ;;  %v967_v39 = vpop.f32.mrb[15].mxu0  ;;  %v1080_v40 = vpop.f32.mrb[15].mxu1 }
 0x136   : > { %v1895_v41 = vpack.c.bf16 %v1365_v33, %v1364_v29  ;;  %v1896_v42 = vpack.c.bf16 %v1367_v34, %v1366_v30  ;;  %v1369_v43 = vadd.f32 %v2347_v25, %v967_v39  ;;  %v1371_v44 = vadd.f32 %v2349_v26, %v1080_v40 }
 0x138   : > { %1608 = vst [vmem:[%s2359_s12 + $0x60] sm:$0xff] %v1895_v41  ;;  %1609 = vst [vmem:[%s2359_s12 + $0x68] sm:$0xff] %v1896_v42  ;;  %v1897_v45 = vpack.c.bf16 %v1369_v43, %v1368_v37  ;;  %v1898_v46 = vpack.c.bf16 %v1371_v44, %v1370_v38 }
 0x13a   : > { %1610 = vst [vmem:[%s2359_s12 + $0x70] sm:$0xff] %v1897_v45  ;;  %1611 = vst [vmem:[%s2359_s12 + $0x78] sm:$0xff] %v1898_v46  ;;  %v971_v47 = vpop.f32.mrb[16].mxu0  ;;  %v1084_v48 = vpop.f32.mrb[16].mxu1 }
 0x13b   : > { %v1372_v49 = vadd.f32 %v2343_v23, %v971_v47  ;;  %v1374_v50 = vadd.f32 %v2345_v24, %v1084_v48  ;;  %v973_v51 = vpop.f32.mrb[17].mxu0  ;;  %v1086_v52 = vpop.f32.mrb[17].mxu1 }
 0x13c   : > { %v1373_v53 = vadd.f32 %v2347_v25, %v973_v51  ;;  %v1375_v54 = vadd.f32 %v2349_v26, %v1086_v52  ;;  %v975_v55 = vpop.f32.mrb[18].mxu0  ;;  %v1088_v56 = vpop.f32.mrb[18].mxu1 }
 0x13d   : > { %v1376_v57 = vadd.f32 %v2343_v23, %v975_v55  ;;  %v1378_v58 = vadd.f32 %v2345_v24, %v1088_v56  ;;  %v977_v59 = vpop.f32.mrb[19].mxu0  ;;  %v1090_v60 = vpop.f32.mrb[19].mxu1 }
 0x13e   : > { %v1899_v61 = vpack.c.bf16 %v1373_v53, %v1372_v49  ;;  %v1900_v62 = vpack.c.bf16 %v1375_v54, %v1374_v50  ;;  %v1377_v63 = vadd.f32 %v2347_v25, %v977_v59  ;;  %v1379_v0 = vadd.f32 %v2349_v26, %v1090_v60 }
 0x140   : > { %1612 = vst [vmem:[%s2359_s12 + $0x80] sm:$0xff] %v1899_v61  ;;  %1613 = vst [vmem:[%s2359_s12 + $0x88] sm:$0xff] %v1900_v62  ;;  %v1901_v1 = vpack.c.bf16 %v1377_v63, %v1376_v57  ;;  %v1902_v2 = vpack.c.bf16 %v1379_v0, %v1378_v58 }
 0x142   : > { %1614 = vst [vmem:[%s2359_s12 + $0x90] sm:$0xff] %v1901_v1  ;;  %1615 = vst [vmem:[%s2359_s12 + $0x98] sm:$0xff] %v1902_v2  ;;  %v981_v3 = vpop.f32.mrb[20].mxu0  ;;  %v1094_v4 = vpop.f32.mrb[20].mxu1 }
 0x143   : > { %v1380_v5 = vadd.f32 %v2343_v23, %v981_v3  ;;  %v1382_v6 = vadd.f32 %v2345_v24, %v1094_v4  ;;  %v983_v7 = vpop.f32.mrb[21].mxu0  ;;  %v1096_v8 = vpop.f32.mrb[21].mxu1 }
 0x144   : > { %v1381_v9 = vadd.f32 %v2347_v25, %v983_v7  ;;  %v1383_v10 = vadd.f32 %v2349_v26, %v1096_v8  ;;  %v985_v11 = vpop.f32.mrb[22].mxu0  ;;  %v1098_v12 = vpop.f32.mrb[22].mxu1 }
 0x145   : > { %v1384_v13 = vadd.f32 %v2343_v23, %v985_v11  ;;  %v1386_v14 = vadd.f32 %v2345_v24, %v1098_v12  ;;  %v987_v15 = vpop.f32.mrb[23].mxu0  ;;  %v1100_v16 = vpop.f32.mrb[23].mxu1 }
 0x146   : > { %v1903_v17 = vpack.c.bf16 %v1381_v9, %v1380_v5  ;;  %v1904_v18 = vpack.c.bf16 %v1383_v10, %v1382_v6  ;;  %v1385_v19 = vadd.f32 %v2347_v25, %v987_v15  ;;  %v1387_v20 = vadd.f32 %v2349_v26, %v1100_v16 }
 0x148   : > { %1616 = vst [vmem:[%s2359_s12 + $0xa0] sm:$0xff] %v1903_v17  ;;  %1617 = vst [vmem:[%s2359_s12 + $0xa8] sm:$0xff] %v1904_v18  ;;  %v1905_v21 = vpack.c.bf16 %v1385_v19, %v1384_v13  ;;  %v1906_v22 = vpack.c.bf16 %v1387_v20, %v1386_v14 }
 0x14a   : > { %1618 = vst [vmem:[%s2359_s12 + $0xb0] sm:$0xff] %v1905_v21  ;;  %1619 = vst [vmem:[%s2359_s12 + $0xb8] sm:$0xff] %v1906_v22  ;;  %v991_v27 = vpop.f32.mrb[24].mxu0  ;;  %v1104_v28 = vpop.f32.mrb[24].mxu1 }
 0x14b   : > { %v1388_v29 = vadd.f32 %v2343_v23, %v991_v27  ;;  %v1390_v30 = vadd.f32 %v2345_v24, %v1104_v28  ;;  %v993_v31 = vpop.f32.mrb[25].mxu0  ;;  %v1106_v32 = vpop.f32.mrb[25].mxu1 }
 0x14c   : > { %v1389_v33 = vadd.f32 %v2347_v25, %v993_v31  ;;  %v1391_v34 = vadd.f32 %v2349_v26, %v1106_v32  ;;  %v995_v35 = vpop.f32.mrb[26].mxu0  ;;  %v1108_v36 = vpop.f32.mrb[26].mxu1 }
 0x14d   : > { %v1392_v37 = vadd.f32 %v2343_v23, %v995_v35  ;;  %v1394_v38 = vadd.f32 %v2345_v24, %v1108_v36  ;;  %v997_v39 = vpop.f32.mrb[27].mxu0  ;;  %v1110_v40 = vpop.f32.mrb[27].mxu1 }
 0x14e   : > { %v1907_v41 = vpack.c.bf16 %v1389_v33, %v1388_v29  ;;  %v1908_v42 = vpack.c.bf16 %v1391_v34, %v1390_v30  ;;  %v1393_v43 = vadd.f32 %v2347_v25, %v997_v39  ;;  %v1395_v44 = vadd.f32 %v2349_v26, %v1110_v40 }
 0x150   : > { %1620 = vst [vmem:[%s2359_s12 + $0xc0] sm:$0xff] %v1907_v41  ;;  %1621 = vst [vmem:[%s2359_s12 + $0xc8] sm:$0xff] %v1908_v42  ;;  %v1909_v45 = vpack.c.bf16 %v1393_v43, %v1392_v37  ;;  %v1910_v46 = vpack.c.bf16 %v1395_v44, %v1394_v38 }
 0x152   : > { %1622 = vst [vmem:[%s2359_s12 + $0xd0] sm:$0xff] %v1909_v45  ;;  %1623 = vst [vmem:[%s2359_s12 + $0xd8] sm:$0xff] %v1910_v46  ;;  %v1001_v47 = vpop.f32.mrb[28].mxu0  ;;  %v1114_v48 = vpop.f32.mrb[28].mxu1 }
 0x153   : > { %v1396_v49 = vadd.f32 %v2343_v23, %v1001_v47  ;;  %v1398_v50 = vadd.f32 %v2345_v24, %v1114_v48  ;;  %v1003_v51 = vpop.f32.mrb[29].mxu0  ;;  %v1116_v52 = vpop.f32.mrb[29].mxu1 }
 0x154   : > { %v1397_v53 = vadd.f32 %v2347_v25, %v1003_v51  ;;  %v1399_v54 = vadd.f32 %v2349_v26, %v1116_v52  ;;  %v1005_v55 = vpop.f32.mrb[30].mxu0  ;;  %v1118_v56 = vpop.f32.mrb[30].mxu1 }
 0x155   : > { %v1400_v57 = vadd.f32 %v2343_v23, %v1005_v55  ;;  %v1402_v58 = vadd.f32 %v2345_v24, %v1118_v56  ;;  %v1007_v59 = vpop.f32.mrb[31].mxu0  ;;  %v1120_v60 = vpop.f32.mrb[31].mxu1 }
 0x156   : > { %v1911_v61 = vpack.c.bf16 %v1397_v53, %v1396_v49  ;;  %v1912_v62 = vpack.c.bf16 %v1399_v54, %v1398_v50  ;;  %v1401_v63 = vadd.f32 %v2347_v25, %v1007_v59  ;;  %v1403_v0 = vadd.f32 %v2349_v26, %v1120_v60 }
 0x158   : > { %1624 = vst [vmem:[%s2359_s12 + $0xe0] sm:$0xff] %v1911_v61  ;;  %1625 = vst [vmem:[%s2359_s12 + $0xe8] sm:$0xff] %v1912_v62  ;;  %v1913_v1 = vpack.c.bf16 %v1401_v63, %v1400_v57  ;;  %v1914_v2 = vpack.c.bf16 %v1403_v0, %v1402_v58 }
 0x15a   : > { %1626 = vst [vmem:[%s2359_s12 + $0xf0] sm:$0xff] %v1913_v1  ;;  %1627 = vst [vmem:[%s2359_s12 + $0xf8] sm:$0xff] %v1914_v2 }
 0x15b PF: > { %s13_s14 = sadd.s32 1, %s2081_s14   ;;  %s2466_s12 = smov %s2077_s13 }
 0x15c   : > { %p10_p5 = scmp.ge.s32.totalorder %s13_s14, 4   ;;  %s2467_s13 = smov %s2469_s15 }
 0x15e   :  { %12 = sbr.rel (!%p10_p5) target bundleno = 2 (0x2), region = 76 }

// kernel: resampler_with_text_forward.14
= control target key start
LH: loop header
LB: loop body
LE: loop exit
PB: predicated region body
PF: predicated region fallthrough
CT: control target
= control target key end

     0   :  { %s1086_s18 = smov 0   ;;  %s1088_s19 = smov 0   ;;  %s1235_s0 = inlined_call_operand.vmem [shape: bf16[32,256], index: 0, kind: input, shape index: {}]   ;;  %s1236_s1 = inlined_call_operand.vmem [shape: bf16[256,256], index: 1, kind: input, shape index: {}]   ;;  %s1237_s2 = inlined_call_operand.vmem [shape: f32[1,256], index: 2, kind: input, shape index: {}]   ;;  %s1238_s3 = inlined_call_operand.vmem [shape: f32[1,256], index: 3, kind: input, shape index: {}]   ;;  %s1239_s4 = inlined_call_operand.vmem [shape: f32[1,256], index: 4, kind: input, shape index: {}]   ;;  %s1240_s5 = inlined_call_operand.vmem [shape: bf16[32,256], index: 5, kind: output, shape index: {}]  }
   0x1   :  { %s1090_s20 = smov 0  }
   0x2 LB: > { %s34_s21 = sadd.s32 1, %s1050_s19  ;;  %p904_p0 = scmp.ge.s32.totalorder %s1054_s20, 1  ;;  %s1054_s20 = sphi %s1090_s20, %s15_s20   ;;  %s1050_s19 = sphi %s1088_s19, %s1242_s19   ;;  %s1046_s18 = sphi %s1086_s18, %s1241_s18  }
   0x3   : > { %p36_p1 = scmp.ge.s32.totalorder %s34_s21, 2  ;;  %p266_p2 = scmp.lt.s32.totalorder %s1054_s20, 3 }
   0x5   : > { %s1244_s21 = smov (%p36_p1, %s34_s21), 0  ;;  %p267_p3 = pnand %p904_p0, %p266_p2 }
   0x6   : > { %v977_v0 = vld [vmem:[%s1236_s1 + $0x4] ss:$8 sps:$4 sm:$0xff] (!%p267_p3)   ;;  %v979_v1 = vld [vmem:[%s1236_s1] ss:$8 sps:$4 sm:$0xff] (!%p267_p3)   ;;  %v980_v2 = vld [vmem:[%s1236_s1 + $0x14] ss:$8 sps:$4 sm:$0xff] (!%p267_p3)   ;;  %v653_v34 = vlaneseq (!%p267_p3) }
   0x7   : > { %270 = sbr.rel (%p267_p3) target bundleno = 608 (0x260), region = 40  ;;  %593 = vmatprep.subr.bf16.mxu0 (!%p267_p3), %v977_v0  ;;  %v982_v3 = vld [vmem:[%s1236_s1 + $0x10] ss:$8 sps:$4 sm:$0xff] (!%p267_p3)   ;;  %v983_v4 = vld [vmem:[%s1236_s1 + $0x24] ss:$8 sps:$4 sm:$0xff] (!%p267_p3)   ;;  %s905_s7 = sshll.u32 (!%p267_p3), %s1046_s18, 1 }
   0x8   : > { %594 = vmatpush1.bf16.msra.mxu0 (!%p267_p3), %v979_v1  ;;  %v985_v5 = vld [vmem:[%s1236_s1 + $0x20] ss:$8 sps:$4 sm:$0xff] (!%p267_p3)   ;;  %v986_v6 = vld [vmem:[%s1236_s1 + $0x34] ss:$8 sps:$4 sm:$0xff] (!%p267_p3)   ;;  %p328_p4 = scmp.lt.s32.totalorder (!%p267_p3), %s905_s7, 3  ;;  %v654_v35 = vshrl.u32 (!%p267_p3), %v653_v34, 7 }
   0x9   : > { %595 = vmatprep.subr.bf16.mxu0 (!%p267_p3), %v980_v2  ;;  %v988_v7 = vld [vmem:[%s1236_s1 + $0x30] ss:$8 sps:$4 sm:$0xff] (!%p267_p3)   ;;  %v989_v8 = vld [vmem:[%s1236_s1 + $0x44] ss:$8 sps:$4 sm:$0xff] (!%p267_p3)   ;;  %v991_v9 = vld [vmem:[%s1236_s1 + $0x40] ss:$8 sps:$4 sm:$0xff] (!%p267_p3)  }
   0xa   : > { %v992_v10 = vld [vmem:[%s1236_s1 + $0x54] ss:$8 sps:$4 sm:$0xff] (!%p267_p3)   ;;  %v994_v11 = vld [vmem:[%s1236_s1 + $0x50] ss:$8 sps:$4 sm:$0xff] (!%p267_p3)   ;;  %v995_v12 = vld [vmem:[%s1236_s1 + $0x64] ss:$8 sps:$4 sm:$0xff] (!%p267_p3)  }
   0xb   : > { %v997_v14 = vld [vmem:[%s1236_s1 + $0x60] ss:$8 sps:$4 sm:$0xff] (!%p267_p3)   ;;  %v998_v15 = vld [vmem:[%s1236_s1 + $0x74] ss:$8 sps:$4 sm:$0xff] (!%p267_p3)   ;;  %v1000_v16 = vld [vmem:[%s1236_s1 + $0x70] ss:$8 sps:$4 sm:$0xff] (!%p267_p3)  }
   0xc   : > { %596 = vmatpush1.bf16.msra.mxu0 (!%p267_p3), %v982_v3  ;;  %v1001_v17 = vld [vmem:[%s1236_s1 + $0x84] ss:$8 sps:$4 sm:$0xff] (!%p267_p3)   ;;  %v1003_v18 = vld [vmem:[%s1236_s1 + $0x80] ss:$8 sps:$4 sm:$0xff] (!%p267_p3)   ;;  %v1004_v19 = vld [vmem:[%s1236_s1 + $0x94] ss:$8 sps:$4 sm:$0xff] (!%p267_p3)  }
   0xd   : > { %597 = vmatprep.subr.bf16.mxu0 (!%p267_p3), %v983_v4  ;;  %v1006_v20 = vld [vmem:[%s1236_s1 + $0x90] ss:$8 sps:$4 sm:$0xff] (!%p267_p3)   ;;  %v1007_v21 = vld [vmem:[%s1236_s1 + $0xa4] ss:$8 sps:$4 sm:$0xff] (!%p267_p3)   ;;  %v1009_v22 = vld [vmem:[%s1236_s1 + $0xa0] ss:$8 sps:$4 sm:$0xff] (!%p267_p3)  }
   0xe   : > { %s1246_s7 = smov (!%p328_p4, %s905_s7), 3  ;;  %v1010_v23 = vld [vmem:[%s1236_s1 + $0xb4] ss:$8 sps:$4 sm:$0xff]   ;;  %v1012_v24 = vld [vmem:[%s1236_s1 + $0xb0] ss:$8 sps:$4 sm:$0xff]   ;;  %v655_v36 = vsub.s32 0, %v654_v35 }
   0xf   : > { %s949_s23 = sshll.u32 %s1246_s7, 3  ;;  %v1013_v25 = vld [vmem:[%s1236_s1 + $0xc4] ss:$8 sps:$4 sm:$0xff]   ;;  %v1015_v26 = vld [vmem:[%s1236_s1 + $0xc0] ss:$8 sps:$4 sm:$0xff]   ;;  %v659_v38 = vsub.s32 1, %v654_v35 }
  0x10   : > { %598 = vmatpush1.bf16.msra.mxu0 %v985_v5  ;;  %s1148_s28 = scalar_lea.vmem %s1235_s0, %s949_s23  ;;  %v1016_v27 = vld [vmem:[%s1236_s1 + $0xd4] ss:$8 sps:$4 sm:$0xff]   ;;  %v1018_v28 = vld [vmem:[%s1236_s1 + $0xd0] ss:$8 sps:$4 sm:$0xff]   ;;  %v1019_v29 = vld [vmem:[%s1236_s1 + $0xe4] ss:$8 sps:$4 sm:$0xff]   ;;  %s374_s14 = scalar_lea.vmem %s1240_s5, %s949_s23 }
  0x11   : > { %599 = vmatprep.subr.bf16.mxu0 %v986_v6  ;;  %v1027_v13 = vld [vmem:[%s1148_s28 + $0x4] ss:$8 sps:$4 sm:$0xff]   ;;  %v1021_v30 = vld [vmem:[%s1236_s1 + $0xe0] ss:$8 sps:$4 sm:$0xff]   ;;  %v1022_v31 = vld [vmem:[%s1236_s1 + $0xf4] ss:$8 sps:$4 sm:$0xff]  }
  0x12   : > { %625 = vmatprep.mubr.bf16.mxu0 %v1027_v13  ;;  %v1024_v32 = vld [vmem:[%s1236_s1 + $0xf0] ss:$8 sps:$4 sm:$0xff]   ;;  %v1025_v33 = vld [vmem:[%s1148_s28] ss:$8 sps:$4 sm:$0xff]  }
  0x13   : > { %v651_v37 = vld [vmem:[%s1237_s2] sm:$0x3] }
  0x14   : > { %600 = vmatpush1.bf16.msra.mxu0 %v988_v7  ;;  %v656_v39 = vrot.slane %v651_v37, %v655_v36  ;;  %v660_v40 = vrot.slane %v651_v37, %v659_v38  ;;  %v700_v7 = vld [vmem:[%s1238_s3] sm:$0x3] }
  0x15   : > { %601 = vmatprep.subr.bf16.mxu0 %v989_v8  ;;  %v716_v8 = vld [vmem:[%s1239_s4] sm:$0x3] }
  0x16   : > { %v725_v13 = vrot.slane %v716_v8, %v659_v38 }
  0x18   : > { %602 = vmatpush1.bf16.msra.mxu0 %v991_v9  ;;  %v705_v9 = vrot.slane %v700_v7, %v655_v36 }
  0x19   : > { %603 = vmatprep.subr.bf16.mxu0 %v992_v10  ;;  %v709_v10 = vrot.slane %v700_v7, %v659_v38 }
  0x1c   : > { %604 = vmatpush1.bf16.msra.mxu0 %v994_v11 }
  0x1d   : > { %605 = vmatprep.subr.bf16.mxu0 %v995_v12  ;;  %v721_v12 = vrot.slane %v716_v8, %v655_v36 }
  0x20   : > { %606 = vmatpush1.bf16.msra.mxu0 %v997_v14 }
  0x21   : > { %607 = vmatprep.subr.bf16.mxu0 %v998_v15 }
  0x24   : > { %608 = vmatpush1.bf16.msra.mxu0 %v1000_v16 }
  0x25   : > { %609 = vmatprep.subr.bf16.mxu0 %v1001_v17 }
  0x28   : > { %610 = vmatpush1.bf16.msra.mxu0 %v1003_v18 }
  0x29   : > { %611 = vmatprep.subr.bf16.mxu0 %v1004_v19 }
  0x2c   : > { %612 = vmatpush1.bf16.msra.mxu0 %v1006_v20 }
  0x2d   : > { %613 = vmatprep.subr.bf16.mxu0 %v1007_v21 }
  0x30   : > { %614 = vmatpush1.bf16.msra.mxu0 %v1009_v22 }
  0x31   : > { %615 = vmatprep.subr.bf16.mxu0 %v1010_v23 }
  0x34   : > { %616 = vmatpush1.bf16.msra.mxu0 %v1012_v24 }
  0x35   : > { %617 = vmatprep.subr.bf16.mxu0 %v1013_v25 }
  0x38   : > { %618 = vmatpush1.bf16.msra.mxu0 %v1015_v26 }
  0x39   : > { %619 = vmatprep.subr.bf16.mxu0 %v1016_v27 }
  0x3c   : > { %620 = vmatpush1.bf16.msra.mxu0 %v1018_v28 }
  0x3d   : > { %621 = vmatprep.subr.bf16.mxu0 %v1019_v29 }
  0x40   : > { %622 = vmatpush1.bf16.msra.mxu0 %v1021_v30 }
  0x41   : > { %623 = vmatprep.subr.bf16.mxu0 %v1022_v31 }
  0x44   : > { %624 = vmatpush1.bf16.msra.mxu0 %v1024_v32 }
  0x47   : > { %626 = vmatmul.mubr.bf16.vlgmr.msra.gmra.mrb[0].mxu0 %v1025_v33 }
 0x11a   : > { %v627_v41 = vpop.f32.mrb[0].mxu0 }
 0x11b   : > { %v663_v42 = vadd.f32 %v656_v39, %v627_v41  ;;  %v629_v43 = vpop.f32.mrb[1].mxu0 }
 0x11c   : > { %v664_v44 = vadd.f32 %v660_v40, %v629_v43  ;;  %v631_v45 = vpop.f32.mrb[2].mxu0 }
 0x11d   : > { %v633_v46 = vpop.f32.mrb[3].mxu0  ;;  %v665_v47 = vadd.f32 %v656_v39, %v631_v45 }
 0x11e   : > { %v666_v48 = vadd.f32 %v660_v40, %v633_v46  ;;  %v667_v49 = vadd.f32 %v664_v44, %v663_v42 }
 0x120   : > { %668 = vadd.xlane.f32.xlu0 %v667_v49  ;;  %v670_v50 = vadd.f32 %v666_v48, %v665_v47 }
 0x124   : > { %671 = vadd.xlane.f32.xlu0 %v670_v50 }
 0x1ad   : > { %v669_v51 = vpop.xlane.xlu0 %668 }
 0x1ae   : > { %v674_v52 = vmul.f32 0.00390625, %v669_v51 }
 0x1b0   : > { %v676_v53 = vsub.f32 %v663_v42, %v674_v52  ;;  %v677_v54 = vsub.f32 %v664_v44, %v674_v52 }
 0x1b1   : > { %v672_v55 = vpop.xlane.xlu0 %671 }
 0x1b2   : > { %v675_v56 = vmul.f32 0.00390625, %v672_v55  ;;  %v680_v57 = vmul.f32 %v676_v53, %v676_v53  ;;  %v681_v58 = vmul.f32 %v677_v54, %v677_v54 }
 0x1b4   : > { %v678_v59 = vsub.f32 %v665_v47, %v675_v56  ;;  %v679_v60 = vsub.f32 %v666_v48, %v675_v56  ;;  %v684_v61 = vadd.f32 %v681_v58, %v680_v57 }
 0x1b6   : > { %685 = vadd.xlane.f32.xlu1 %v684_v61  ;;  %v682_v62 = vmul.f32 %v678_v59, %v678_v59  ;;  %v683_v63 = vmul.f32 %v679_v60, %v679_v60 }
 0x1b8   : > { %v687_v0 = vadd.f32 %v683_v63, %v682_v62 }
 0x1ba   : > { %688 = vadd.xlane.f32.xlu1 %v687_v0 }
 0x243   : > { %v686_v1 = vpop.xlane.xlu1 %685 }
 0x244   : > { %v690_v2 = vmul.f32 0.00390625, %v686_v1 }
 0x246   : > { %v692_v3 = vadd.f32 1e-06, %v690_v2 }
 0x247   : > { %v689_v4 = vpop.xlane.xlu1 %688 }
 0x248   : > { %1028 = vrsqrt.f32 %v692_v3  ;;  %v691_v5 = vmul.f32 0.00390625, %v689_v4 }
 0x24a   : > { %v693_v6 = vadd.f32 1e-06, %v691_v5 }
 0x24c   : > { %1030 = vrsqrt.f32 %v693_v6 }
 0x252   : > { %v1029_v11 = vpop.eup %1028 }
 0x253   : > { %v696_v14 = vmul.f32 %v1029_v11, %v676_v53  ;;  %v697_v15 = vmul.f32 %v1029_v11, %v677_v54 }
 0x255   : > { %v712_v16 = vmul.f32 %v705_v9, %v696_v14  ;;  %v713_v17 = vmul.f32 %v709_v10, %v697_v15 }
 0x256   : > { %v1031_v18 = vpop.eup %1030 }
 0x257   : > { %v728_v19 = vadd.f32 %v721_v12, %v712_v16  ;;  %v729_v20 = vadd.f32 %v725_v13, %v713_v17  ;;  %v698_v21 = vmul.f32 %v1031_v18, %v678_v59  ;;  %v699_v22 = vmul.f32 %v1031_v18, %v679_v60 }
 0x259   : > { %v951_v23 = vpack.c.bf16 %v729_v20, %v728_v19  ;;  %v714_v24 = vmul.f32 %v705_v9, %v698_v21  ;;  %v715_v25 = vmul.f32 %v709_v10, %v699_v22 }
 0x25b   : > { %744 = vst [vmem:[%s374_s14] sm:$0xff] %v951_v23  ;;  %v730_v26 = vadd.f32 %v721_v12, %v714_v24  ;;  %v731_v27 = vadd.f32 %v725_v13, %v715_v25 }
 0x25d   : > { %v952_v28 = vpack.c.bf16 %v731_v27, %v730_v26 }
 0x25f   : > { %745 = vst [vmem:[%s374_s14 + $0x8] sm:$0xff] %v952_v28 }
 0x260 PF: > { %s15_s20 = sadd.s32 1, %s1054_s20   ;;  %s1241_s18 = smov %s1050_s19 }
 0x261   : > { %p12_p5 = scmp.ge.s32.totalorder %s15_s20, 4   ;;  %s1242_s19 = smov %s1244_s21 }
 0x263   :  { %14 = sbr.rel (!%p12_p5) target bundleno = 2 (0x2), region = 90 }

// kernel: resampler_with_text_forward.19
= control target key start
LH: loop header
LB: loop body
LE: loop exit
PB: predicated region body
PF: predicated region fallthrough
CT: control target
= control target key end

     0   :  { %10 = vsyncpa [#allocation4], 0  ;;  %s1384_s0 = inlined_call_operand.vmem [shape: bf16[32,256], index: 0, kind: input, shape index: {}]   ;;  %s1385_s1 = inlined_call_operand.vmem [shape: bf16[256,256], index: 1, kind: input, shape index: {}]   ;;  %s1386_s2 = inlined_call_operand.vmem [shape: f32[1,256], index: 2, kind: input, shape index: {}]   ;;  %s1387_s3 = inlined_call_operand.vmem [shape: f32[1,256], index: 3, kind: input, shape index: {}]   ;;  %s1388_s4 = inlined_call_operand.vmem [shape: f32[1,256], index: 4, kind: input, shape index: {}]   ;;  %s1389_s5 = inlined_call_operand.hbm [shape: f32[32,256], index: 5, kind: output, shape index: {}]  }
   0x1   :  { %12 = vsyncpa [#allocation4 + $0x1], 0  ;;  %s1161_s18 = smov 0   ;;  %s1163_s19 = smov 0  }
   0x2   :  { %s1165_s20 = smov 0   ;;  %s1167_s21 = smov 0  }
   0x3   :  { %s1169_s22 = smov 0   ;;  %s1171_s23 = smov 0  }
   0x4 LB: > { %s880_s24 = sadd.s32 4294967295, %s1126_s23   ;;  %s881_s25 = sadd.s32 4294967294, %s1126_s23   ;;  %s1126_s23 = sphi %s1171_s23, %s18_s23   ;;  %s1122_s22 = sphi %s1169_s22, %s1396_s22   ;;  %s1118_s21 = sphi %s1167_s21, %s1395_s21   ;;  %s1114_s20 = sphi %s1165_s20, %s1394_s20   ;;  %s1110_s19 = sphi %s1163_s19, %s1393_s19   ;;  %s1106_s18 = sphi %s1161_s18, %s1392_s18  }
   0x5   : > { %s37_s26 = sadd.s32 1, %s1122_s22  ;;  %s180_s27 = sadd.s32 1, %s1114_s20 }
   0x6   : > { %p39_p0 = scmp.ge.s32.totalorder %s37_s26, 2  ;;  %p190_p1 = scmp.ne.s32.totalorder %s1114_s20, %s1110_s19 }
   0x7   : > { %p191_p2 = scmp.eq.s32.totalorder %s880_s24, 1  ;;  %p196_p3 = scmp.ne.s32.totalorder %s1110_s19, %s1106_s18 }
   0x8   : > { %s1398_s26 = smov (%p39_p0, %s37_s26), 0  ;;  %p197_p5 = scmp.eq.s32.totalorder %s881_s25, 1 }
   0x9   : > { %p1201_p4 = por %p191_p2, %p190_p1  ;;  %s175_s29 = ssub.s32 %s1122_s22, %s1398_s26 }
   0xa   : > { %p888_p6 = scmp.ge.s32.totalorder %s1126_s23, 1  ;;  %p178_p7 = scmp.eq.s32.totalorder %s175_s29, 0 }
   0xb   : > { %p1208_p8 = por %p197_p5, %p196_p3  ;;  %p269_p9 = scmp.lt.s32.totalorder %s1126_s23, 3 }
   0xc   : > { %s1214_s6 = scalar_select %p178_p7, %s1114_s20, %s180_s27  }
   0xd   : > { %p270_p10 = pnand %p888_p6, %p269_p9 }
   0xe   : > { %v993_v0 = vld [vmem:[%s1385_s1 + $0x4] ss:$8 sps:$4 sm:$0xff] (!%p270_p10)   ;;  %v995_v1 = vld [vmem:[%s1385_s1] ss:$8 sps:$4 sm:$0xff] (!%p270_p10)   ;;  %v996_v2 = vld [vmem:[%s1385_s1 + $0x14] ss:$8 sps:$4 sm:$0xff] (!%p270_p10)   ;;  %v641_v34 = vlaneseq (!%p270_p10) }
   0xf   : > { %273 = sbr.rel (%p270_p10) target bundleno = 628 (0x274), region = 40  ;;  %581 = vmatprep.subr.bf16.mxu0 (!%p270_p10), %v993_v0  ;;  %v998_v3 = vld [vmem:[%s1385_s1 + $0x10] ss:$8 sps:$4 sm:$0xff] (!%p270_p10)   ;;  %v999_v4 = vld [vmem:[%s1385_s1 + $0x24] ss:$8 sps:$4 sm:$0xff] (!%p270_p10)   ;;  %s890_s17 = sshll.u32 (!%p270_p10), %s1118_s21, 1 }
  0x10   : > { %582 = vmatpush1.bf16.msra.mxu0 (!%p270_p10), %v995_v1  ;;  %v1001_v5 = vld [vmem:[%s1385_s1 + $0x20] ss:$8 sps:$4 sm:$0xff] (!%p270_p10)   ;;  %v1002_v6 = vld [vmem:[%s1385_s1 + $0x34] ss:$8 sps:$4 sm:$0xff] (!%p270_p10)   ;;  %p326_p11 = scmp.lt.s32.totalorder (!%p270_p10), %s890_s17, 3  ;;  %v642_v35 = vshrl.u32 (!%p270_p10), %v641_v34, 7 }
  0x11   : > { %583 = vmatprep.subr.bf16.mxu0 (!%p270_p10), %v996_v2  ;;  %v1004_v7 = vld [vmem:[%s1385_s1 + $0x30] ss:$8 sps:$4 sm:$0xff] (!%p270_p10)   ;;  %v1005_v8 = vld [vmem:[%s1385_s1 + $0x44] ss:$8 sps:$4 sm:$0xff] (!%p270_p10)   ;;  %v1007_v9 = vld [vmem:[%s1385_s1 + $0x40] ss:$8 sps:$4 sm:$0xff] (!%p270_p10)  }
  0x12   : > { %v1008_v10 = vld [vmem:[%s1385_s1 + $0x54] ss:$8 sps:$4 sm:$0xff] (!%p270_p10)   ;;  %v1010_v11 = vld [vmem:[%s1385_s1 + $0x50] ss:$8 sps:$4 sm:$0xff] (!%p270_p10)   ;;  %v1011_v12 = vld [vmem:[%s1385_s1 + $0x64] ss:$8 sps:$4 sm:$0xff] (!%p270_p10)  }
  0x13   : > { %v1013_v14 = vld [vmem:[%s1385_s1 + $0x60] ss:$8 sps:$4 sm:$0xff] (!%p270_p10)   ;;  %v1014_v15 = vld [vmem:[%s1385_s1 + $0x74] ss:$8 sps:$4 sm:$0xff] (!%p270_p10)   ;;  %v1016_v16 = vld [vmem:[%s1385_s1 + $0x70] ss:$8 sps:$4 sm:$0xff] (!%p270_p10)  }
  0x14   : > { %584 = vmatpush1.bf16.msra.mxu0 (!%p270_p10), %v998_v3  ;;  %v1017_v17 = vld [vmem:[%s1385_s1 + $0x84] ss:$8 sps:$4 sm:$0xff] (!%p270_p10)   ;;  %v1019_v18 = vld [vmem:[%s1385_s1 + $0x80] ss:$8 sps:$4 sm:$0xff] (!%p270_p10)   ;;  %v1020_v19 = vld [vmem:[%s1385_s1 + $0x94] ss:$8 sps:$4 sm:$0xff] (!%p270_p10)  }
  0x15   : > { %585 = vmatprep.subr.bf16.mxu0 (!%p270_p10), %v999_v4  ;;  %v1022_v20 = vld [vmem:[%s1385_s1 + $0x90] ss:$8 sps:$4 sm:$0xff] (!%p270_p10)   ;;  %v1023_v21 = vld [vmem:[%s1385_s1 + $0xa4] ss:$8 sps:$4 sm:$0xff] (!%p270_p10)   ;;  %v1025_v22 = vld [vmem:[%s1385_s1 + $0xa0] ss:$8 sps:$4 sm:$0xff] (!%p270_p10)  }
  0x16   : > { %s1400_s17 = smov (!%p326_p11, %s890_s17), 3  ;;  %v1026_v23 = vld [vmem:[%s1385_s1 + $0xb4] ss:$8 sps:$4 sm:$0xff]   ;;  %v1028_v24 = vld [vmem:[%s1385_s1 + $0xb0] ss:$8 sps:$4 sm:$0xff]   ;;  %v643_v36 = vsub.s32 0, %v642_v35 }
  0x17   : > { %s933_s15 = sshll.u32 %s1400_s17, 3  ;;  %v1029_v25 = vld [vmem:[%s1385_s1 + $0xc4] ss:$8 sps:$4 sm:$0xff]   ;;  %v1031_v26 = vld [vmem:[%s1385_s1 + $0xc0] ss:$8 sps:$4 sm:$0xff]   ;;  %v647_v38 = vsub.s32 1, %v642_v35 }
  0x18   : > { %586 = vmatpush1.bf16.msra.mxu0 %v1001_v5  ;;  %s1256_s29 = scalar_lea.vmem %s1384_s0, %s933_s15  ;;  %v1032_v27 = vld [vmem:[%s1385_s1 + $0xd4] ss:$8 sps:$4 sm:$0xff]   ;;  %v1034_v28 = vld [vmem:[%s1385_s1 + $0xd0] ss:$8 sps:$4 sm:$0xff]   ;;  %v1035_v29 = vld [vmem:[%s1385_s1 + $0xe4] ss:$8 sps:$4 sm:$0xff]  }
  0x19   : > { %587 = vmatprep.subr.bf16.mxu0 %v1002_v6  ;;  %v1043_v13 = vld [vmem:[%s1256_s29 + $0x4] ss:$8 sps:$4 sm:$0xff]   ;;  %v1037_v30 = vld [vmem:[%s1385_s1 + $0xe0] ss:$8 sps:$4 sm:$0xff]   ;;  %v1038_v31 = vld [vmem:[%s1385_s1 + $0xf4] ss:$8 sps:$4 sm:$0xff]  }
  0x1a   : > { %613 = vmatprep.mubr.bf16.mxu0 %v1043_v13  ;;  %v1040_v32 = vld [vmem:[%s1385_s1 + $0xf0] ss:$8 sps:$4 sm:$0xff]   ;;  %v1041_v33 = vld [vmem:[%s1256_s29] ss:$8 sps:$4 sm:$0xff]   ;;  %s321_s17 = sand.u32 1, %s1110_s19   ;;  %s935_s11 = sshll.u32 %s1118_s21, 9 }
  0x1b   : > { %v639_v37 = vld [vmem:[%s1386_s2] sm:$0x3]  ;;  %s889_s10 = sshll.u32 %s321_s17, 5  ;;  %s1334_s16 = scalar_lea.hbm %s1389_s5, %s935_s11 }
  0x1c   : > { %588 = vmatpush1.bf16.msra.mxu0 %v1004_v7  ;;  %v644_v39 = vrot.slane %v639_v37, %v643_v36  ;;  %v648_v40 = vrot.slane %v639_v37, %v647_v38  ;;  %v688_v7 = vld [vmem:[%s1387_s3] sm:$0x3]  ;;  %s323_s12 = scalar_lea.vmem [#allocation3], %s889_s10  ;;  %s1338_s21 = scalar_lea.sflag [#allocation4], %s321_s17 }
  0x1d   : > { %589 = vmatprep.subr.bf16.mxu0 %v1005_v8  ;;  %v704_v8 = vld [vmem:[%s1388_s4] sm:$0x3]  ;;  %s741_s13 = sshll.u32 %s323_s12, 4  ;;  %s1128_s25 = smov [#allocation3]   ;;  %s1336_s13 = int_to_ptr.vmem [resolvable:$true] %s741_s13 }
  0x1e   : > { %v713_v13 = vrot.slane %v704_v8, %v647_v38  ;;  %s1048_s24 = scalar_lea.vmem %s1336_s13, 512  ;;  %s1052_s27 = sshll.u32 %s1128_s25, 4  ;;  %s1053_s27 = int_to_ptr.vmem [resolvable:$false] %s1052_s27 }
  0x1f   : > { %p1049_p12 = scmp.ne.s32.totalorder %s1336_s13, %s1048_s24  ;;  %s1054_s29 = scalar_lea.vmem %s1053_s27, 1024 }
  0x20   : > { %590 = vmatpush1.bf16.msra.mxu0 %v1007_v9  ;;  %v693_v9 = vrot.slane %v688_v7, %v643_v36  ;;  %p1055_p1 = scmp.lt.s32.totalorder %s1336_s13, %s1053_s27  ;;  %p1056_p2 = scmp.lt.s32.totalorder %s1054_s29, %s1048_s24 }
  0x21   : > { %591 = vmatprep.subr.bf16.mxu0 %v1008_v10  ;;  %v697_v10 = vrot.slane %v688_v7, %v647_v38  ;;  %p1050_p13 = pnand %p1049_p12, %p1201_p4 }
  0x22   : > { %p1057_p3 = por %p1056_p2, %p1055_p1 }
  0x23   : > { %p1051_p0 = pneg %p1050_p13 }
  0x24   : > { %592 = vmatpush1.bf16.msra.mxu0 %v1010_v11 }
  0x25   : > { %593 = vmatprep.subr.bf16.mxu0 %v1011_v12  ;;  %v709_v12 = vrot.slane %v704_v8, %v643_v36  ;;  %p1058_p5 = pnand %p1057_p3, %p1051_p0 }
  0x28   : > { %594 = vmatpush1.bf16.msra.mxu0 %v1013_v14 }
  0x29   : > { %595 = vmatprep.subr.bf16.mxu0 %v1014_v15 }
  0x2c   : > { %596 = vmatpush1.bf16.msra.mxu0 %v1016_v16 }
  0x2d   : > { %597 = vmatprep.subr.bf16.mxu0 %v1017_v17 }
  0x30   : > { %598 = vmatpush1.bf16.msra.mxu0 %v1019_v18 }
  0x31   : > { %599 = vmatprep.subr.bf16.mxu0 %v1020_v19 }
  0x34   : > { %600 = vmatpush1.bf16.msra.mxu0 %v1022_v20 }
  0x35   : > { %601 = vmatprep.subr.bf16.mxu0 %v1023_v21 }
  0x38   : > { %602 = vmatpush1.bf16.msra.mxu0 %v1025_v22 }
  0x39   : > { %603 = vmatprep.subr.bf16.mxu0 %v1026_v23 }
  0x3c   : > { %604 = vmatpush1.bf16.msra.mxu0 %v1028_v24 }
  0x3d   : > { %605 = vmatprep.subr.bf16.mxu0 %v1029_v25 }
  0x40   : > { %606 = vmatpush1.bf16.msra.mxu0 %v1031_v26 }
  0x41   : > { %607 = vmatprep.subr.bf16.mxu0 %v1032_v27 }
  0x44   : > { %608 = vmatpush1.bf16.msra.mxu0 %v1034_v28 }
  0x45   : > { %609 = vmatprep.subr.bf16.mxu0 %v1035_v29 }
  0x48   : > { %610 = vmatpush1.bf16.msra.mxu0 %v1037_v30 }
  0x49   : > { %611 = vmatprep.subr.bf16.mxu0 %v1038_v31 }
  0x4c   : > { %612 = vmatpush1.bf16.msra.mxu0 %v1040_v32 }
  0x4f   : > { %614 = vmatmul.mubr.bf16.vlgmr.msra.gmra.mrb[0].mxu0 %v1041_v33 }
 0x122   : > { %v615_v41 = vpop.f32.mrb[0].mxu0 }
 0x123   : > { %v651_v42 = vadd.f32 %v644_v39, %v615_v41  ;;  %v617_v43 = vpop.f32.mrb[1].mxu0 }
 0x124   : > { %v652_v44 = vadd.f32 %v648_v40, %v617_v43  ;;  %v619_v45 = vpop.f32.mrb[2].mxu0 }
 0x125   : > { %v621_v46 = vpop.f32.mrb[3].mxu0  ;;  %v653_v47 = vadd.f32 %v644_v39, %v619_v45 }
 0x126   : > { %v654_v48 = vadd.f32 %v648_v40, %v621_v46  ;;  %v655_v49 = vadd.f32 %v652_v44, %v651_v42 }
 0x128   : > { %656 = vadd.xlane.f32.xlu0 %v655_v49  ;;  %v658_v50 = vadd.f32 %v654_v48, %v653_v47 }
 0x12c   : > { %659 = vadd.xlane.f32.xlu0 %v658_v50 }
 0x1b5   : > { %v657_v51 = vpop.xlane.xlu0 %656 }
 0x1b6   : > { %v662_v52 = vmul.f32 0.00390625, %v657_v51 }
 0x1b8   : > { %v664_v53 = vsub.f32 %v651_v42, %v662_v52  ;;  %v665_v54 = vsub.f32 %v652_v44, %v662_v52 }
 0x1b9   : > { %v660_v55 = vpop.xlane.xlu0 %659 }
 0x1ba   : > { %v663_v56 = vmul.f32 0.00390625, %v660_v55  ;;  %v668_v57 = vmul.f32 %v664_v53, %v664_v53  ;;  %v669_v58 = vmul.f32 %v665_v54, %v665_v54 }
 0x1bc   : > { %v666_v59 = vsub.f32 %v653_v47, %v663_v56  ;;  %v667_v60 = vsub.f32 %v654_v48, %v663_v56  ;;  %v672_v61 = vadd.f32 %v669_v58, %v668_v57 }
 0x1be   : > { %673 = vadd.xlane.f32.xlu1 %v672_v61  ;;  %v670_v62 = vmul.f32 %v666_v59, %v666_v59  ;;  %v671_v63 = vmul.f32 %v667_v60, %v667_v60 }
 0x1c0   : > { %v675_v0 = vadd.f32 %v671_v63, %v670_v62 }
 0x1c2   : > { %676 = vadd.xlane.f32.xlu1 %v675_v0 }
 0x24b   : > { %v674_v1 = vpop.xlane.xlu1 %673 }
 0x24c   : > { %v678_v2 = vmul.f32 0.00390625, %v674_v1 }
 0x24e   : > { %v680_v3 = vadd.f32 1e-06, %v678_v2 }
 0x24f   : > { %v677_v4 = vpop.xlane.xlu1 %676 }
 0x250   : > { %1044 = vrsqrt.f32 %v680_v3  ;;  %v679_v5 = vmul.f32 0.00390625, %v677_v4 }
 0x252   : > { %v681_v6 = vadd.f32 1e-06, %v679_v5 }
 0x254   : > { %1046 = vrsqrt.f32 %v681_v6 }
 0x25a   : > { %v1045_v11 = vpop.eup %1044 }
 0x25b   : > { %v684_v14 = vmul.f32 %v1045_v11, %v664_v53  ;;  %v685_v15 = vmul.f32 %v1045_v11, %v665_v54 }
 0x25d   : > { %v700_v16 = vmul.f32 %v693_v9, %v684_v14  ;;  %v701_v17 = vmul.f32 %v697_v10, %v685_v15 }
 0x25e   : > { %v1047_v18 = vpop.eup %1046 }
 0x25f   : > { %v716_v19 = vadd.f32 %v709_v12, %v700_v16  ;;  %v717_v20 = vadd.f32 %v713_v13, %v701_v17  ;;  %v686_v21 = vmul.f32 %v1047_v18, %v666_v59  ;;  %v687_v22 = vmul.f32 %v1047_v18, %v667_v60 }
 0x261   : > { %720 = vst [vmem:[%s323_s12] sm:$0xff] %v716_v19  ;;  %721 = vst [vmem:[%s323_s12 + $0x8] sm:$0xff] %v717_v20  ;;  %v702_v23 = vmul.f32 %v693_v9, %v686_v21  ;;  %v703_v24 = vmul.f32 %v697_v10, %v687_v22 }
 0x263   : > { %v718_v25 = vadd.f32 %v709_v12, %v702_v23  ;;  %v719_v26 = vadd.f32 %v713_v13, %v703_v24 }
 0x265   : > { %722 = vst [vmem:[%s323_s12 + $0x10] sm:$0xff] %v718_v25  ;;  %723 = vst [vmem:[%s323_s12 + $0x18] sm:$0xff] %v719_v26 }
 0x266   : > { %1061 = shalt.err (!%p1058_p5)
}
 0x267   : > { %s1062_s7 = scalar_lea.hbm %s1334_s16, 512  ;;  %s1066_s17 = scalar_lea.hbm %s1389_s5, 1024 }
 0x268   : > { %p1063_p6 = scmp.ne.s32.totalorder %s1334_s16, %s1062_s7  ;;  %p1067_p10 = scmp.lt.u32.totalorder %s1334_s16, %s1389_s5 }
 0x269   : > { %p1068_p11 = scmp.lt.u32.totalorder %s1066_s17, %s1062_s7  ;;  %p1070_p13 = scmp.lt.u32.totalorder %s1062_s7, %s1334_s16 }
 0x26a   : > { %p1064_p7 = pnand %p1063_p6, %p1201_p4 }
 0x26b   : > { %p1069_p12 = por %p1068_p11, %p1067_p10 }
 0x26c   : > { %p1065_p9 = pneg %p1064_p7 }
 0x26d   : > { %p1071_p0 = por %p1070_p13, %p1069_p12 }
 0x26f   : > { %p1072_p1 = pnand %p1071_p0, %p1065_p9 }
 0x271   : > { %1075 = shalt.err (!%p1072_p1)
}
 0x272   : > { %s1129_s12 = smov 256   ;;  %s1130_s14 = smov 16  }
 0x273   : > { %936 = dma.vmem_to_hbm [thread:$0]  (%p1201_p4), %s1336_s13, 512, %s1334_s16, %s1338_s21, %s1129_s12, %s1129_s12, %s1130_s14  }
 0x274 PF: > { %p942_p2 = scmp.ge.s32.totalorder %s1126_s23, 2  ;;  %s756_s15 = sand.u32 1, %s1106_s18  }
 0x275   : > { %s757_s24 = scalar_lea.sflag [#allocation4], %s756_s15 }
 0x276   : > { %p939_p3 = pnand %p942_p2, %p1208_p8 }
 0x278   : > { %1101 = dma.done.wait (!%p939_p3), %s757_s24, 512  }
 0x279   : > { %1103 = vsyncadd (!%p939_p3), %s757_s24, 4294966784  ;;  %s18_s23 = sadd.s32 1, %s1126_s23   ;;  %s1392_s18 = smov %s1110_s19 }
 0x27a   : > { %p15_p5 = scmp.ge.s32.totalorder %s18_s23, 4   ;;  %s1393_s19 = smov %s1114_s20 }
 0x27b   : > { %s1394_s20 = smov %s1214_s6  ;;  %s1395_s21 = smov %s1122_s22 }
 0x27c   : > { %s1396_s22 = smov %s1398_s26  ;;  %17 = sbr.rel (!%p15_p5) target bundleno = 4 (0x4), region = 95 }
 0x283   :  { %762 = vsyncpa [#allocation4], 1 }
 0x284   :  { %764 = vsyncpa [#allocation4 + $0x1], 1 }

// kernel: resampler_with_text_forward.18
= control target key start
LH: loop header
LB: loop body
LE: loop exit
PB: predicated region body
PF: predicated region fallthrough
CT: control target
= control target key end

     0   :  { %s1376_s15 = smov 0   ;;  %s1378_s16 = smov 0   ;;  %s1581_s0 = inlined_call_operand.vmem [shape: bf16[2,16,256], index: 0, kind: input, shape index: {}]   ;;  %s1582_s1 = inlined_call_operand.vmem [shape: bf16[2,128,256], index: 1, kind: input, shape index: {}]   ;;  %s1583_s2 = inlined_call_operand.vmem [shape: bf16[2,128,256], index: 2, kind: input, shape index: {}]   ;;  %s1584_s3 = inlined_call_operand.vmem [shape: f32[2,1,128], index: 3, kind: input, shape index: {}]   ;;  %s1585_s4 = inlined_call_operand.vmem [shape: bf16[2,16,256], index: 4, kind: output, shape index: {}]  }
   0x1   :  { %s1380_s17 = smov 0   ;;  %s1382_s18 = smov 0  }
   0x2   :  { %s1384_s19 = smov 0   ;;  %s1386_s20 = smov 0  }
   0x3   :  { %s1388_s21 = smov 0  }
   0x4 LB: > { %s36_s22 = sadd.s32 1, %s1337_s19  ;;  %s40_s23 = sadd.s32 1, %s1341_s20  ;;  %s1345_s21 = sphi %s1388_s21, %s14_s21   ;;  %s1341_s20 = sphi %s1386_s20, %s1593_s20   ;;  %s1337_s19 = sphi %s1384_s19, %s1592_s19   ;;  %s1333_s18 = sphi %s1382_s18, %s1591_s18   ;;  %s1329_s17 = sphi %s1380_s17, %s1590_s17   ;;  %s1325_s16 = sphi %s1378_s16, %s1589_s16   ;;  %s1321_s15 = sphi %s1376_s15, %s1588_s15  }
   0x5   : > { %p38_p0 = scmp.ge.s32.totalorder %s36_s22, 2  ;;  %s1092_s24 = sadd.s32 4294967295, %s1345_s21  }
   0x6   : > { %p58_p1 = scmp.ne.s32.totalorder %s1325_s16, %s1321_s15  ;;  %p59_p2 = scmp.eq.s32.totalorder %s1345_s21, 0 }
   0x7   : > { %s1595_s22 = smov (%p38_p0, %s36_s22), 0  ;;  %s1597_s23 = smov (!%p38_p0, %s40_s23), %s1341_s20 }
   0x8   : > { %p42_p3 = scmp.ge.s32.totalorder %s1597_s23, 2  ;;  %p180_p4 = scmp.eq.s32.totalorder %s1092_s24, 3 }
   0x9   : > { %s47_s25 = ssub.s32 %s1337_s19, %s1595_s22  ;;  %p1422_p5 = por %p59_p2, %p58_p1 }
   0xa   : > { %s1599_s23 = smov (%p42_p3, %s1597_s23), 0  ;;  %p1428_p6 = por %p180_p4, %p58_p1 }
   0xb   : > { %s44_s28 = ssub.s32 %s1341_s20, %s1599_s23  ;;  %s51_s30 = sadd.s32 1, %s1325_s16 }
   0xc   : > { %s48_s29 = sor.u32 %s47_s25, %s44_s28  ;;  %p1095_p8 = scmp.ge.s32.totalorder %s1345_s21, 4 }
   0xd   : > { %p49_p7 = scmp.eq.s32.totalorder %s48_s29, 0 }
   0xe   : > { %202 = sbr.rel (%p1095_p8) target bundleno = 60 (0x3c), region = 16 }
   0xf   : > { %s1436_s5 = scalar_select %p49_p7, %s1325_s16, %s51_s30  }
  0x15   : > { %205 = sbr.rel (!%p1422_p5) target bundleno = 28 (0x1c), region = 20  ;;  %s207_s6 = sand.u32 (%p1422_p5), 1, %s1325_s16  }
  0x16   : > { %s1097_s7 = sshll.u32 (%p1422_p5), %s1341_s20, 2  ;;  %s1096_s8 = sshll.u32 (%p1422_p5), %s207_s6, 3 }
  0x17   : > { %s214_s9 = sadd.s32 (%p1422_p5), %s1337_s19, %s1097_s7  ;;  %s209_s14 = scalar_lea.vmem (%p1422_p5), [#allocation5], %s1096_s8 }
  0x18   : > { %s1098_s10 = sshll.u32 (%p1422_p5), %s214_s9, 2 }
  0x19   : > { %s216_s13 = scalar_lea.vmem (%p1422_p5), %s1581_s0, %s1098_s10 }
  0x1a   : > { %v232_v0 = vld [vmem:[%s216_s13] sm:$0xf] (%p1422_p5)  ;;  %v234_v1 = vld [vmem:[%s216_s13 + $0x8] sm:$0xf] (%p1422_p5) }
  0x1b   : > { %233 = vst [vmem:[%s209_s14] sm:$0xf] (%p1422_p5), %v232_v0  ;;  %235 = vst [vmem:[%s209_s14 + $0x4] sm:$0xf] (%p1422_p5), %v234_v1 }
  0x1c PF: > { %262 = sbr.rel (!%p1422_p5) target bundleno = 44 (0x2c), region = 61  ;;  %s264_s24 = sand.u32 (%p1422_p5), 1, %s1325_s16  }
  0x1d   : > { %s1100_s25 = sshll.u32 (%p1422_p5), %s1341_s20, 5  ;;  %s1099_s28 = sshll.u32 (%p1422_p5), %s264_s24, 6 }
  0x1e   : > { %s271_s29 = sadd.s32 (%p1422_p5), %s1337_s19, %s1100_s25  ;;  %s266_s8 = scalar_lea.vmem (%p1422_p5), [#allocation6], %s1099_s28 }
  0x1f   : > { %s1101_s30 = sshll.u32 (%p1422_p5), %s271_s29, 2 }
  0x20   : > { %s1455_s9 = scalar_lea.vmem (%p1422_p5), %s1582_s1, %s1101_s30 }
  0x21   : > { %v289_v2 = vld [vmem:[%s1455_s9] sm:$0xf] (%p1422_p5)  ;;  %v291_v3 = vld [vmem:[%s1455_s9 + $0x8] sm:$0xf] (%p1422_p5)  ;;  %v293_v4 = vld [vmem:[%s1455_s9 + $0x10] sm:$0xf] (%p1422_p5) }
  0x22   : > { %290 = vst [vmem:[%s266_s8] sm:$0xf] (%p1422_p5), %v289_v2  ;;  %292 = vst [vmem:[%s266_s8 + $0x4] sm:$0xf] (%p1422_p5), %v291_v3  ;;  %v295_v5 = vld [vmem:[%s1455_s9 + $0x18] sm:$0xf] (%p1422_p5) }
  0x23   : > { %294 = vst [vmem:[%s266_s8 + $0x8] sm:$0xf] %v293_v4  ;;  %v297_v6 = vld [vmem:[%s1455_s9 + $0x20] sm:$0xf]  ;;  %v299_v7 = vld [vmem:[%s1455_s9 + $0x28] sm:$0xf] }
  0x24   : > { %296 = vst [vmem:[%s266_s8 + $0xc] sm:$0xf] %v295_v5  ;;  %298 = vst [vmem:[%s266_s8 + $0x10] sm:$0xf] %v297_v6  ;;  %v301_v8 = vld [vmem:[%s1455_s9 + $0x30] sm:$0xf] }
  0x25   : > { %300 = vst [vmem:[%s266_s8 + $0x14] sm:$0xf] %v299_v7  ;;  %v303_v9 = vld [vmem:[%s1455_s9 + $0x38] sm:$0xf]  ;;  %v305_v10 = vld [vmem:[%s1455_s9 + $0x40] sm:$0xf] }
  0x26   : > { %302 = vst [vmem:[%s266_s8 + $0x18] sm:$0xf] %v301_v8  ;;  %304 = vst [vmem:[%s266_s8 + $0x1c] sm:$0xf] %v303_v9  ;;  %v307_v11 = vld [vmem:[%s1455_s9 + $0x48] sm:$0xf] }
  0x27   : > { %306 = vst [vmem:[%s266_s8 + $0x20] sm:$0xf] %v305_v10  ;;  %v309_v12 = vld [vmem:[%s1455_s9 + $0x50] sm:$0xf]  ;;  %v311_v13 = vld [vmem:[%s1455_s9 + $0x58] sm:$0xf] }
  0x28   : > { %308 = vst [vmem:[%s266_s8 + $0x24] sm:$0xf] %v307_v11  ;;  %310 = vst [vmem:[%s266_s8 + $0x28] sm:$0xf] %v309_v12  ;;  %v313_v14 = vld [vmem:[%s1455_s9 + $0x60] sm:$0xf] }
  0x29   : > { %312 = vst [vmem:[%s266_s8 + $0x2c] sm:$0xf] %v311_v13  ;;  %v315_v15 = vld [vmem:[%s1455_s9 + $0x68] sm:$0xf]  ;;  %v317_v16 = vld [vmem:[%s1455_s9 + $0x70] sm:$0xf] }
  0x2a   : > { %314 = vst [vmem:[%s266_s8 + $0x30] sm:$0xf] %v313_v14  ;;  %316 = vst [vmem:[%s266_s8 + $0x34] sm:$0xf] %v315_v15  ;;  %v319_v17 = vld [vmem:[%s1455_s9 + $0x78] sm:$0xf] }
  0x2b   : > { %318 = vst [vmem:[%s266_s8 + $0x38] sm:$0xf] %v317_v16  ;;  %320 = vst [vmem:[%s266_s8 + $0x3c] sm:$0xf] %v319_v17 }
  0x2c PF: > { %375 = sbr.rel (!%p1422_p5) target bundleno = 60 (0x3c), region = 102  ;;  %s377_s10 = sand.u32 (%p1422_p5), 1, %s1325_s16  }
  0x2d   : > { %s1103_s11 = sshll.u32 (%p1422_p5), %s1341_s20, 5  ;;  %s1102_s12 = sshll.u32 (%p1422_p5), %s377_s10, 6 }
  0x2e   : > { %s384_s13 = sadd.s32 (%p1422_p5), %s1337_s19, %s1103_s11  ;;  %s379_s26 = scalar_lea.vmem (%p1422_p5), [#allocation7], %s1102_s12 }
  0x2f   : > { %s1104_s14 = sshll.u32 (%p1422_p5), %s384_s13, 2 }
  0x30   : > { %s1481_s28 = scalar_lea.vmem (%p1422_p5), %s1583_s2, %s1104_s14 }
  0x31   : > { %v402_v18 = vld [vmem:[%s1481_s28] sm:$0xf] (%p1422_p5)  ;;  %v404_v19 = vld [vmem:[%s1481_s28 + $0x8] sm:$0xf] (%p1422_p5)  ;;  %v406_v20 = vld [vmem:[%s1481_s28 + $0x10] sm:$0xf] (%p1422_p5) }
  0x32   : > { %403 = vst [vmem:[%s379_s26] sm:$0xf] (%p1422_p5), %v402_v18  ;;  %405 = vst [vmem:[%s379_s26 + $0x4] sm:$0xf] (%p1422_p5), %v404_v19  ;;  %v408_v21 = vld [vmem:[%s1481_s28 + $0x18] sm:$0xf] (%p1422_p5) }
  0x33   : > { %407 = vst [vmem:[%s379_s26 + $0x8] sm:$0xf] %v406_v20  ;;  %v410_v22 = vld [vmem:[%s1481_s28 + $0x20] sm:$0xf]  ;;  %v412_v23 = vld [vmem:[%s1481_s28 + $0x28] sm:$0xf] }
  0x34   : > { %409 = vst [vmem:[%s379_s26 + $0xc] sm:$0xf] %v408_v21  ;;  %411 = vst [vmem:[%s379_s26 + $0x10] sm:$0xf] %v410_v22  ;;  %v414_v24 = vld [vmem:[%s1481_s28 + $0x30] sm:$0xf] }
  0x35   : > { %413 = vst [vmem:[%s379_s26 + $0x14] sm:$0xf] %v412_v23  ;;  %v416_v25 = vld [vmem:[%s1481_s28 + $0x38] sm:$0xf]  ;;  %v418_v26 = vld [vmem:[%s1481_s28 + $0x40] sm:$0xf] }
  0x36   : > { %415 = vst [vmem:[%s379_s26 + $0x18] sm:$0xf] %v414_v24  ;;  %417 = vst [vmem:[%s379_s26 + $0x1c] sm:$0xf] %v416_v25  ;;  %v420_v27 = vld [vmem:[%s1481_s28 + $0x48] sm:$0xf] }
  0x37   : > { %419 = vst [vmem:[%s379_s26 + $0x20] sm:$0xf] %v418_v26  ;;  %v422_v28 = vld [vmem:[%s1481_s28 + $0x50] sm:$0xf]  ;;  %v424_v29 = vld [vmem:[%s1481_s28 + $0x58] sm:$0xf] }
  0x38   : > { %421 = vst [vmem:[%s379_s26 + $0x24] sm:$0xf] %v420_v27  ;;  %423 = vst [vmem:[%s379_s26 + $0x28] sm:$0xf] %v422_v28  ;;  %v426_v30 = vld [vmem:[%s1481_s28 + $0x60] sm:$0xf] }
  0x39   : > { %425 = vst [vmem:[%s379_s26 + $0x2c] sm:$0xf] %v424_v29  ;;  %v428_v31 = vld [vmem:[%s1481_s28 + $0x68] sm:$0xf]  ;;  %v430_v32 = vld [vmem:[%s1481_s28 + $0x70] sm:$0xf] }
  0x3a   : > { %427 = vst [vmem:[%s379_s26 + $0x30] sm:$0xf] %v426_v30  ;;  %429 = vst [vmem:[%s379_s26 + $0x34] sm:$0xf] %v428_v31  ;;  %v432_v33 = vld [vmem:[%s1481_s28 + $0x78] sm:$0xf] }
  0x3b   : > { %431 = vst [vmem:[%s379_s26 + $0x38] sm:$0xf] %v430_v32  ;;  %433 = vst [vmem:[%s379_s26 + $0x3c] sm:$0xf] %v432_v33 }
  0x3c PF: > { %p1105_p9 = scmp.ge.s32.totalorder %s1345_s21, 1  ;;  %p496_p10 = scmp.lt.s32.totalorder %s1345_s21, 5 }
  0x3e   : > { %p497_p11 = pnand %p1105_p9, %p496_p10 }
  0x3f   : > { %s503_s29 = sand.u32 (!%p497_p11), 1, %s1321_s15   ;;  %v1347_v34 = vmov (!%p497_p11), 0.0   ;;  %vm1348_vm0 = vmmov (!%p497_p11), 0   ;;  %vm570_vm1 = vcmask (!%p497_p11), 7168   ;;  %v1349_v44 = vmov (!%p497_p11), -1e+30  }
  0x40   : > { %500 = sbr.rel (%p497_p11) target bundleno = 939 (0x3ab), region = 147  ;;  %1160 = vmatprep.subr.bf16.mxu0 (!%p497_p11), %v1347_v34  ;;  %s1503_s30 = sshll.u32 (!%p497_p11), %s503_s29, 6  ;;  %1176 = vmatprep.mubr.msk.bf16.mxu0 (!%p497_p11), %vm1348_vm0, %v1347_v34  ;;  %571 = vst.msk [vmem:[#allocation2] sm:$0xff] (!%p497_p11), %vm570_vm1, %v1349_v44  ;;  %572 = vst.msk [vmem:[#allocation2 + $0x8] sm:$0xff] (!%p497_p11), %vm570_vm1, %v1349_v44  ;;  %v1350_v52 = vmov (!%p497_p11), 0  }
  0x41   : > { %1180 = vmatprep.subr.bf16.mxu1 (!%p497_p11), %v1347_v34  ;;  %1196 = vmatprep.mubr.msk.bf16.mxu1 (!%p497_p11), %vm1348_vm0, %v1347_v34  ;;  %s512_s6 = scalar_lea.vmem (!%p497_p11), [#allocation6], %s1503_s30  ;;  %s1510_s7 = sshll.u32 (!%p497_p11), %s503_s29, 3  ;;  %573 = vst.msk [vmem:[#allocation3] sm:$0xff] (!%p497_p11), %vm570_vm1, %v1347_v34  ;;  %574 = vst.msk [vmem:[#allocation3 + $0x8] sm:$0xff] (!%p497_p11), %vm570_vm1, %v1347_v34 }
  0x42   : > { %v1262_v35 = vld [vmem:[%s512_s6] sm:$0xff] (!%p497_p11)   ;;  %v1263_v36 = vld [vmem:[%s512_s6 + $0x8] sm:$0xff] (!%p497_p11)   ;;  %s505_s15 = scalar_lea.vmem (!%p497_p11), [#allocation5], %s1510_s7  ;;  %v1264_v37 = vld [vmem:[%s512_s6 + $0x10] sm:$0xff] (!%p497_p11)   ;;  %p558_p12 = scmp.lt.s32.totalorder (!%p497_p11), %s1333_s18, 1  ;;  %1260 = vset.pattern.permute.xlu1 (!%p497_p11), %v1350_v52  ;;  %1261 = vset.pattern.permute.xlu0 (!%p497_p11), %v1350_v52 }
  0x43   : > { %1161 = vmatpush3.bf16.xpose.msra.mxu0 (!%p497_p11), %v1262_v35  ;;  %v1265_v38 = vld [vmem:[%s512_s6 + $0x18] sm:$0xff] (!%p497_p11)   ;;  %v1266_v39 = vld [vmem:[%s512_s6 + $0x20] sm:$0xff] (!%p497_p11)   ;;  %v1267_v40 = vld [vmem:[%s512_s6 + $0x28] sm:$0xff] (!%p497_p11)   ;;  %s1531_s12 = scalar_lea.vmem (!%p497_p11), [#allocation7], %s1503_s30  ;;  %s554_s13 = scalar_lea.vmem (!%p497_p11), [#allocation8], %s1510_s7 }
  0x44   : > { %1162 = vmatprep.subr.bf16.mxu0 (!%p497_p11), %v1347_v34  ;;  %v1268_v41 = vld [vmem:[%s512_s6 + $0x30] sm:$0xff] (!%p497_p11)   ;;  %v1269_v42 = vld [vmem:[%s512_s6 + $0x38] sm:$0xff] (!%p497_p11)   ;;  %v1271_v53 = vld [vmem:[%s1531_s12] sm:$0xff] (!%p497_p11)  }
  0x45   : > { %v1270_v43 = vld [vmem:[%s505_s15] sm:$0xff] (!%p497_p11)   ;;  %1181 = vmatpush3.bf16.msra.mxu1 (!%p497_p11), %v1271_v53  ;;  %v1272_v54 = vld [vmem:[%s1531_s12 + $0x8] sm:$0xff] (!%p497_p11)   ;;  %v1275_v1 = vld [vmem:[%s1531_s12 + $0x20] sm:$0xff] (!%p497_p11)  }
  0x46   : > { %1182 = vmatprep.subr.bf16.mxu1 (!%p497_p11), %v1347_v34  ;;  %v1273_v55 = vld [vmem:[%s1531_s12 + $0x10] sm:$0xff] (!%p497_p11)   ;;  %v1274_v61 = vld [vmem:[%s1531_s12 + $0x18] sm:$0xff] (!%p497_p11)   ;;  %v1276_v2 = vld [vmem:[%s1531_s12 + $0x28] sm:$0xff] (!%p497_p11)  }
  0x47   : > { %s559_s9 = scalar_select %p558_p12, %s1333_s18, 1  ;;  %v713_v56 = vld [vmem:[#allocation2] sm:$0xff]  ;;  %v714_v59 = vld [vmem:[#allocation2 + $0x8] sm:$0xff] }
  0x48   : > { %v1277_v3 = vld [vmem:[%s1531_s12 + $0x30] sm:$0xff]   ;;  %v1278_v4 = vld [vmem:[%s1531_s12 + $0x38] sm:$0xff]   ;;  %v743_v18 = vld [vmem:[#allocation3] sm:$0xff]  ;;  %s1131_s14 = sshll.u32 (%p1428_p6), %s1333_s18, 2 }
  0x49   : > { %s563_s11 = scalar_lea.vmem %s1584_s3, %s559_s9  ;;  %1183 = vmatpush3.bf16.msra.mxu1 %v1272_v54  ;;  %v744_v21 = vld [vmem:[#allocation3 + $0x8] sm:$0xff]  ;;  %s908_s24 = sadd.s32 (%p1428_p6), %s1329_s17, %s1131_s14 }
  0x4a   : > { %v1110_v45 = vld [vmem:[%s563_s11] ss:$0 sm:$0xff]  ;;  %1184 = vmatprep.subr.bf16.mxu1 %v1347_v34  ;;  %s1132_s25 = sshll.u32 (%p1428_p6), %s908_s24, 2 }
  0x4b   : > { %1163 = vmatpush3.bf16.xpose.msra.mxu0 %v1263_v36  ;;  %s910_s29 = scalar_lea.vmem (%p1428_p6), %s1585_s4, %s1132_s25 }
  0x4c   : > { %1164 = vmatprep.subr.bf16.mxu0 %v1347_v34 }
  0x4d   : > { %1185 = vmatpush3.bf16.msra.mxu1 %v1273_v55 }
  0x4e   : > { %1186 = vmatprep.subr.bf16.mxu1 %v1347_v34 }
  0x51   : > { %1187 = vmatpush3.bf16.msra.mxu1 %v1274_v61 }
  0x52   : > { %1188 = vmatprep.subr.bf16.mxu1 %v1347_v34 }
  0x53   : > { %1165 = vmatpush3.bf16.xpose.msra.mxu0 %v1264_v37 }
  0x54   : > { %1166 = vmatprep.subr.bf16.mxu0 %v1347_v34 }
  0x55   : > { %1189 = vmatpush3.bf16.msra.mxu1 %v1275_v1 }
  0x56   : > { %1190 = vmatprep.subr.bf16.mxu1 %v1347_v34 }
  0x59   : > { %1191 = vmatpush3.bf16.msra.mxu1 %v1276_v2 }
  0x5a   : > { %1192 = vmatprep.subr.bf16.mxu1 %v1347_v34 }
  0x5b   : > { %1167 = vmatpush3.bf16.xpose.msra.mxu0 %v1265_v38 }
  0x5c   : > { %1168 = vmatprep.subr.bf16.mxu0 %v1347_v34 }
  0x5d   : > { %1193 = vmatpush3.bf16.msra.mxu1 %v1277_v3 }
  0x5e   : > { %1194 = vmatprep.subr.bf16.mxu1 %v1347_v34 }
  0x61   : > { %1195 = vmatpush3.bf16.msra.mxu1 %v1278_v4 }
  0x63   : > { %1169 = vmatpush3.bf16.xpose.msra.mxu0 %v1266_v39 }
  0x64   : > { %1170 = vmatprep.subr.bf16.mxu0 %v1347_v34 }
  0x6b   : > { %1171 = vmatpush3.bf16.xpose.msra.mxu0 %v1267_v40 }
  0x6c   : > { %1172 = vmatprep.subr.bf16.mxu0 %v1347_v34 }
  0x73   : > { %1173 = vmatpush3.bf16.xpose.msra.mxu0 %v1268_v41 }
  0x74   : > { %1174 = vmatprep.subr.bf16.mxu0 %v1347_v34 }
  0x7b   : > { %1175 = vmatpush3.bf16.xpose.msra.mxu0 %v1269_v42 }
  0x82   : > { %1177 = vmatmul.mubr.bf16.vlgmr.msra.gmra.mrb[0].mxu0 %v1270_v43 }
 0x155   : > { %v706_v46 = vpop.f32.mrb[0].mxu0 }
 0x156   : > { %v707_v47 = vadd.f32 %v1110_v45, %v706_v46  ;;  %v1178_v48 = vpop.f32.mrb[1].mxu0 }
 0x157   : > { %v709_v49 = vpop.f32.mrb[2].mxu0 }
 0x158   : > { %715 = vmax.xlane.f32.xlu0 %v707_v47  ;;  %v1179_v50 = vpop.f32.mrb[3].mxu0  ;;  %v710_v51 = vadd.f32 %v1110_v45, %v709_v49 }
 0x15c   : > { %717 = vmax.xlane.f32.xlu0 %v710_v51 }
 0x1e5   : > { %v716_v57 = vpop.xlane.xlu0 %715 }
 0x1e6   : > { %v719_v58 = vmax.f32 %v713_v56, %v716_v57 }
 0x1e8   : > { %v721_v60 = vsub.f32 %v713_v56, %v719_v58  ;;  %864 = vst.msk [vmem:[#allocation2] sm:$0xff] %vm570_vm1, %v719_v58  ;;  %729 = vperm.xlu1 %1260, %v719_v58  }
 0x1e9   : > { %v718_v62 = vpop.xlane.xlu0 %717 }
 0x1ea   : > { %v720_v63 = vmax.f32 %v714_v59, %v718_v62  ;;  %v723_v15 = vmul.f32 1.442695, %v721_v60 }
 0x1ec   : > { %v722_v0 = vsub.f32 %v714_v59, %v720_v63  ;;  %865 = vst.msk [vmem:[#allocation2 + $0x8] sm:$0xff] %vm570_vm1, %v720_v63  ;;  %734 = vperm.xlu1 %1260, %v720_v63  }
 0x1ee   : > { %v725_v14 = vmul.f32 1.442695, %v722_v0 }
 0x267   : > { %v730_v5 = vpop.permute.xlu1 %729 }
 0x268   : > { %v737_v6 = vsub.f32 %v707_v47, %v730_v5 }
 0x26a   : > { %v739_v7 = vmul.f32 1.442695, %v737_v6 }
 0x26b   : > { %v735_v8 = vpop.permute.xlu1 %734 }
 0x26c   : > { %1279 = vpow2.f32 %v739_v7  ;;  %v738_v9 = vsub.f32 %v710_v51, %v735_v8 }
 0x26e   : > { %v741_v10 = vmul.f32 1.442695, %v738_v9 }
 0x270   : > { %1281 = vpow2.f32 %v741_v10 }
 0x271   : > { %1283 = vpow2.f32 %v725_v14 }
 0x272   : > { %1285 = vpow2.f32 %v723_v15 }
 0x276   : > { %v1280_v11 = vpop.eup %1279 }
 0x277   : > { %747 = vadd.xlane.f32.xlu0 %v1280_v11 }
 0x27a   : > { %v1282_v12 = vpop.eup %1281 }
 0x27b   : > { %749 = vadd.xlane.f32.xlu1 %v1282_v12  ;;  %v770_v13 = vpack.c.bf16 %v1282_v12, %v1280_v11  ;;  %v1284_v16 = vpop.eup %1283 }
 0x27c   : > { %v1286_v17 = vpop.eup %1285  ;;  %v746_v23 = vmul.f32 %v1284_v16, %v744_v21 }
 0x27d   : > { %1197 = vmatmul.mubr.bf16.vlgmr.msra.gmra.mrb[0].mxu1 %v770_v13  ;;  %v745_v19 = vmul.f32 %v1286_v17, %v743_v18 }
 0x28c   : > { %765 = vperm.xlu1 %1260, %v1284_v16  }
 0x28d   : > { %760 = vperm.xlu0 %1261, %v1286_v17  }
 0x304   : > { %v748_v20 = vpop.xlane.xlu0 %747 }
 0x305   : > { %v751_v22 = vadd.f32 %v748_v20, %v745_v19 }
 0x307   : > { %754 = vst.msk [vmem:[#allocation3] sm:$0xff] %vm570_vm1, %v751_v22 }
 0x308   : > { %v750_v24 = vpop.xlane.xlu1 %749 }
 0x309   : > { %v752_v25 = vadd.f32 %v750_v24, %v746_v23 }
 0x30b   : > { %755 = vst.msk [vmem:[#allocation3 + $0x8] sm:$0xff] %vm570_vm1, %v752_v25 }
 0x30c   : > { %v761_v34 = vpop.permute.xlu0 %760  ;;  %v766_v35 = vpop.permute.xlu1 %765 }
 0x30d   : > { %v769_v37 = vmul.f32 0.0, %v766_v35  ;;  %v768_v38 = vmul.f32 0.0, %v761_v34 }
 0x30e   : > { %v871_v26 = vld [vmem:[#allocation3] sm:$0xff] }
 0x30f   : > { %1287 = vrcp.f32 %v871_v26 }
 0x312   : > { %v872_v27 = vld [vmem:[#allocation3 + $0x8] sm:$0xff] }
 0x313   : > { %1289 = vrcp.f32 %v872_v27 }
 0x319   : > { %v1288_v28 = vpop.eup %1287 }
 0x31a   : > { %877 = vperm.xlu0 %1261, %v1288_v28  }
 0x31d   : > { %v1290_v29 = vpop.eup %1289 }
 0x31e   : > { %882 = vperm.xlu0 %1261, %v1290_v29  }
 0x350   : > { %v853_v30 = vpop.f32.mrb[0].mxu1 }
 0x351   : > { %v1198_v31 = vpop.f32.mrb[1].mxu1  ;;  %v860_v39 = vadd.f32 %v853_v30, %v768_v38 }
 0x352   : > { %v856_v32 = vpop.f32.mrb[2].mxu1 }
 0x353   : > { %v1199_v33 = vpop.f32.mrb[3].mxu1  ;;  %v861_v40 = vadd.f32 %v856_v32, %v769_v37 }
 0x399   : > { %v878_v36 = vpop.permute.xlu0 %877 }
 0x39a   : > { %v885_v42 = vmul.f32 %v878_v36, %v860_v39 }
 0x39c   : > { %903 = sbr.rel (!%p1428_p6) target bundleno = 939 (0x3ab), region = 171 }
 0x39d   : > { %v883_v41 = vpop.permute.xlu0 %882 }
 0x39e   : > { %v886_v43 = vmul.f32 %v883_v41, %v861_v40 }
 0x3a0   : > { %v1140_v44 = vpack.c.bf16 %v886_v43, %v885_v42 }
 0x3a2   : > { %1141 = vst [vmem:[%s554_s13] sm:$0xff] %v1140_v44  }
 0x3a9   : > { %v926_v45 = vld [vmem:[%s554_s13] sm:$0xf]  ;;  %v928_v46 = vld [vmem:[%s554_s13 + $0x4] sm:$0xf] }
 0x3aa   : > { %927 = vst [vmem:[%s910_s29] sm:$0xf] %v926_v45  ;;  %929 = vst [vmem:[%s910_s29 + $0x8] sm:$0xf] %v928_v46 }
 0x3ab PF: > { %s14_s21 = sadd.s32 1, %s1345_s21   ;;  %s1588_s15 = smov %s1325_s16 }
 0x3ac   : > { %p11_p13 = scmp.ge.s32.totalorder %s14_s21, 6   ;;  %s1589_s16 = smov %s1436_s5 }
 0x3ad   : > { %s1590_s17 = smov %s1337_s19  ;;  %s1591_s18 = smov %s1341_s20 }
 0x3ae   : > { %s1592_s19 = smov %s1595_s22  ;;  %s1593_s20 = smov %s1599_s23 }
 0x3af   :  { %13 = sbr.rel (!%p11_p13) target bundleno = 4 (0x4), region = 262 }

// kernel: resampler_with_text_forward.16
= control target key start
LH: loop header
LB: loop body
LE: loop exit
PB: predicated region body
PF: predicated region fallthrough
CT: control target
= control target key end

     0   :  { %s1404_s12 = smov 0   ;;  %s1406_s13 = smov 0   ;;  %s1618_s0 = inlined_call_operand.vmem [shape: bf16[256,256], index: 0, kind: input, shape index: {}]   ;;  %s1619_s1 = inlined_call_operand.vmem [shape: bf16[256,256], index: 1, kind: input, shape index: {}]   ;;  %s1620_s2 = inlined_call_operand.vmem [shape: f32[1,256], index: 2, kind: input, shape index: {}]   ;;  %s1621_s3 = inlined_call_operand.vmem [shape: bf16[256,256], index: 3, kind: output, shape index: {}]  }
   0x1   :  { %s1408_s14 = smov 0  }
   0x2 LB: > { %s32_s15 = sadd.s32 1, %s1378_s13  ;;  %p1141_p0 = scmp.ge.s32.totalorder %s1382_s14, 1  ;;  %s1382_s14 = sphi %s1408_s14, %s13_s14   ;;  %s1378_s13 = sphi %s1406_s13, %s1623_s13   ;;  %s1374_s12 = sphi %s1404_s12, %s1622_s12  }
   0x3   : > { %p34_p1 = scmp.ge.s32.totalorder %s32_s15, 2  ;;  %p196_p2 = scmp.lt.s32.totalorder %s1382_s14, 3 }
   0x5   : > { %s1625_s15 = smov (%p34_p1, %s32_s15), 0  ;;  %p197_p3 = pnand %p1141_p0, %p196_p2 }
   0x6   : > { %v1288_v0 = vld [vmem:[%s1619_s1 + $0x4] ss:$8 sps:$4 sm:$0xff] (!%p197_p3)   ;;  %v1290_v1 = vld [vmem:[%s1619_s1] ss:$8 sps:$4 sm:$0xff] (!%p197_p3)   ;;  %v1291_v2 = vld [vmem:[%s1619_s1 + $0x14] ss:$8 sps:$4 sm:$0xff] (!%p197_p3)   ;;  %v855_v48 = vlaneseq (!%p197_p3) }
   0x7   : > { %200 = sbr.rel (%p197_p3) target bundleno = 315 (0x13b), region = 32  ;;  %641 = vmatprep.subr.bf16.mxu0 (!%p197_p3), %v1288_v0  ;;  %1232 = vmatprep.subr.bf16.mxu1 (!%p197_p3), %v1288_v0  ;;  %v1293_v3 = vld [vmem:[%s1619_s1 + $0x10] ss:$8 sps:$4 sm:$0xff] (!%p197_p3)   ;;  %v1294_v4 = vld [vmem:[%s1619_s1 + $0x24] ss:$8 sps:$4 sm:$0xff] (!%p197_p3)   ;;  %s1142_s26 = sshll.u32 (!%p197_p3), %s1374_s12, 4 }
   0x8   : > { %642 = vmatpush1.bf16.msra.mxu0 (!%p197_p3), %v1290_v1  ;;  %1248 = vmatpush1.bf16.msra.mxu1 (!%p197_p3), %v1290_v1  ;;  %v1296_v5 = vld [vmem:[%s1619_s1 + $0x20] ss:$8 sps:$4 sm:$0xff] (!%p197_p3)   ;;  %v1297_v6 = vld [vmem:[%s1619_s1 + $0x34] ss:$8 sps:$4 sm:$0xff] (!%p197_p3)   ;;  %p246_p4 = scmp.lt.s32.totalorder (!%p197_p3), %s1142_s26, 31  ;;  %v856_v49 = vshrl.u32 (!%p197_p3), %v855_v48, 7 }
   0x9   : > { %643 = vmatprep.subr.bf16.mxu0 (!%p197_p3), %v1291_v2  ;;  %1233 = vmatprep.subr.bf16.mxu1 (!%p197_p3), %v1291_v2  ;;  %v1299_v7 = vld [vmem:[%s1619_s1 + $0x30] ss:$8 sps:$4 sm:$0xff] (!%p197_p3)   ;;  %v1300_v8 = vld [vmem:[%s1619_s1 + $0x44] ss:$8 sps:$4 sm:$0xff] (!%p197_p3)   ;;  %v1302_v9 = vld [vmem:[%s1619_s1 + $0x40] ss:$8 sps:$4 sm:$0xff] (!%p197_p3)  }
   0xa   : > { %v1303_v10 = vld [vmem:[%s1619_s1 + $0x54] ss:$8 sps:$4 sm:$0xff] (!%p197_p3)   ;;  %v1305_v11 = vld [vmem:[%s1619_s1 + $0x50] ss:$8 sps:$4 sm:$0xff] (!%p197_p3)   ;;  %v1306_v12 = vld [vmem:[%s1619_s1 + $0x64] ss:$8 sps:$4 sm:$0xff] (!%p197_p3)  }
   0xb   : > { %v1308_v14 = vld [vmem:[%s1619_s1 + $0x60] ss:$8 sps:$4 sm:$0xff] (!%p197_p3)   ;;  %v1309_v16 = vld [vmem:[%s1619_s1 + $0x74] ss:$8 sps:$4 sm:$0xff] (!%p197_p3)   ;;  %v1311_v17 = vld [vmem:[%s1619_s1 + $0x70] ss:$8 sps:$4 sm:$0xff] (!%p197_p3)  }
   0xc   : > { %644 = vmatpush1.bf16.msra.mxu0 (!%p197_p3), %v1293_v3  ;;  %1249 = vmatpush1.bf16.msra.mxu1 (!%p197_p3), %v1293_v3  ;;  %v1312_v18 = vld [vmem:[%s1619_s1 + $0x84] ss:$8 sps:$4 sm:$0xff] (!%p197_p3)   ;;  %v1314_v19 = vld [vmem:[%s1619_s1 + $0x80] ss:$8 sps:$4 sm:$0xff] (!%p197_p3)   ;;  %v1315_v20 = vld [vmem:[%s1619_s1 + $0x94] ss:$8 sps:$4 sm:$0xff] (!%p197_p3)  }
   0xd   : > { %645 = vmatprep.subr.bf16.mxu0 (!%p197_p3), %v1294_v4  ;;  %1234 = vmatprep.subr.bf16.mxu1 (!%p197_p3), %v1294_v4  ;;  %v1317_v21 = vld [vmem:[%s1619_s1 + $0x90] ss:$8 sps:$4 sm:$0xff] (!%p197_p3)   ;;  %v1318_v22 = vld [vmem:[%s1619_s1 + $0xa4] ss:$8 sps:$4 sm:$0xff] (!%p197_p3)   ;;  %v1320_v23 = vld [vmem:[%s1619_s1 + $0xa0] ss:$8 sps:$4 sm:$0xff] (!%p197_p3)  }
   0xe   : > { %s1627_s26 = smov (!%p246_p4, %s1142_s26), 31  ;;  %v1321_v24 = vld [vmem:[%s1619_s1 + $0xb4] ss:$8 sps:$4 sm:$0xff]   ;;  %v1323_v25 = vld [vmem:[%s1619_s1 + $0xb0] ss:$8 sps:$4 sm:$0xff]   ;;  %v857_v50 = vsub.s32 0, %v856_v49 }
   0xf   : > { %s1214_s12 = sshll.u32 %s1627_s26, 3  ;;  %v1324_v26 = vld [vmem:[%s1619_s1 + $0xc4] ss:$8 sps:$4 sm:$0xff]   ;;  %v1326_v27 = vld [vmem:[%s1619_s1 + $0xc0] ss:$8 sps:$4 sm:$0xff]   ;;  %v861_v52 = vsub.s32 1, %v856_v49 }
  0x10   : > { %646 = vmatpush1.bf16.msra.mxu0 %v1296_v5  ;;  %1250 = vmatpush1.bf16.msra.mxu1 %v1296_v5  ;;  %s1469_s20 = scalar_lea.vmem %s1618_s0, %s1214_s12  ;;  %v1327_v28 = vld [vmem:[%s1619_s1 + $0xd4] ss:$8 sps:$4 sm:$0xff]   ;;  %v1329_v29 = vld [vmem:[%s1619_s1 + $0xd0] ss:$8 sps:$4 sm:$0xff]   ;;  %v1330_v30 = vld [vmem:[%s1619_s1 + $0xe4] ss:$8 sps:$4 sm:$0xff]   ;;  %s1563_s22 = scalar_lea.vmem %s1621_s3, %s1214_s12 }
  0x11   : > { %647 = vmatprep.subr.bf16.mxu0 %v1297_v6  ;;  %1235 = vmatprep.subr.bf16.mxu1 %v1297_v6  ;;  %v1338_v13 = vld [vmem:[%s1469_s20 + $0x4] ss:$8 sps:$4 sm:$0xff]   ;;  %v1332_v31 = vld [vmem:[%s1619_s1 + $0xe0] ss:$8 sps:$4 sm:$0xff]   ;;  %v1333_v32 = vld [vmem:[%s1619_s1 + $0xf4] ss:$8 sps:$4 sm:$0xff]  }
  0x12   : > { %v1341_v15 = vld [vmem:[%s1469_s20 + $0x44] ss:$8 sps:$4 sm:$0xff]   ;;  %673 = vmatprep.mubr.bf16.mxu0 %v1338_v13  ;;  %v1335_v33 = vld [vmem:[%s1619_s1 + $0xf0] ss:$8 sps:$4 sm:$0xff]   ;;  %v1336_v34 = vld [vmem:[%s1469_s20] ss:$8 sps:$4 sm:$0xff]  }
  0x13   : > { %713 = vmatprep.mubr.bf16.mxu1 %v1341_v15  ;;  %v1339_v35 = vld [vmem:[%s1469_s20 + $0x40] ss:$8 sps:$4 sm:$0xff]   ;;  %v1342_v36 = vld [vmem:[%s1469_s20 + $0x14] ss:$8 sps:$4 sm:$0xff]   ;;  %v1346_v38 = vld [vmem:[%s1469_s20 + $0x10] ss:$8 sps:$4 sm:$0xff]  }
  0x14   : > { %648 = vmatpush1.bf16.msra.mxu0 %v1299_v7  ;;  %1251 = vmatpush1.bf16.msra.mxu1 %v1299_v7  ;;  %v1344_v37 = vld [vmem:[%s1469_s20 + $0x54] ss:$8 sps:$4 sm:$0xff]   ;;  %v1347_v39 = vld [vmem:[%s1469_s20 + $0x50] ss:$8 sps:$4 sm:$0xff]   ;;  %v1348_v40 = vld [vmem:[%s1469_s20 + $0x24] ss:$8 sps:$4 sm:$0xff]  }
  0x15   : > { %649 = vmatprep.subr.bf16.mxu0 %v1300_v8  ;;  %1236 = vmatprep.subr.bf16.mxu1 %v1300_v8  ;;  %v1350_v41 = vld [vmem:[%s1469_s20 + $0x64] ss:$8 sps:$4 sm:$0xff]   ;;  %v1352_v42 = vld [vmem:[%s1469_s20 + $0x20] ss:$8 sps:$4 sm:$0xff]   ;;  %v1354_v44 = vld [vmem:[%s1469_s20 + $0x34] ss:$8 sps:$4 sm:$0xff]  }
  0x16   : > { %v1353_v43 = vld [vmem:[%s1469_s20 + $0x60] ss:$8 sps:$4 sm:$0xff]   ;;  %v1356_v45 = vld [vmem:[%s1469_s20 + $0x74] ss:$8 sps:$4 sm:$0xff]   ;;  %v1358_v46 = vld [vmem:[%s1469_s20 + $0x30] ss:$8 sps:$4 sm:$0xff]  }
  0x17   : > { %v1359_v47 = vld [vmem:[%s1469_s20 + $0x70] ss:$8 sps:$4 sm:$0xff]   ;;  %v853_v51 = vld [vmem:[%s1620_s2] sm:$0x3] }
  0x18   : > { %650 = vmatpush1.bf16.msra.mxu0 %v1302_v9  ;;  %1252 = vmatpush1.bf16.msra.mxu1 %v1302_v9  ;;  %v1550_v53 = vrot.slane %v853_v51, %v857_v50  ;;  %v1552_v54 = vrot.slane %v853_v51, %v861_v52 }
  0x19   : > { %651 = vmatprep.subr.bf16.mxu0 %v1303_v10  ;;  %1237 = vmatprep.subr.bf16.mxu1 %v1303_v10 }
  0x1c   : > { %652 = vmatpush1.bf16.msra.mxu0 %v1305_v11  ;;  %1253 = vmatpush1.bf16.msra.mxu1 %v1305_v11 }
  0x1d   : > { %653 = vmatprep.subr.bf16.mxu0 %v1306_v12  ;;  %1238 = vmatprep.subr.bf16.mxu1 %v1306_v12 }
  0x20   : > { %654 = vmatpush1.bf16.msra.mxu0 %v1308_v14  ;;  %1254 = vmatpush1.bf16.msra.mxu1 %v1308_v14 }
  0x21   : > { %655 = vmatprep.subr.bf16.mxu0 %v1309_v16  ;;  %1239 = vmatprep.subr.bf16.mxu1 %v1309_v16 }
  0x24   : > { %656 = vmatpush1.bf16.msra.mxu0 %v1311_v17  ;;  %1255 = vmatpush1.bf16.msra.mxu1 %v1311_v17 }
  0x25   : > { %657 = vmatprep.subr.bf16.mxu0 %v1312_v18  ;;  %1240 = vmatprep.subr.bf16.mxu1 %v1312_v18 }
  0x28   : > { %658 = vmatpush1.bf16.msra.mxu0 %v1314_v19  ;;  %1256 = vmatpush1.bf16.msra.mxu1 %v1314_v19 }
  0x29   : > { %659 = vmatprep.subr.bf16.mxu0 %v1315_v20  ;;  %1241 = vmatprep.subr.bf16.mxu1 %v1315_v20 }
  0x2c   : > { %660 = vmatpush1.bf16.msra.mxu0 %v1317_v21  ;;  %1257 = vmatpush1.bf16.msra.mxu1 %v1317_v21 }
  0x2d   : > { %661 = vmatprep.subr.bf16.mxu0 %v1318_v22  ;;  %1242 = vmatprep.subr.bf16.mxu1 %v1318_v22 }
  0x30   : > { %662 = vmatpush1.bf16.msra.mxu0 %v1320_v23  ;;  %1258 = vmatpush1.bf16.msra.mxu1 %v1320_v23 }
  0x31   : > { %663 = vmatprep.subr.bf16.mxu0 %v1321_v24  ;;  %1243 = vmatprep.subr.bf16.mxu1 %v1321_v24 }
  0x34   : > { %664 = vmatpush1.bf16.msra.mxu0 %v1323_v25  ;;  %1259 = vmatpush1.bf16.msra.mxu1 %v1323_v25 }
  0x35   : > { %665 = vmatprep.subr.bf16.mxu0 %v1324_v26  ;;  %1244 = vmatprep.subr.bf16.mxu1 %v1324_v26 }
  0x38   : > { %666 = vmatpush1.bf16.msra.mxu0 %v1326_v27  ;;  %1260 = vmatpush1.bf16.msra.mxu1 %v1326_v27 }
  0x39   : > { %667 = vmatprep.subr.bf16.mxu0 %v1327_v28  ;;  %1245 = vmatprep.subr.bf16.mxu1 %v1327_v28 }
  0x3c   : > { %668 = vmatpush1.bf16.msra.mxu0 %v1329_v29  ;;  %1261 = vmatpush1.bf16.msra.mxu1 %v1329_v29 }
  0x3d   : > { %669 = vmatprep.subr.bf16.mxu0 %v1330_v30  ;;  %1246 = vmatprep.subr.bf16.mxu1 %v1330_v30 }
  0x40   : > { %670 = vmatpush1.bf16.msra.mxu0 %v1332_v31  ;;  %1262 = vmatpush1.bf16.msra.mxu1 %v1332_v31 }
  0x41   : > { %671 = vmatprep.subr.bf16.mxu0 %v1333_v32  ;;  %1247 = vmatprep.subr.bf16.mxu1 %v1333_v32 }
  0x44   : > { %672 = vmatpush1.bf16.msra.mxu0 %v1335_v33  ;;  %1263 = vmatpush1.bf16.msra.mxu1 %v1335_v33 }
  0x47   : > { %674 = vmatmul.mubr.bf16.vlgmr.msra.gmra.mrb[0].mxu0 %v1336_v34  ;;  %714 = vmatmul.mubr.bf16.vlgmr.msra.gmra.mrb[0].mxu1 %v1339_v35 }
  0x48   : > { %683 = vmatprep.mubr.bf16.mxu0 %v1342_v36  ;;  %723 = vmatprep.mubr.bf16.mxu1 %v1344_v37 }
  0x4f   : > { %684 = vmatmul.mubr.bf16.gmra.mrb[4].mxu0 %v1346_v38  ;;  %724 = vmatmul.mubr.bf16.gmra.mrb[4].mxu1 %v1347_v39 }
  0x50   : > { %693 = vmatprep.mubr.bf16.mxu0 %v1348_v40  ;;  %733 = vmatprep.mubr.bf16.mxu1 %v1350_v41 }
  0x57   : > { %694 = vmatmul.mubr.bf16.gmra.mrb[8].mxu0 %v1352_v42  ;;  %734 = vmatmul.mubr.bf16.gmra.mrb[8].mxu1 %v1353_v43 }
  0x58   : > { %703 = vmatprep.mubr.bf16.mxu0 %v1354_v44  ;;  %743 = vmatprep.mubr.bf16.mxu1 %v1356_v45 }
  0x5f   : > { %704 = vmatmul.mubr.bf16.gmra.mrb[12].mxu0 %v1358_v46  ;;  %744 = vmatmul.mubr.bf16.gmra.mrb[12].mxu1 %v1359_v47 }
 0x11a   : > { %v675_v55 = vpop.f32.mrb[0].mxu0  ;;  %v715_v56 = vpop.f32.mrb[0].mxu1 }
 0x11b   : > { %v865_v57 = vadd.f32 %v1550_v53, %v675_v55  ;;  %v881_v58 = vadd.f32 %v1550_v53, %v715_v56  ;;  %v677_v59 = vpop.f32.mrb[1].mxu0  ;;  %v717_v60 = vpop.f32.mrb[1].mxu1 }
 0x11c   : > { %v866_v61 = vadd.f32 %v1552_v54, %v677_v59  ;;  %v882_v62 = vadd.f32 %v1552_v54, %v717_v60  ;;  %v679_v63 = vpop.f32.mrb[2].mxu0  ;;  %v719_v0 = vpop.f32.mrb[2].mxu1 }
 0x11d   : > { %v867_v1 = vadd.f32 %v1550_v53, %v679_v63  ;;  %v883_v2 = vadd.f32 %v1550_v53, %v719_v0  ;;  %v681_v3 = vpop.f32.mrb[3].mxu0  ;;  %v721_v4 = vpop.f32.mrb[3].mxu1 }
 0x11e   : > { %v1216_v5 = vpack.c.bf16 %v866_v61, %v865_v57  ;;  %v1224_v6 = vpack.c.bf16 %v882_v62, %v881_v58  ;;  %v868_v7 = vadd.f32 %v1552_v54, %v681_v3  ;;  %v884_v8 = vadd.f32 %v1552_v54, %v721_v4 }
 0x120   : > { %993 = vst [vmem:[%s1563_s22] sm:$0xff] %v1216_v5  ;;  %1001 = vst [vmem:[%s1563_s22 + $0x40] sm:$0xff] %v1224_v6  ;;  %v1217_v9 = vpack.c.bf16 %v868_v7, %v867_v1  ;;  %v1225_v10 = vpack.c.bf16 %v884_v8, %v883_v2 }
 0x122   : > { %994 = vst [vmem:[%s1563_s22 + $0x8] sm:$0xff] %v1217_v9  ;;  %1002 = vst [vmem:[%s1563_s22 + $0x48] sm:$0xff] %v1225_v10  ;;  %v685_v11 = vpop.f32.mrb[4].mxu0  ;;  %v725_v12 = vpop.f32.mrb[4].mxu1 }
 0x123   : > { %v869_v13 = vadd.f32 %v1550_v53, %v685_v11  ;;  %v885_v14 = vadd.f32 %v1550_v53, %v725_v12  ;;  %v687_v15 = vpop.f32.mrb[5].mxu0  ;;  %v727_v16 = vpop.f32.mrb[5].mxu1 }
 0x124   : > { %v870_v17 = vadd.f32 %v1552_v54, %v687_v15  ;;  %v886_v18 = vadd.f32 %v1552_v54, %v727_v16  ;;  %v689_v19 = vpop.f32.mrb[6].mxu0  ;;  %v729_v20 = vpop.f32.mrb[6].mxu1 }
 0x125   : > { %v871_v21 = vadd.f32 %v1550_v53, %v689_v19  ;;  %v887_v22 = vadd.f32 %v1550_v53, %v729_v20  ;;  %v691_v23 = vpop.f32.mrb[7].mxu0  ;;  %v731_v24 = vpop.f32.mrb[7].mxu1 }
 0x126   : > { %v1218_v25 = vpack.c.bf16 %v870_v17, %v869_v13  ;;  %v1226_v26 = vpack.c.bf16 %v886_v18, %v885_v14  ;;  %v872_v27 = vadd.f32 %v1552_v54, %v691_v23  ;;  %v888_v28 = vadd.f32 %v1552_v54, %v731_v24 }
 0x128   : > { %995 = vst [vmem:[%s1563_s22 + $0x10] sm:$0xff] %v1218_v25  ;;  %1003 = vst [vmem:[%s1563_s22 + $0x50] sm:$0xff] %v1226_v26  ;;  %v1219_v29 = vpack.c.bf16 %v872_v27, %v871_v21  ;;  %v1227_v30 = vpack.c.bf16 %v888_v28, %v887_v22 }
 0x12a   : > { %996 = vst [vmem:[%s1563_s22 + $0x18] sm:$0xff] %v1219_v29  ;;  %1004 = vst [vmem:[%s1563_s22 + $0x58] sm:$0xff] %v1227_v30  ;;  %v695_v31 = vpop.f32.mrb[8].mxu0  ;;  %v735_v32 = vpop.f32.mrb[8].mxu1 }
 0x12b   : > { %v873_v33 = vadd.f32 %v1550_v53, %v695_v31  ;;  %v889_v34 = vadd.f32 %v1550_v53, %v735_v32  ;;  %v697_v35 = vpop.f32.mrb[9].mxu0  ;;  %v737_v36 = vpop.f32.mrb[9].mxu1 }
 0x12c   : > { %v874_v37 = vadd.f32 %v1552_v54, %v697_v35  ;;  %v890_v38 = vadd.f32 %v1552_v54, %v737_v36  ;;  %v699_v39 = vpop.f32.mrb[10].mxu0  ;;  %v739_v40 = vpop.f32.mrb[10].mxu1 }
 0x12d   : > { %v875_v41 = vadd.f32 %v1550_v53, %v699_v39  ;;  %v891_v42 = vadd.f32 %v1550_v53, %v739_v40  ;;  %v701_v43 = vpop.f32.mrb[11].mxu0  ;;  %v741_v44 = vpop.f32.mrb[11].mxu1 }
 0x12e   : > { %v1220_v45 = vpack.c.bf16 %v874_v37, %v873_v33  ;;  %v1228_v46 = vpack.c.bf16 %v890_v38, %v889_v34  ;;  %v876_v47 = vadd.f32 %v1552_v54, %v701_v43  ;;  %v892_v48 = vadd.f32 %v1552_v54, %v741_v44 }
 0x130   : > { %997 = vst [vmem:[%s1563_s22 + $0x20] sm:$0xff] %v1220_v45  ;;  %1005 = vst [vmem:[%s1563_s22 + $0x60] sm:$0xff] %v1228_v46  ;;  %v1221_v49 = vpack.c.bf16 %v876_v47, %v875_v41  ;;  %v1229_v50 = vpack.c.bf16 %v892_v48, %v891_v42 }
 0x132   : > { %998 = vst [vmem:[%s1563_s22 + $0x28] sm:$0xff] %v1221_v49  ;;  %1006 = vst [vmem:[%s1563_s22 + $0x68] sm:$0xff] %v1229_v50  ;;  %v705_v51 = vpop.f32.mrb[12].mxu0  ;;  %v745_v52 = vpop.f32.mrb[12].mxu1 }
 0x133   : > { %v877_v55 = vadd.f32 %v1550_v53, %v705_v51  ;;  %v893_v56 = vadd.f32 %v1550_v53, %v745_v52  ;;  %v707_v57 = vpop.f32.mrb[13].mxu0  ;;  %v747_v58 = vpop.f32.mrb[13].mxu1 }
 0x134   : > { %v878_v59 = vadd.f32 %v1552_v54, %v707_v57  ;;  %v894_v60 = vadd.f32 %v1552_v54, %v747_v58  ;;  %v709_v61 = vpop.f32.mrb[14].mxu0  ;;  %v749_v62 = vpop.f32.mrb[14].mxu1 }
 0x135   : > { %v879_v63 = vadd.f32 %v1550_v53, %v709_v61  ;;  %v895_v0 = vadd.f32 %v1550_v53, %v749_v62  ;;  %v711_v1 = vpop.f32.mrb[15].mxu0  ;;  %v751_v2 = vpop.f32.mrb[15].mxu1 }
 0x136   : > { %v1222_v3 = vpack.c.bf16 %v878_v59, %v877_v55  ;;  %v1230_v4 = vpack.c.bf16 %v894_v60, %v893_v56  ;;  %v880_v5 = vadd.f32 %v1552_v54, %v711_v1  ;;  %v896_v6 = vadd.f32 %v1552_v54, %v751_v2 }
 0x138   : > { %999 = vst [vmem:[%s1563_s22 + $0x30] sm:$0xff] %v1222_v3  ;;  %1007 = vst [vmem:[%s1563_s22 + $0x70] sm:$0xff] %v1230_v4  ;;  %v1223_v7 = vpack.c.bf16 %v880_v5, %v879_v63  ;;  %v1231_v8 = vpack.c.bf16 %v896_v6, %v895_v0 }
 0x13a   : > { %1000 = vst [vmem:[%s1563_s22 + $0x38] sm:$0xff] %v1223_v7  ;;  %1008 = vst [vmem:[%s1563_s22 + $0x78] sm:$0xff] %v1231_v8 }
 0x13b PF: > { %s13_s14 = sadd.s32 1, %s1382_s14   ;;  %s1622_s12 = smov %s1378_s13 }
 0x13c   : > { %p10_p5 = scmp.ge.s32.totalorder %s13_s14, 4   ;;  %s1623_s13 = smov %s1625_s15 }
 0x13e   :  { %12 = sbr.rel (!%p10_p5) target bundleno = 2 (0x2), region = 76 }

</bundles_post_ra>
